<compile_context>
chip_gen: v6e
topology: v6e:2x2x1
jax: 0.10.0
libtpu: 0.0.40
codegen_flags: <defaults>
</compile_context>

<pallas_src>
import functools

import jax
import jax.numpy as jnp
from jax import lax
from jax.experimental import pallas as pl
from jax.experimental.pallas import tpu as pltpu


def _round_up(x, m):
    return ((x + m - 1) // m) * m


# ----------------------------------------------------------------------------
# Fused kernel: all LSTM layers + FC epilogue, everything resident in VMEM.
# ----------------------------------------------------------------------------
def _make_fused_kernel(num_layers, T, Bp, Hp):
    G = 4 * Hp

    def kernel(*refs):
        # ---- unpack refs -----------------------------------------------------
        x_ref = refs[0]            # (T*Bp, F)   time-major, batch-padded, flat
        s_ref = refs[1]            # (Bp, S)     static features, batch-padded
        k = 2
        layers = []
        for _ in range(num_layers):
            # w_ih_t: (F_in, 4Hp), w_hh_t: (Hp, 4Hp), b: (1, 4Hp)
            layers.append((refs[k], refs[k + 1], refs[k + 2]))
            k += 3
        w_fc_h_ref = refs[k]       # (Hp, Op)
        w_fc_s_ref = refs[k + 1]   # (S, Op)
        b_fc_ref = refs[k + 2]     # (1, Op)
        out_ref = refs[k + 3]      # (Bp, Op)
        hseq_scr = refs[k + 4]     # (T*Bp, Hp)   inter-layer hidden sequence
        gx_scr = refs[k + 5]       # (T*Bp, 4Hp)  hoisted input projection
        h_scr = refs[k + 6]        # (Bp, Hp)
        c_scr = refs[k + 7]        # (Bp, Hp)

        for l, (w_ih_t_ref, w_hh_t_ref, b_ref) in enumerate(layers):
            # Hoisted input projection + bias: ONE MXU matmul for all timesteps.
            layer_in = x_ref[...] if l == 0 else hseq_scr[...]
            gx_scr[...] = (
                jnp.dot(layer_in, w_ih_t_ref[...],
                        preferred_element_type=jnp.float32)
                + b_ref[...]
            )

            h_scr[...] = jnp.zeros_like(h_scr)
            c_scr[...] = jnp.zeros_like(c_scr)
            w_hh_t = w_hh_t_ref[...]          # load recurrent weights once
            is_last = l == num_layers - 1

            # T is small and static: fully unrolled recurrence (static slices).
            for t in range(T):
                row = pl.ds(t * Bp, Bp)
                gates = (
                    jnp.dot(h_scr[...], w_hh_t,
                            preferred_element_type=jnp.float32)
                    + gx_scr[row, :]
                )                                           # (Bp, 4Hp)
                i_g = jax.nn.sigmoid(gates[:, 0 * Hp:1 * Hp])
                f_g = jax.nn.sigmoid(gates[:, 1 * Hp:2 * Hp])
                g_g = jnp.tanh(gates[:, 2 * Hp:3 * Hp])
                o_g = jax.nn.sigmoid(gates[:, 3 * Hp:4 * Hp])
                c_new = f_g * c_scr[...] + i_g * g_g
                h_new = o_g * jnp.tanh(c_new)
                c_scr[...] = c_new
                h_scr[...] = h_new
                if not is_last:
                    # Only intermediate layers need the full hidden sequence.
                    hseq_scr[row, :] = h_new

        # FC epilogue on the last hidden state: out = [h_last, x_static] @ W^T + b
        out_ref[...] = (
            jnp.dot(h_scr[...], w_fc_h_ref[...],
                    preferred_element_type=jnp.float32)
            + jnp.dot(s_ref[...], w_fc_s_ref[...],
                      preferred_element_type=jnp.float32)
            + b_fc_ref[...]
        ).astype(out_ref.dtype)

    return kernel


# ----------------------------------------------------------------------------
# Parameter preparation: pad to lane-dense shapes and pre-transpose (one-time).
# ----------------------------------------------------------------------------
def _pad_gate_rows(w, H, Hp):
    """Pad the 4H gate-blocked leading axis [i,f,g,o] to 4Hp with zeros."""
    w4 = w.reshape((4, H) + w.shape[1:])
    pad = [(0, 0), (0, Hp - H)] + [(0, 0)] * (w.ndim - 1)
    return jnp.pad(w4, pad).reshape((4 * Hp,) + w.shape[1:])


def prepare_params(params):
    """Pad/transpose PyTorch-layout LSTM + FC weights for the fused kernel."""
    w_hh0 = params["lstm"][0]["w_hh"]
    H = w_hh0.shape[1]
    Hp = _round_up(H, 128)
    out_size = params["fc_w"].shape[0]
    Op = _round_up(out_size, 128)

    prep = {"lstm": []}
    for l, layer in enumerate(params["lstm"]):
        w_ih = _pad_gate_rows(layer["w_ih"], H, Hp)         # (4Hp, in)
        if l > 0:                                           # input is padded h
            w_ih = jnp.pad(w_ih, ((0, 0), (0, Hp - H)))     # (4Hp, Hp)
        w_hh = _pad_gate_rows(layer["w_hh"], H, Hp)         # (4Hp, H)
        w_hh = jnp.pad(w_hh, ((0, 0), (0, Hp - H)))         # (4Hp, Hp)
        b = _pad_gate_rows(layer["b"], H, Hp)               # (4Hp,)
        prep["lstm"].append({
            "w_ih_t": w_ih.T,                               # (in, 4Hp)
            "w_hh_t": w_hh.T,                               # (Hp, 4Hp)
            "b": b.reshape(1, 4 * Hp),
        })

    w_fc = params["fc_w"]                                   # (out, H + S)
    w_h = jnp.pad(w_fc[:, :H], ((0, Op - out_size), (0, Hp - H)))   # (Op, Hp)
    w_s = jnp.pad(w_fc[:, H:], ((0, Op - out_size), (0, 0)))        # (Op, S)
    b_fc = jnp.pad(params["fc_b"], ((0, Op - out_size),))
    prep["w_fc_h_t"] = w_h.T                                # (Hp, Op)
    prep["w_fc_s_t"] = w_s.T                                # (S, Op)
    prep["b_fc"] = b_fc.reshape(1, Op)
    return prep


# ----------------------------------------------------------------------------
# Full ExampleLSTM forward (single fused pallas_call)
# ----------------------------------------------------------------------------
@functools.partial(jax.jit, static_argnames=("output_size",))
def example_lstm_forward(x_ts, x_static, prep, *, output_size):
    """x_ts: (B, T, n_ts_inputs) batch-first, x_static: (B, n_static_inputs).
    Returns (B, output_size)."""
    # TODO(synk): the dataset-specific transforms (transform_ts_inputs_to_dekadal,
    # transform_stack_ts_static_inputs) are data plumbing with no tensor-op
    # equivalent here; inputs are assumed already in x['ts'] / x['static'] form.
    B, T, F = x_ts.shape
    num_layers = len(prep["lstm"])
    Hp = prep["lstm"][0]["w_hh_t"].shape[0]
    Op = prep["w_fc_h_t"].shape[1]
    Bp = _round_up(B, 8)

    # time-major, zero-pad batch to a full sublane group, flatten (T, Bp) rows
    x_tm = jnp.transpose(x_ts, (1, 0, 2)).astype(jnp.float32)      # (T, B, F)
    x_tm = jnp.pad(x_tm, ((0, 0), (0, Bp - B), (0, 0)))            # (T, Bp, F)
    x2d = x_tm.reshape(T * Bp, F)
    s_p = jnp.pad(x_static.astype(jnp.float32), ((0, Bp - B), (0, 0)))

    inputs = [x2d, s_p]
    for layer in prep["lstm"]:
        inputs += [layer["w_ih_t"], layer["w_hh_t"], layer["b"]]
    inputs += [prep["w_fc_h_t"], prep["w_fc_s_t"], prep["b_fc"]]

    kernel = _make_fused_kernel(num_layers, T, Bp, Hp)
    out_p = pl.pallas_call(
        kernel,
        out_shape=jax.ShapeDtypeStruct((Bp, Op), jnp.float32),
        scratch_shapes=[
            pltpu.VMEM((T * Bp, Hp), jnp.float32),       # inter-layer h sequence
            pltpu.VMEM((T * Bp, 4 * Hp), jnp.float32),   # hoisted gate projections
            pltpu.VMEM((Bp, Hp), jnp.float32),           # h state
            pltpu.VMEM((Bp, Hp), jnp.float32),           # c state
        ],
    )(*inputs)
    return out_p[:B, :output_size]


# ----------------------------------------------------------------------------
# Pure-JAX reference (for correctness check)
# ----------------------------------------------------------------------------
def reference_forward(x_ts, x_static, params):
    x = jnp.transpose(x_ts, (1, 0, 2))  # (T, B, F)
    for layer in params["lstm"]:
        H = layer["w_hh"].shape[1]
        B = x.shape[1]

        def step(carry, x_t, layer=layer, H=H):
            h, c = carry
            gates = x_t @ layer["w_ih"].T + h @ layer["w_hh"].T + layer["b"]
            i = jax.nn.sigmoid(gates[:, :H])
            f = jax.nn.sigmoid(gates[:, H:2 * H])
            g = jnp.tanh(gates[:, 2 * H:3 * H])
            o = jax.nn.sigmoid(gates[:, 3 * H:])
            c = f * c + i * g
            h = o * jnp.tanh(c)
            return (h, c), h

        init = (jnp.zeros((B, H), jnp.float32), jnp.zeros((B, H), jnp.float32))
        _, x = lax.scan(step, init, x)
    h_last = x[-1]
    feat = jnp.concatenate([h_last, x_static], axis=1)
    return feat @ params["fc_w"].T + params["fc_b"]


# ----------------------------------------------------------------------------
# Deterministic parameter init (PyTorch-style uniform(-1/sqrt(H), 1/sqrt(H)))
# ----------------------------------------------------------------------------
def init_params(key, n_ts_inputs, n_static_inputs, hidden_size, num_layers,
                output_size):
    params = {"lstm": []}
    bound = 1.0 / jnp.sqrt(hidden_size)
    for l in range(num_layers):
        in_size = n_ts_inputs if l == 0 else hidden_size
        key, k1, k2, k3, k4 = jax.random.split(key, 5)
        w_ih = jax.random.uniform(k1, (4 * hidden_size, in_size),
                                  jnp.float32, -bound, bound)
        w_hh = jax.random.uniform(k2, (4 * hidden_size, hidden_size),
                                  jnp.float32, -bound, bound)
        b_ih = jax.random.uniform(k3, (4 * hidden_size,), jnp.float32, -bound, bound)
        b_hh = jax.random.uniform(k4, (4 * hidden_size,), jnp.float32, -bound, bound)
        params["lstm"].append({
            "w_ih": w_ih,
            "w_hh": w_hh,
            "b": b_ih + b_hh,      # combined bias (4H,)
        })
    fc_in = hidden_size + n_static_inputs
    fc_bound = 1.0 / jnp.sqrt(fc_in)
    key, k1, k2 = jax.random.split(key, 3)
    params["fc_w"] = jax.random.uniform(k1, (output_size, fc_in),
                                        jnp.float32, -fc_bound, fc_bound)
    params["fc_b"] = jax.random.uniform(k2, (output_size,),
                                        jnp.float32, -fc_bound, fc_bound)
    return params


if __name__ == "__main__":
    # Small synthetic shapes consistent with the module's forward:
    B, T = 2, 8
    n_ts_inputs, n_static_inputs = 6, 4
    hidden_size, num_layers, output_size = 32, 2, 1

    key = jax.random.PRNGKey(0)
    key, kx, ks, kp = jax.random.split(key, 4)
    x_ts = jax.random.normal(kx, (B, T, n_ts_inputs), jnp.float32)
    x_static = jax.random.normal(ks, (B, n_static_inputs), jnp.float32)
    params = init_params(kp, n_ts_inputs, n_static_inputs,
                         hidden_size, num_layers, output_size)

    prep = prepare_params(params)           # one-time pad / pre-transpose
    out = example_lstm_forward(x_ts, x_static, prep, output_size=output_size)
    out = jax.block_until_ready(out)
    assert out.shape == (B, output_size), out.shape

    ref = reference_forward(x_ts, x_static, params)
    assert jnp.allclose(out, ref, atol=1e-4, rtol=1e-4), (out, ref)

    print("KERNEL_OK")
</pallas_src>

<mosaic_0001>
module attributes {stable_mosaic.version = 11 : i64} {
  func.func @kernel(%arg0: memref<64x6xf32, #tpu.memory_space<vmem>>, %arg1: memref<8x4xf32, #tpu.memory_space<vmem>>, %arg2: memref<6x512xf32, #tpu.memory_space<vmem>>, %arg3: memref<128x512xf32, #tpu.memory_space<vmem>>, %arg4: memref<1x512xf32, #tpu.memory_space<vmem>>, %arg5: memref<128x512xf32, #tpu.memory_space<vmem>>, %arg6: memref<128x512xf32, #tpu.memory_space<vmem>>, %arg7: memref<1x512xf32, #tpu.memory_space<vmem>>, %arg8: memref<128x128xf32, #tpu.memory_space<vmem>>, %arg9: memref<4x128xf32, #tpu.memory_space<vmem>>, %arg10: memref<1x128xf32, #tpu.memory_space<vmem>>, %arg11: memref<8x128xf32, #tpu.memory_space<vmem>>, %arg12: memref<64x128xf32, #tpu.memory_space<vmem>>, %arg13: memref<64x512xf32, #tpu.memory_space<vmem>>, %arg14: memref<8x128xf32, #tpu.memory_space<vmem>>, %arg15: memref<8x128xf32, #tpu.memory_space<vmem>>) attributes {dimension_semantics = [], scalar_prefetch = 0 : i64, scratch_operands = 4 : i64, tpu.core_type = #tpu.core_type<tc>} {
    %c0 = arith.constant 0 : index
    %c0_0 = arith.constant 0 : index
    %0 = vector.load %arg0[%c0, %c0_0] : memref<64x6xf32, #tpu.memory_space<vmem>>, vector<64x6xf32>
    %c0_1 = arith.constant 0 : index
    %c0_2 = arith.constant 0 : index
    %1 = vector.load %arg2[%c0_1, %c0_2] : memref<6x512xf32, #tpu.memory_space<vmem>>, vector<6x512xf32>
    %cst = arith.constant dense<0.000000e+00> : vector<64x512xf32>
    %2 = tpu.matmul %0, %1, %cst {dimension_numbers = #tpu.dot_dimension_numbers<[1], [0], [0], [1], [0, 0, 1, 1], [], []>} : vector<64x6xf32>, vector<6x512xf32>, vector<64x512xf32> -> vector<64x512xf32>
    %c0_3 = arith.constant 0 : index
    %c0_4 = arith.constant 0 : index
    %3 = vector.load %arg4[%c0_3, %c0_4] : memref<1x512xf32, #tpu.memory_space<vmem>>, vector<1x512xf32>
    %4 = vector.broadcast %3 : vector<1x512xf32> to vector<64x512xf32>
    %5 = arith.addf %2, %4 : vector<64x512xf32>
    %c0_5 = arith.constant 0 : index
    %c0_6 = arith.constant 0 : index
    %6 = vector.load %arg13[%c0_5, %c0_6] : memref<64x512xf32, #tpu.memory_space<vmem>>, vector<64x512xf32>
    tpu.vector_store %arg13[%c0_5, %c0_6], %5 {strides = array<i32>} : memref<64x512xf32, #tpu.memory_space<vmem>>, vector<64x512xf32>,
    %cst_7 = arith.constant 0.000000e+00 : f32
    %7 = vector.broadcast %cst_7 : f32 to vector<8x128xf32>
    %c0_8 = arith.constant 0 : index
    %c0_9 = arith.constant 0 : index
    %8 = vector.load %arg14[%c0_8, %c0_9] : memref<8x128xf32, #tpu.memory_space<vmem>>, vector<8x128xf32>
    tpu.vector_store %arg14[%c0_8, %c0_9], %7 {strides = array<i32>} : memref<8x128xf32, #tpu.memory_space<vmem>>, vector<8x128xf32>,
    %cst_10 = arith.constant 0.000000e+00 : f32
    %9 = vector.broadcast %cst_10 : f32 to vector<8x128xf32>
    %c0_11 = arith.constant 0 : index
    %c0_12 = arith.constant 0 : index
    %10 = vector.load %arg15[%c0_11, %c0_12] : memref<8x128xf32, #tpu.memory_space<vmem>>, vector<8x128xf32>
    tpu.vector_store %arg15[%c0_11, %c0_12], %9 {strides = array<i32>} : memref<8x128xf32, #tpu.memory_space<vmem>>, vector<8x128xf32>,
    %c0_13 = arith.constant 0 : index
    %c0_14 = arith.constant 0 : index
    %11 = vector.load %arg3[%c0_13, %c0_14] : memref<128x512xf32, #tpu.memory_space<vmem>>, vector<128x512xf32>
    %c0_15 = arith.constant 0 : index
    %c0_16 = arith.constant 0 : index
    %12 = vector.load %arg14[%c0_15, %c0_16] : memref<8x128xf32, #tpu.memory_space<vmem>>, vector<8x128xf32>
    %cst_17 = arith.constant dense<0.000000e+00> : vector<8x512xf32>
    %13 = tpu.matmul %12, %11, %cst_17 {dimension_numbers = #tpu.dot_dimension_numbers<[1], [0], [0], [1], [0, 0, 1, 1], [], []>} : vector<8x128xf32>, vector<128x512xf32>, vector<8x512xf32> -> vector<8x512xf32>
    %c0_18 = arith.constant 0 : index
    %c0_19 = arith.constant 0 : index
    %14 = vector.load %arg13[%c0_18, %c0_19] : memref<64x512xf32, #tpu.memory_space<vmem>>, vector<8x512xf32>
    %15 = arith.addf %13, %14 : vector<8x512xf32>
    %16 = vector.extract_strided_slice %15 {offsets = [0, 0], sizes = [8, 128], strides = [1, 1]} : vector<8x512xf32> to vector<8x128xf32>
    %17 = arith.negf %16 : vector<8x128xf32>
    %18 = math.exp %17 : vector<8x128xf32>
    %cst_20 = arith.constant 1.000000e+00 : f32
    %19 = vector.broadcast %cst_20 : f32 to vector<8x128xf32>
    %20 = arith.addf %19, %18 : vector<8x128xf32>
    %21 = arith.divf %19, %20 : vector<8x128xf32>
    %22 = vector.extract_strided_slice %15 {offsets = [0, 128], sizes = [8, 128], strides = [1, 1]} : vector<8x512xf32> to vector<8x128xf32>
    %23 = arith.negf %22 : vector<8x128xf32>
    %24 = math.exp %23 : vector<8x128xf32>
    %cst_21 = arith.constant 1.000000e+00 : f32
    %25 = vector.broadcast %cst_21 : f32 to vector<8x128xf32>
    %26 = arith.addf %25, %24 : vector<8x128xf32>
    %27 = arith.divf %25, %26 : vector<8x128xf32>
    %28 = vector.extract_strided_slice %15 {offsets = [0, 256], sizes = [8, 128], strides = [1, 1]} : vector<8x512xf32> to vector<8x128xf32>
    %29 = math.tanh %28 : vector<8x128xf32>
    %30 = vector.extract_strided_slice %15 {offsets = [0, 384], sizes = [8, 128], strides = [1, 1]} : vector<8x512xf32> to vector<8x128xf32>
    %31 = arith.negf %30 : vector<8x128xf32>
    %32 = math.exp %31 : vector<8x128xf32>
    %cst_22 = arith.constant 1.000000e+00 : f32
    %33 = vector.broadcast %cst_22 : f32 to vector<8x128xf32>
    %34 = arith.addf %33, %32 : vector<8x128xf32>
    %35 = arith.divf %33, %34 : vector<8x128xf32>
    %c0_23 = arith.constant 0 : index
    %c0_24 = arith.constant 0 : index
    %36 = vector.load %arg15[%c0_23, %c0_24] : memref<8x128xf32, #tpu.memory_space<vmem>>, vector<8x128xf32>
    %37 = arith.mulf %27, %36 : vector<8x128xf32>
    %38 = arith.mulf %21, %29 : vector<8x128xf32>
    %39 = arith.addf %37, %38 : vector<8x128xf32>
    %40 = math.tanh %39 : vector<8x128xf32>
    %41 = arith.mulf %35, %40 : vector<8x128xf32>
    %c0_25 = arith.constant 0 : index
    %c0_26 = arith.constant 0 : index
    %42 = vector.load %arg15[%c0_25, %c0_26] : memref<8x128xf32, #tpu.memory_space<vmem>>, vector<8x128xf32>
    tpu.vector_store %arg15[%c0_25, %c0_26], %39 {strides = array<i32>} : memref<8x128xf32, #tpu.memory_space<vmem>>, vector<8x128xf32>,
    %c0_27 = arith.constant 0 : index
    %c0_28 = arith.constant 0 : index
    %43 = vector.load %arg14[%c0_27, %c0_28] : memref<8x128xf32, #tpu.memory_space<vmem>>, vector<8x128xf32>
    tpu.vector_store %arg14[%c0_27, %c0_28], %41 {strides = array<i32>} : memref<8x128xf32, #tpu.memory_space<vmem>>, vector<8x128xf32>,
    %c0_29 = arith.constant 0 : index
    %c0_30 = arith.constant 0 : index
    %44 = vector.load %arg12[%c0_29, %c0_30] : memref<64x128xf32, #tpu.memory_space<vmem>>, vector<8x128xf32>
    tpu.vector_store %arg12[%c0_29, %c0_30], %41 {strides = array<i32>} : memref<64x128xf32, #tpu.memory_space<vmem>>, vector<8x128xf32>,
    %c0_31 = arith.constant 0 : index
    %c0_32 = arith.constant 0 : index
    %45 = vector.load %arg14[%c0_31, %c0_32] : memref<8x128xf32, #tpu.memory_space<vmem>>, vector<8x128xf32>
    %cst_33 = arith.constant dense<0.000000e+00> : vector<8x512xf32>
    %46 = tpu.matmul %45, %11, %cst_33 {dimension_numbers = #tpu.dot_dimension_numbers<[1], [0], [0], [1], [0, 0, 1, 1], [], []>} : vector<8x128xf32>, vector<128x512xf32>, vector<8x512xf32> -> vector<8x512xf32>
    %c8 = arith.constant 8 : index
    %c0_34 = arith.constant 0 : index
    %47 = vector.load %arg13[%c8, %c0_34] : memref<64x512xf32, #tpu.memory_space<vmem>>, vector<8x512xf32>
    %48 = arith.addf %46, %47 : vector<8x512xf32>
    %49 = vector.extract_strided_slice %48 {offsets = [0, 0], sizes = [8, 128], strides = [1, 1]} : vector<8x512xf32> to vector<8x128xf32>
    %50 = arith.negf %49 : vector<8x128xf32>
    %51 = math.exp %50 : vector<8x128xf32>
    %cst_35 = arith.constant 1.000000e+00 : f32
    %52 = vector.broadcast %cst_35 : f32 to vector<8x128xf32>
    %53 = arith.addf %52, %51 : vector<8x128xf32>
    %54 = arith.divf %52, %53 : vector<8x128xf32>
    %55 = vector.extract_strided_slice %48 {offsets = [0, 128], sizes = [8, 128], strides = [1, 1]} : vector<8x512xf32> to vector<8x128xf32>
    %56 = arith.negf %55 : vector<8x128xf32>
    %57 = math.exp %56 : vector<8x128xf32>
    %cst_36 = arith.constant 1.000000e+00 : f32
    %58 = vector.broadcast %cst_36 : f32 to vector<8x128xf32>
    %59 = arith.addf %58, %57 : vector<8x128xf32>
    %60 = arith.divf %58, %59 : vector<8x128xf32>
    %61 = vector.extract_strided_slice %48 {offsets = [0, 256], sizes = [8, 128], strides = [1, 1]} : vector<8x512xf32> to vector<8x128xf32>
    %62 = math.tanh %61 : vector<8x128xf32>
    %63 = vector.extract_strided_slice %48 {offsets = [0, 384], sizes = [8, 128], strides = [1, 1]} : vector<8x512xf32> to vector<8x128xf32>
    %64 = arith.negf %63 : vector<8x128xf32>
    %65 = math.exp %64 : vector<8x128xf32>
    %cst_37 = arith.constant 1.000000e+00 : f32
    %66 = vector.broadcast %cst_37 : f32 to vector<8x128xf32>
    %67 = arith.addf %66, %65 : vector<8x128xf32>
    %68 = arith.divf %66, %67 : vector<8x128xf32>
    %c0_38 = arith.constant 0 : index
    %c0_39 = arith.constant 0 : index
    %69 = vector.load %arg15[%c0_38, %c0_39] : memref<8x128xf32, #tpu.memory_space<vmem>>, vector<8x128xf32>
    %70 = arith.mulf %60, %69 : vector<8x128xf32>
    %71 = arith.mulf %54, %62 : vector<8x128xf32>
    %72 = arith.addf %70, %71 : vector<8x128xf32>
    %73 = math.tanh %72 : vector<8x128xf32>
    %74 = arith.mulf %68, %73 : vector<8x128xf32>
    %c0_40 = arith.constant 0 : index
    %c0_41 = arith.constant 0 : index
    %75 = vector.load %arg15[%c0_40, %c0_41] : memref<8x128xf32, #tpu.memory_space<vmem>>, vector<8x128xf32>
    tpu.vector_store %arg15[%c0_40, %c0_41], %72 {strides = array<i32>} : memref<8x128xf32, #tpu.memory_space<vmem>>, vector<8x128xf32>,
    %c0_42 = arith.constant 0 : index
    %c0_43 = arith.constant 0 : index
    %76 = vector.load %arg14[%c0_42, %c0_43] : memref<8x128xf32, #tpu.memory_space<vmem>>, vector<8x128xf32>
    tpu.vector_store %arg14[%c0_42, %c0_43], %74 {strides = array<i32>} : memref<8x128xf32, #tpu.memory_space<vmem>>, vector<8x128xf32>,
    %c8_44 = arith.constant 8 : index
    %c0_45 = arith.constant 0 : index
    %77 = vector.load %arg12[%c8_44, %c0_45] : memref<64x128xf32, #tpu.memory_space<vmem>>, vector<8x128xf32>
    tpu.vector_store %arg12[%c8_44, %c0_45], %74 {strides = array<i32>} : memref<64x128xf32, #tpu.memory_space<vmem>>, vector<8x128xf32>,
    %c0_46 = arith.constant 0 : index
    %c0_47 = arith.constant 0 : index
    %78 = vector.load %arg14[%c0_46, %c0_47] : memref<8x128xf32, #tpu.memory_space<vmem>>, vector<8x128xf32>
    %cst_48 = arith.constant dense<0.000000e+00> : vector<8x512xf32>
    %79 = tpu.matmul %78, %11, %cst_48 {dimension_numbers = #tpu.dot_dimension_numbers<[1], [0], [0], [1], [0, 0, 1, 1], [], []>} : vector<8x128xf32>, vector<128x512xf32>, vector<8x512xf32> -> vector<8x512xf32>
    %c16 = arith.constant 16 : index
    %c0_49 = arith.constant 0 : index
    %80 = vector.load %arg13[%c16, %c0_49] : memref<64x512xf32, #tpu.memory_space<vmem>>, vector<8x512xf32>
    %81 = arith.addf %79, %80 : vector<8x512xf32>
    %82 = vector.extract_strided_slice %81 {offsets = [0, 0], sizes = [8, 128], strides = [1, 1]} : vector<8x512xf32> to vector<8x128xf32>
    %83 = arith.negf %82 : vector<8x128xf32>
    %84 = math.exp %83 : vector<8x128xf32>
    %cst_50 = arith.constant 1.000000e+00 : f32
    %85 = vector.broadcast %cst_50 : f32 to vector<8x128xf32>
    %86 = arith.addf %85, %84 : vector<8x128xf32>
    %87 = arith.divf %85, %86 : vector<8x128xf32>
    %88 = vector.extract_strided_slice %81 {offsets = [0, 128], sizes = [8, 128], strides = [1, 1]} : vector<8x512xf32> to vector<8x128xf32>
    %89 = arith.negf %88 : vector<8x128xf32>
    %90 = math.exp %89 : vector<8x128xf32>
    %cst_51 = arith.constant 1.000000e+00 : f32
    %91 = vector.broadcast %cst_51 : f32 to vector<8x128xf32>
    %92 = arith.addf %91, %90 : vector<8x128xf32>
    %93 = arith.divf %91, %92 : vector<8x128xf32>
    %94 = vector.extract_strided_slice %81 {offsets = [0, 256], sizes = [8, 128], strides = [1, 1]} : vector<8x512xf32> to vector<8x128xf32>
    %95 = math.tanh %94 : vector<8x128xf32>
    %96 = vector.extract_strided_slice %81 {offsets = [0, 384], sizes = [8, 128], strides = [1, 1]} : vector<8x512xf32> to vector<8x128xf32>
    %97 = arith.negf %96 : vector<8x128xf32>
    %98 = math.exp %97 : vector<8x128xf32>
    %cst_52 = arith.constant 1.000000e+00 : f32
    %99 = vector.broadcast %cst_52 : f32 to vector<8x128xf32>
    %100 = arith.addf %99, %98 : vector<8x128xf32>
    %101 = arith.divf %99, %100 : vector<8x128xf32>
    %c0_53 = arith.constant 0 : index
    %c0_54 = arith.constant 0 : index
    %102 = vector.load %arg15[%c0_53, %c0_54] : memref<8x128xf32, #tpu.memory_space<vmem>>, vector<8x128xf32>
    %103 = arith.mulf %93, %102 : vector<8x128xf32>
    %104 = arith.mulf %87, %95 : vector<8x128xf32>
    %105 = arith.addf %103, %104 : vector<8x128xf32>
    %106 = math.tanh %105 : vector<8x128xf32>
    %107 = arith.mulf %101, %106 : vector<8x128xf32>
    %c0_55 = arith.constant 0 : index
    %c0_56 = arith.constant 0 : index
    %108 = vector.load %arg15[%c0_55, %c0_56] : memref<8x128xf32, #tpu.memory_space<vmem>>, vector<8x128xf32>
    tpu.vector_store %arg15[%c0_55, %c0_56], %105 {strides = array<i32>} : memref<8x128xf32, #tpu.memory_space<vmem>>, vector<8x128xf32>,
    %c0_57 = arith.constant 0 : index
    %c0_58 = arith.constant 0 : index
    %109 = vector.load %arg14[%c0_57, %c0_58] : memref<8x128xf32, #tpu.memory_space<vmem>>, vector<8x128xf32>
    tpu.vector_store %arg14[%c0_57, %c0_58], %107 {strides = array<i32>} : memref<8x128xf32, #tpu.memory_space<vmem>>, vector<8x128xf32>,
    %c16_59 = arith.constant 16 : index
    %c0_60 = arith.constant 0 : index
    %110 = vector.load %arg12[%c16_59, %c0_60] : memref<64x128xf32, #tpu.memory_space<vmem>>, vector<8x128xf32>
    tpu.vector_store %arg12[%c16_59, %c0_60], %107 {strides = array<i32>} : memref<64x128xf32, #tpu.memory_space<vmem>>, vector<8x128xf32>,
    %c0_61 = arith.constant 0 : index
    %c0_62 = arith.constant 0 : index
    %111 = vector.load %arg14[%c0_61, %c0_62] : memref<8x128xf32, #tpu.memory_space<vmem>>, vector<8x128xf32>
    %cst_63 = arith.constant dense<0.000000e+00> : vector<8x512xf32>
    %112 = tpu.matmul %111, %11, %cst_63 {dimension_numbers = #tpu.dot_dimension_numbers<[1], [0], [0], [1], [0, 0, 1, 1], [], []>} : vector<8x128xf32>, vector<128x512xf32>, vector<8x512xf32> -> vector<8x512xf32>
    %c24 = arith.constant 24 : index
    %c0_64 = arith.constant 0 : index
    %113 = vector.load %arg13[%c24, %c0_64] : memref<64x512xf32, #tpu.memory_space<vmem>>, vector<8x512xf32>
    %114 = arith.addf %112, %113 : vector<8x512xf32>
    %115 = vector.extract_strided_slice %114 {offsets = [0, 0], sizes = [8, 128], strides = [1, 1]} : vector<8x512xf32> to vector<8x128xf32>
    %116 = arith.negf %115 : vector<8x128xf32>
    %117 = math.exp %116 : vector<8x128xf32>
    %cst_65 = arith.constant 1.000000e+00 : f32
    %118 = vector.broadcast %cst_65 : f32 to vector<8x128xf32>
    %119 = arith.addf %118, %117 : vector<8x128xf32>
    %120 = arith.divf %118, %119 : vector<8x128xf32>
    %121 = vector.extract_strided_slice %114 {offsets = [0, 128], sizes = [8, 128], strides = [1, 1]} : vector<8x512xf32> to vector<8x128xf32>
    %122 = arith.negf %121 : vector<8x128xf32>
    %123 = math.exp %122 : vector<8x128xf32>
    %cst_66 = arith.constant 1.000000e+00 : f32
    %124 = vector.broadcast %cst_66 : f32 to vector<8x128xf32>
    %125 = arith.addf %124, %123 : vector<8x128xf32>
    %126 = arith.divf %124, %125 : vector<8x128xf32>
    %127 = vector.extract_strided_slice %114 {offsets = [0, 256], sizes = [8, 128], strides = [1, 1]} : vector<8x512xf32> to vector<8x128xf32>
    %128 = math.tanh %127 : vector<8x128xf32>
    %129 = vector.extract_strided_slice %114 {offsets = [0, 384], sizes = [8, 128], strides = [1, 1]} : vector<8x512xf32> to vector<8x128xf32>
    %130 = arith.negf %129 : vector<8x128xf32>
    %131 = math.exp %130 : vector<8x128xf32>
    %cst_67 = arith.constant 1.000000e+00 : f32
    %132 = vector.broadcast %cst_67 : f32 to vector<8x128xf32>
    %133 = arith.addf %132, %131 : vector<8x128xf32>
    %134 = arith.divf %132, %133 : vector<8x128xf32>
    %c0_68 = arith.constant 0 : index
    %c0_69 = arith.constant 0 : index
    %135 = vector.load %arg15[%c0_68, %c0_69] : memref<8x128xf32, #tpu.memory_space<vmem>>, vector<8x128xf32>
    %136 = arith.mulf %126, %135 : vector<8x128xf32>
    %137 = arith.mulf %120, %128 : vector<8x128xf32>
    %138 = arith.addf %136, %137 : vector<8x128xf32>
    %139 = math.tanh %138 : vector<8x128xf32>
    %140 = arith.mulf %134, %139 : vector<8x128xf32>
    %c0_70 = arith.constant 0 : index
    %c0_71 = arith.constant 0 : index
    %141 = vector.load %arg15[%c0_70, %c0_71] : memref<8x128xf32, #tpu.memory_space<vmem>>, vector<8x128xf32>
    tpu.vector_store %arg15[%c0_70, %c0_71], %138 {strides = array<i32>} : memref<8x128xf32, #tpu.memory_space<vmem>>, vector<8x128xf32>,
    %c0_72 = arith.constant 0 : index
    %c0_73 = arith.constant 0 : index
    %142 = vector.load %arg14[%c0_72, %c0_73] : memref<8x128xf32, #tpu.memory_space<vmem>>, vector<8x128xf32>
    tpu.vector_store %arg14[%c0_72, %c0_73], %140 {strides = array<i32>} : memref<8x128xf32, #tpu.memory_space<vmem>>, vector<8x128xf32>,
    %c24_74 = arith.constant 24 : index
    %c0_75 = arith.constant 0 : index
    %143 = vector.load %arg12[%c24_74, %c0_75] : memref<64x128xf32, #tpu.memory_space<vmem>>, vector<8x128xf32>
    tpu.vector_store %arg12[%c24_74, %c0_75], %140 {strides = array<i32>} : memref<64x128xf32, #tpu.memory_space<vmem>>, vector<8x128xf32>,
    %c0_76 = arith.constant 0 : index
    %c0_77 = arith.constant 0 : index
    %144 = vector.load %arg14[%c0_76, %c0_77] : memref<8x128xf32, #tpu.memory_space<vmem>>, vector<8x128xf32>
    %cst_78 = arith.constant dense<0.000000e+00> : vector<8x512xf32>
    %145 = tpu.matmul %144, %11, %cst_78 {dimension_numbers = #tpu.dot_dimension_numbers<[1], [0], [0], [1], [0, 0, 1, 1], [], []>} : vector<8x128xf32>, vector<128x512xf32>, vector<8x512xf32> -> vector<8x512xf32>
    %c32 = arith.constant 32 : index
    %c0_79 = arith.constant 0 : index
    %146 = vector.load %arg13[%c32, %c0_79] : memref<64x512xf32, #tpu.memory_space<vmem>>, vector<8x512xf32>
    %147 = arith.addf %145, %146 : vector<8x512xf32>
    %148 = vector.extract_strided_slice %147 {offsets = [0, 0], sizes = [8, 128], strides = [1, 1]} : vector<8x512xf32> to vector<8x128xf32>
    %149 = arith.negf %148 : vector<8x128xf32>
    %150 = math.exp %149 : vector<8x128xf32>
    %cst_80 = arith.constant 1.000000e+00 : f32
    %151 = vector.broadcast %cst_80 : f32 to vector<8x128xf32>
    %152 = arith.addf %151, %150 : vector<8x128xf32>
    %153 = arith.divf %151, %152 : vector<8x128xf32>
    %154 = vector.extract_strided_slice %147 {offsets = [0, 128], sizes = [8, 128], strides = [1, 1]} : vector<8x512xf32> to vector<8x128xf32>
    %155 = arith.negf %154 : vector<8x128xf32>
    %156 = math.exp %155 : vector<8x128xf32>
    %cst_81 = arith.constant 1.000000e+00 : f32
    %157 = vector.broadcast %cst_81 : f32 to vector<8x128xf32>
    %158 = arith.addf %157, %156 : vector<8x128xf32>
    %159 = arith.divf %157, %158 : vector<8x128xf32>
    %160 = vector.extract_strided_slice %147 {offsets = [0, 256], sizes = [8, 128], strides = [1, 1]} : vector<8x512xf32> to vector<8x128xf32>
    %161 = math.tanh %160 : vector<8x128xf32>
    %162 = vector.extract_strided_slice %147 {offsets = [0, 384], sizes = [8, 128], strides = [1, 1]} : vector<8x512xf32> to vector<8x128xf32>
    %163 = arith.negf %162 : vector<8x128xf32>
    %164 = math.exp %163 : vector<8x128xf32>
    %cst_82 = arith.constant 1.000000e+00 : f32
    %165 = vector.broadcast %cst_82 : f32 to vector<8x128xf32>
    %166 = arith.addf %165, %164 : vector<8x128xf32>
    %167 = arith.divf %165, %166 : vector<8x128xf32>
    %c0_83 = arith.constant 0 : index
    %c0_84 = arith.constant 0 : index
    %168 = vector.load %arg15[%c0_83, %c0_84] : memref<8x128xf32, #tpu.memory_space<vmem>>, vector<8x128xf32>
    %169 = arith.mulf %159, %168 : vector<8x128xf32>
    %170 = arith.mulf %153, %161 : vector<8x128xf32>
    %171 = arith.addf %169, %170 : vector<8x128xf32>
    %172 = math.tanh %171 : vector<8x128xf32>
    %173 = arith.mulf %167, %172 : vector<8x128xf32>
    %c0_85 = arith.constant 0 : index
    %c0_86 = arith.constant 0 : index
    %174 = vector.load %arg15[%c0_85, %c0_86] : memref<8x128xf32, #tpu.memory_space<vmem>>, vector<8x128xf32>
    tpu.vector_store %arg15[%c0_85, %c0_86], %171 {strides = array<i32>} : memref<8x128xf32, #tpu.memory_space<vmem>>, vector<8x128xf32>,
    %c0_87 = arith.constant 0 : index
    %c0_88 = arith.constant 0 : index
    %175 = vector.load %arg14[%c0_87, %c0_88] : memref<8x128xf32, #tpu.memory_space<vmem>>, vector<8x128xf32>
    tpu.vector_store %arg14[%c0_87, %c0_88], %173 {strides = array<i32>} : memref<8x128xf32, #tpu.memory_space<vmem>>, vector<8x128xf32>,
    %c32_89 = arith.constant 32 : index
    %c0_90 = arith.constant 0 : index
    %176 = vector.load %arg12[%c32_89, %c0_90] : memref<64x128xf32, #tpu.memory_space<vmem>>, vector<8x128xf32>
    tpu.vector_store %arg12[%c32_89, %c0_90], %173 {strides = array<i32>} : memref<64x128xf32, #tpu.memory_space<vmem>>, vector<8x128xf32>,
    %c0_91 = arith.constant 0 : index
    %c0_92 = arith.constant 0 : index
    %177 = vector.load %arg14[%c0_91, %c0_92] : memref<8x128xf32, #tpu.memory_space<vmem>>, vector<8x128xf32>
    %cst_93 = arith.constant dense<0.000000e+00> : vector<8x512xf32>
    %178 = tpu.matmul %177, %11, %cst_93 {dimension_numbers = #tpu.dot_dimension_numbers<[1], [0], [0], [1], [0, 0, 1, 1], [], []>} : vector<8x128xf32>, vector<128x512xf32>, vector<8x512xf32> -> vector<8x512xf32>
    %c40 = arith.constant 40 : index
    %c0_94 = arith.constant 0 : index
    %179 = vector.load %arg13[%c40, %c0_94] : memref<64x512xf32, #tpu.memory_space<vmem>>, vector<8x512xf32>
    %180 = arith.addf %178, %179 : vector<8x512xf32>
    %181 = vector.extract_strided_slice %180 {offsets = [0, 0], sizes = [8, 128], strides = [1, 1]} : vector<8x512xf32> to vector<8x128xf32>
    %182 = arith.negf %181 : vector<8x128xf32>
    %183 = math.exp %182 : vector<8x128xf32>
    %cst_95 = arith.constant 1.000000e+00 : f32
    %184 = vector.broadcast %cst_95 : f32 to vector<8x128xf32>
    %185 = arith.addf %184, %183 : vector<8x128xf32>
    %186 = arith.divf %184, %185 : vector<8x128xf32>
    %187 = vector.extract_strided_slice %180 {offsets = [0, 128], sizes = [8, 128], strides = [1, 1]} : vector<8x512xf32> to vector<8x128xf32>
    %188 = arith.negf %187 : vector<8x128xf32>
    %189 = math.exp %188 : vector<8x128xf32>
    %cst_96 = arith.constant 1.000000e+00 : f32
    %190 = vector.broadcast %cst_96 : f32 to vector<8x128xf32>
    %191 = arith.addf %190, %189 : vector<8x128xf32>
    %192 = arith.divf %190, %191 : vector<8x128xf32>
    %193 = vector.extract_strided_slice %180 {offsets = [0, 256], sizes = [8, 128], strides = [1, 1]} : vector<8x512xf32> to vector<8x128xf32>
    %194 = math.tanh %193 : vector<8x128xf32>
    %195 = vector.extract_strided_slice %180 {offsets = [0, 384], sizes = [8, 128], strides = [1, 1]} : vector<8x512xf32> to vector<8x128xf32>
    %196 = arith.negf %195 : vector<8x128xf32>
    %197 = math.exp %196 : vector<8x128xf32>
    %cst_97 = arith.constant 1.000000e+00 : f32
    %198 = vector.broadcast %cst_97 : f32 to vector<8x128xf32>
    %199 = arith.addf %198, %197 : vector<8x128xf32>
    %200 = arith.divf %198, %199 : vector<8x128xf32>
    %c0_98 = arith.constant 0 : index
    %c0_99 = arith.constant 0 : index
    %201 = vector.load %arg15[%c0_98, %c0_99] : memref<8x128xf32, #tpu.memory_space<vmem>>, vector<8x128xf32>
    %202 = arith.mulf %192, %201 : vector<8x128xf32>
    %203 = arith.mulf %186, %194 : vector<8x128xf32>
    %204 = arith.addf %202, %203 : vector<8x128xf32>
    %205 = math.tanh %204 : vector<8x128xf32>
    %206 = arith.mulf %200, %205 : vector<8x128xf32>
    %c0_100 = arith.constant 0 : index
    %c0_101 = arith.constant 0 : index
    %207 = vector.load %arg15[%c0_100, %c0_101] : memref<8x128xf32, #tpu.memory_space<vmem>>, vector<8x128xf32>
    tpu.vector_store %arg15[%c0_100, %c0_101], %204 {strides = array<i32>} : memref<8x128xf32, #tpu.memory_space<vmem>>, vector<8x128xf32>,
    %c0_102 = arith.constant 0 : index
    %c0_103 = arith.constant 0 : index
    %208 = vector.load %arg14[%c0_102, %c0_103] : memref<8x128xf32, #tpu.memory_space<vmem>>, vector<8x128xf32>
    tpu.vector_store %arg14[%c0_102, %c0_103], %206 {strides = array<i32>} : memref<8x128xf32, #tpu.memory_space<vmem>>, vector<8x128xf32>,
    %c40_104 = arith.constant 40 : index
    %c0_105 = arith.constant 0 : index
    %209 = vector.load %arg12[%c40_104, %c0_105] : memref<64x128xf32, #tpu.memory_space<vmem>>, vector<8x128xf32>
    tpu.vector_store %arg12[%c40_104, %c0_105], %206 {strides = array<i32>} : memref<64x128xf32, #tpu.memory_space<vmem>>, vector<8x128xf32>,
    %c0_106 = arith.constant 0 : index
    %c0_107 = arith.constant 0 : index
    %210 = vector.load %arg14[%c0_106, %c0_107] : memref<8x128xf32, #tpu.memory_space<vmem>>, vector<8x128xf32>
    %cst_108 = arith.constant dense<0.000000e+00> : vector<8x512xf32>
    %211 = tpu.matmul %210, %11, %cst_108 {dimension_numbers = #tpu.dot_dimension_numbers<[1], [0], [0], [1], [0, 0, 1, 1], [], []>} : vector<8x128xf32>, vector<128x512xf32>, vector<8x512xf32> -> vector<8x512xf32>
    %c48 = arith.constant 48 : index
    %c0_109 = arith.constant 0 : index
    %212 = vector.load %arg13[%c48, %c0_109] : memref<64x512xf32, #tpu.memory_space<vmem>>, vector<8x512xf32>
    %213 = arith.addf %211, %212 : vector<8x512xf32>
    %214 = vector.extract_strided_slice %213 {offsets = [0, 0], sizes = [8, 128], strides = [1, 1]} : vector<8x512xf32> to vector<8x128xf32>
    %215 = arith.negf %214 : vector<8x128xf32>
    %216 = math.exp %215 : vector<8x128xf32>
    %cst_110 = arith.constant 1.000000e+00 : f32
    %217 = vector.broadcast %cst_110 : f32 to vector<8x128xf32>
    %218 = arith.addf %217, %216 : vector<8x128xf32>
    %219 = arith.divf %217, %218 : vector<8x128xf32>
    %220 = vector.extract_strided_slice %213 {offsets = [0, 128], sizes = [8, 128], strides = [1, 1]} : vector<8x512xf32> to vector<8x128xf32>
    %221 = arith.negf %220 : vector<8x128xf32>
    %222 = math.exp %221 : vector<8x128xf32>
    %cst_111 = arith.constant 1.000000e+00 : f32
    %223 = vector.broadcast %cst_111 : f32 to vector<8x128xf32>
    %224 = arith.addf %223, %222 : vector<8x128xf32>
    %225 = arith.divf %223, %224 : vector<8x128xf32>
    %226 = vector.extract_strided_slice %213 {offsets = [0, 256], sizes = [8, 128], strides = [1, 1]} : vector<8x512xf32> to vector<8x128xf32>
    %227 = math.tanh %226 : vector<8x128xf32>
    %228 = vector.extract_strided_slice %213 {offsets = [0, 384], sizes = [8, 128], strides = [1, 1]} : vector<8x512xf32> to vector<8x128xf32>
    %229 = arith.negf %228 : vector<8x128xf32>
    %230 = math.exp %229 : vector<8x128xf32>
    %cst_112 = arith.constant 1.000000e+00 : f32
    %231 = vector.broadcast %cst_112 : f32 to vector<8x128xf32>
    %232 = arith.addf %231, %230 : vector<8x128xf32>
    %233 = arith.divf %231, %232 : vector<8x128xf32>
    %c0_113 = arith.constant 0 : index
    %c0_114 = arith.constant 0 : index
    %234 = vector.load %arg15[%c0_113, %c0_114] : memref<8x128xf32, #tpu.memory_space<vmem>>, vector<8x128xf32>
    %235 = arith.mulf %225, %234 : vector<8x128xf32>
    %236 = arith.mulf %219, %227 : vector<8x128xf32>
    %237 = arith.addf %235, %236 : vector<8x128xf32>
    %238 = math.tanh %237 : vector<8x128xf32>
    %239 = arith.mulf %233, %238 : vector<8x128xf32>
    %c0_115 = arith.constant 0 : index
    %c0_116 = arith.constant 0 : index
    %240 = vector.load %arg15[%c0_115, %c0_116] : memref<8x128xf32, #tpu.memory_space<vmem>>, vector<8x128xf32>
    tpu.vector_store %arg15[%c0_115, %c0_116], %237 {strides = array<i32>} : memref<8x128xf32, #tpu.memory_space<vmem>>, vector<8x128xf32>,
    %c0_117 = arith.constant 0 : index
    %c0_118 = arith.constant 0 : index
    %241 = vector.load %arg14[%c0_117, %c0_118] : memref<8x128xf32, #tpu.memory_space<vmem>>, vector<8x128xf32>
    tpu.vector_store %arg14[%c0_117, %c0_118], %239 {strides = array<i32>} : memref<8x128xf32, #tpu.memory_space<vmem>>, vector<8x128xf32>,
    %c48_119 = arith.constant 48 : index
    %c0_120 = arith.constant 0 : index
    %242 = vector.load %arg12[%c48_119, %c0_120] : memref<64x128xf32, #tpu.memory_space<vmem>>, vector<8x128xf32>
    tpu.vector_store %arg12[%c48_119, %c0_120], %239 {strides = array<i32>} : memref<64x128xf32, #tpu.memory_space<vmem>>, vector<8x128xf32>,
    %c0_121 = arith.constant 0 : index
    %c0_122 = arith.constant 0 : index
    %243 = vector.load %arg14[%c0_121, %c0_122] : memref<8x128xf32, #tpu.memory_space<vmem>>, vector<8x128xf32>
    %cst_123 = arith.constant dense<0.000000e+00> : vector<8x512xf32>
    %244 = tpu.matmul %243, %11, %cst_123 {dimension_numbers = #tpu.dot_dimension_numbers<[1], [0], [0], [1], [0, 0, 1, 1], [], []>} : vector<8x128xf32>, vector<128x512xf32>, vector<8x512xf32> -> vector<8x512xf32>
    %c56 = arith.constant 56 : index
    %c0_124 = arith.constant 0 : index
    %245 = vector.load %arg13[%c56, %c0_124] : memref<64x512xf32, #tpu.memory_space<vmem>>, vector<8x512xf32>
    %246 = arith.addf %244, %245 : vector<8x512xf32>
    %247 = vector.extract_strided_slice %246 {offsets = [0, 0], sizes = [8, 128], strides = [1, 1]} : vector<8x512xf32> to vector<8x128xf32>
    %248 = arith.negf %247 : vector<8x128xf32>
    %249 = math.exp %248 : vector<8x128xf32>
    %cst_125 = arith.constant 1.000000e+00 : f32
    %250 = vector.broadcast %cst_125 : f32 to vector<8x128xf32>
    %251 = arith.addf %250, %249 : vector<8x128xf32>
    %252 = arith.divf %250, %251 : vector<8x128xf32>
    %253 = vector.extract_strided_slice %246 {offsets = [0, 128], sizes = [8, 128], strides = [1, 1]} : vector<8x512xf32> to vector<8x128xf32>
    %254 = arith.negf %253 : vector<8x128xf32>
    %255 = math.exp %254 : vector<8x128xf32>
    %cst_126 = arith.constant 1.000000e+00 : f32
    %256 = vector.broadcast %cst_126 : f32 to vector<8x128xf32>
    %257 = arith.addf %256, %255 : vector<8x128xf32>
    %258 = arith.divf %256, %257 : vector<8x128xf32>
    %259 = vector.extract_strided_slice %246 {offsets = [0, 256], sizes = [8, 128], strides = [1, 1]} : vector<8x512xf32> to vector<8x128xf32>
    %260 = math.tanh %259 : vector<8x128xf32>
    %261 = vector.extract_strided_slice %246 {offsets = [0, 384], sizes = [8, 128], strides = [1, 1]} : vector<8x512xf32> to vector<8x128xf32>
    %262 = arith.negf %261 : vector<8x128xf32>
    %263 = math.exp %262 : vector<8x128xf32>
    %cst_127 = arith.constant 1.000000e+00 : f32
    %264 = vector.broadcast %cst_127 : f32 to vector<8x128xf32>
    %265 = arith.addf %264, %263 : vector<8x128xf32>
    %266 = arith.divf %264, %265 : vector<8x128xf32>
    %c0_128 = arith.constant 0 : index
    %c0_129 = arith.constant 0 : index
    %267 = vector.load %arg15[%c0_128, %c0_129] : memref<8x128xf32, #tpu.memory_space<vmem>>, vector<8x128xf32>
    %268 = arith.mulf %258, %267 : vector<8x128xf32>
    %269 = arith.mulf %252, %260 : vector<8x128xf32>
    %270 = arith.addf %268, %269 : vector<8x128xf32>
    %271 = math.tanh %270 : vector<8x128xf32>
    %272 = arith.mulf %266, %271 : vector<8x128xf32>
    %c0_130 = arith.constant 0 : index
    %c0_131 = arith.constant 0 : index
    %273 = vector.load %arg15[%c0_130, %c0_131] : memref<8x128xf32, #tpu.memory_space<vmem>>, vector<8x128xf32>
    tpu.vector_store %arg15[%c0_130, %c0_131], %270 {strides = array<i32>} : memref<8x128xf32, #tpu.memory_space<vmem>>, vector<8x128xf32>,
    %c0_132 = arith.constant 0 : index
    %c0_133 = arith.constant 0 : index
    %274 = vector.load %arg14[%c0_132, %c0_133] : memref<8x128xf32, #tpu.memory_space<vmem>>, vector<8x128xf32>
    tpu.vector_store %arg14[%c0_132, %c0_133], %272 {strides = array<i32>} : memref<8x128xf32, #tpu.memory_space<vmem>>, vector<8x128xf32>,
    %c56_134 = arith.constant 56 : index
    %c0_135 = arith.constant 0 : index
    %275 = vector.load %arg12[%c56_134, %c0_135] : memref<64x128xf32, #tpu.memory_space<vmem>>, vector<8x128xf32>
    tpu.vector_store %arg12[%c56_134, %c0_135], %272 {strides = array<i32>} : memref<64x128xf32, #tpu.memory_space<vmem>>, vector<8x128xf32>,
    %c0_136 = arith.constant 0 : index
    %c0_137 = arith.constant 0 : index
    %276 = vector.load %arg12[%c0_136, %c0_137] : memref<64x128xf32, #tpu.memory_space<vmem>>, vector<64x128xf32>
    %c0_138 = arith.constant 0 : index
    %c0_139 = arith.constant 0 : index
    %277 = vector.load %arg5[%c0_138, %c0_139] : memref<128x512xf32, #tpu.memory_space<vmem>>, vector<128x512xf32>
    %cst_140 = arith.constant dense<0.000000e+00> : vector<64x512xf32>
    %278 = tpu.matmul %276, %277, %cst_140 {dimension_numbers = #tpu.dot_dimension_numbers<[1], [0], [0], [1], [0, 0, 1, 1], [], []>} : vector<64x128xf32>, vector<128x512xf32>, vector<64x512xf32> -> vector<64x512xf32>
    %c0_141 = arith.constant 0 : index
    %c0_142 = arith.constant 0 : index
    %279 = vector.load %arg7[%c0_141, %c0_142] : memref<1x512xf32, #tpu.memory_space<vmem>>, vector<1x512xf32>
    %280 = vector.broadcast %279 : vector<1x512xf32> to vector<64x512xf32>
    %281 = arith.addf %278, %280 : vector<64x512xf32>
    %c0_143 = arith.constant 0 : index
    %c0_144 = arith.constant 0 : index
    %282 = vector.load %arg13[%c0_143, %c0_144] : memref<64x512xf32, #tpu.memory_space<vmem>>, vector<64x512xf32>
    tpu.vector_store %arg13[%c0_143, %c0_144], %281 {strides = array<i32>} : memref<64x512xf32, #tpu.memory_space<vmem>>, vector<64x512xf32>,
    %cst_145 = arith.constant 0.000000e+00 : f32
    %283 = vector.broadcast %cst_145 : f32 to vector<8x128xf32>
    %c0_146 = arith.constant 0 : index
    %c0_147 = arith.constant 0 : index
    %284 = vector.load %arg14[%c0_146, %c0_147] : memref<8x128xf32, #tpu.memory_space<vmem>>, vector<8x128xf32>
    tpu.vector_store %arg14[%c0_146, %c0_147], %283 {strides = array<i32>} : memref<8x128xf32, #tpu.memory_space<vmem>>, vector<8x128xf32>,
    %cst_148 = arith.constant 0.000000e+00 : f32
    %285 = vector.broadcast %cst_148 : f32 to vector<8x128xf32>
    %c0_149 = arith.constant 0 : index
    %c0_150 = arith.constant 0 : index
    %286 = vector.load %arg15[%c0_149, %c0_150] : memref<8x128xf32, #tpu.memory_space<vmem>>, vector<8x128xf32>
    tpu.vector_store %arg15[%c0_149, %c0_150], %285 {strides = array<i32>} : memref<8x128xf32, #tpu.memory_space<vmem>>, vector<8x128xf32>,
    %c0_151 = arith.constant 0 : index
    %c0_152 = arith.constant 0 : index
    %287 = vector.load %arg6[%c0_151, %c0_152] : memref<128x512xf32, #tpu.memory_space<vmem>>, vector<128x512xf32>
    %c0_153 = arith.constant 0 : index
    %c0_154 = arith.constant 0 : index
    %288 = vector.load %arg14[%c0_153, %c0_154] : memref<8x128xf32, #tpu.memory_space<vmem>>, vector<8x128xf32>
    %cst_155 = arith.constant dense<0.000000e+00> : vector<8x512xf32>
    %289 = tpu.matmul %288, %287, %cst_155 {dimension_numbers = #tpu.dot_dimension_numbers<[1], [0], [0], [1], [0, 0, 1, 1], [], []>} : vector<8x128xf32>, vector<128x512xf32>, vector<8x512xf32> -> vector<8x512xf32>
    %c0_156 = arith.constant 0 : index
    %c0_157 = arith.constant 0 : index
    %290 = vector.load %arg13[%c0_156, %c0_157] : memref<64x512xf32, #tpu.memory_space<vmem>>, vector<8x512xf32>
    %291 = arith.addf %289, %290 : vector<8x512xf32>
    %292 = vector.extract_strided_slice %291 {offsets = [0, 0], sizes = [8, 128], strides = [1, 1]} : vector<8x512xf32> to vector<8x128xf32>
    %293 = arith.negf %292 : vector<8x128xf32>
    %294 = math.exp %293 : vector<8x128xf32>
    %cst_158 = arith.constant 1.000000e+00 : f32
    %295 = vector.broadcast %cst_158 : f32 to vector<8x128xf32>
    %296 = arith.addf %295, %294 : vector<8x128xf32>
    %297 = arith.divf %295, %296 : vector<8x128xf32>
    %298 = vector.extract_strided_slice %291 {offsets = [0, 128], sizes = [8, 128], strides = [1, 1]} : vector<8x512xf32> to vector<8x128xf32>
    %299 = arith.negf %298 : vector<8x128xf32>
    %300 = math.exp %299 : vector<8x128xf32>
    %cst_159 = arith.constant 1.000000e+00 : f32
    %301 = vector.broadcast %cst_159 : f32 to vector<8x128xf32>
    %302 = arith.addf %301, %300 : vector<8x128xf32>
    %303 = arith.divf %301, %302 : vector<8x128xf32>
    %304 = vector.extract_strided_slice %291 {offsets = [0, 256], sizes = [8, 128], strides = [1, 1]} : vector<8x512xf32> to vector<8x128xf32>
    %305 = math.tanh %304 : vector<8x128xf32>
    %306 = vector.extract_strided_slice %291 {offsets = [0, 384], sizes = [8, 128], strides = [1, 1]} : vector<8x512xf32> to vector<8x128xf32>
    %307 = arith.negf %306 : vector<8x128xf32>
    %308 = math.exp %307 : vector<8x128xf32>
    %cst_160 = arith.constant 1.000000e+00 : f32
    %309 = vector.broadcast %cst_160 : f32 to vector<8x128xf32>
    %310 = arith.addf %309, %308 : vector<8x128xf32>
    %311 = arith.divf %309, %310 : vector<8x128xf32>
    %c0_161 = arith.constant 0 : index
    %c0_162 = arith.constant 0 : index
    %312 = vector.load %arg15[%c0_161, %c0_162] : memref<8x128xf32, #tpu.memory_space<vmem>>, vector<8x128xf32>
    %313 = arith.mulf %303, %312 : vector<8x128xf32>
    %314 = arith.mulf %297, %305 : vector<8x128xf32>
    %315 = arith.addf %313, %314 : vector<8x128xf32>
    %316 = math.tanh %315 : vector<8x128xf32>
    %317 = arith.mulf %311, %316 : vector<8x128xf32>
    %c0_163 = arith.constant 0 : index
    %c0_164 = arith.constant 0 : index
    %318 = vector.load %arg15[%c0_163, %c0_164] : memref<8x128xf32, #tpu.memory_space<vmem>>, vector<8x128xf32>
    tpu.vector_store %arg15[%c0_163, %c0_164], %315 {strides = array<i32>} : memref<8x128xf32, #tpu.memory_space<vmem>>, vector<8x128xf32>,
    %c0_165 = arith.constant 0 : index
    %c0_166 = arith.constant 0 : index
    %319 = vector.load %arg14[%c0_165, %c0_166] : memref<8x128xf32, #tpu.memory_space<vmem>>, vector<8x128xf32>
    tpu.vector_store %arg14[%c0_165, %c0_166], %317 {strides = array<i32>} : memref<8x128xf32, #tpu.memory_space<vmem>>, vector<8x128xf32>,
    %c0_167 = arith.constant 0 : index
    %c0_168 = arith.constant 0 : index
    %320 = vector.load %arg14[%c0_167, %c0_168] : memref<8x128xf32, #tpu.memory_space<vmem>>, vector<8x128xf32>
    %cst_169 = arith.constant dense<0.000000e+00> : vector<8x512xf32>
    %321 = tpu.matmul %320, %287, %cst_169 {dimension_numbers = #tpu.dot_dimension_numbers<[1], [0], [0], [1], [0, 0, 1, 1], [], []>} : vector<8x128xf32>, vector<128x512xf32>, vector<8x512xf32> -> vector<8x512xf32>
    %c8_170 = arith.constant 8 : index
    %c0_171 = arith.constant 0 : index
    %322 = vector.load %arg13[%c8_170, %c0_171] : memref<64x512xf32, #tpu.memory_space<vmem>>, vector<8x512xf32>
    %323 = arith.addf %321, %322 : vector<8x512xf32>
    %324 = vector.extract_strided_slice %323 {offsets = [0, 0], sizes = [8, 128], strides = [1, 1]} : vector<8x512xf32> to vector<8x128xf32>
    %325 = arith.negf %324 : vector<8x128xf32>
    %326 = math.exp %325 : vector<8x128xf32>
    %cst_172 = arith.constant 1.000000e+00 : f32
    %327 = vector.broadcast %cst_172 : f32 to vector<8x128xf32>
    %328 = arith.addf %327, %326 : vector<8x128xf32>
    %329 = arith.divf %327, %328 : vector<8x128xf32>
    %330 = vector.extract_strided_slice %323 {offsets = [0, 128], sizes = [8, 128], strides = [1, 1]} : vector<8x512xf32> to vector<8x128xf32>
    %331 = arith.negf %330 : vector<8x128xf32>
    %332 = math.exp %331 : vector<8x128xf32>
    %cst_173 = arith.constant 1.000000e+00 : f32
    %333 = vector.broadcast %cst_173 : f32 to vector<8x128xf32>
    %334 = arith.addf %333, %332 : vector<8x128xf32>
    %335 = arith.divf %333, %334 : vector<8x128xf32>
    %336 = vector.extract_strided_slice %323 {offsets = [0, 256], sizes = [8, 128], strides = [1, 1]} : vector<8x512xf32> to vector<8x128xf32>
    %337 = math.tanh %336 : vector<8x128xf32>
    %338 = vector.extract_strided_slice %323 {offsets = [0, 384], sizes = [8, 128], strides = [1, 1]} : vector<8x512xf32> to vector<8x128xf32>
    %339 = arith.negf %338 : vector<8x128xf32>
    %340 = math.exp %339 : vector<8x128xf32>
    %cst_174 = arith.constant 1.000000e+00 : f32
    %341 = vector.broadcast %cst_174 : f32 to vector<8x128xf32>
    %342 = arith.addf %341, %340 : vector<8x128xf32>
    %343 = arith.divf %341, %342 : vector<8x128xf32>
    %c0_175 = arith.constant 0 : index
    %c0_176 = arith.constant 0 : index
    %344 = vector.load %arg15[%c0_175, %c0_176] : memref<8x128xf32, #tpu.memory_space<vmem>>, vector<8x128xf32>
    %345 = arith.mulf %335, %344 : vector<8x128xf32>
    %346 = arith.mulf %329, %337 : vector<8x128xf32>
    %347 = arith.addf %345, %346 : vector<8x128xf32>
    %348 = math.tanh %347 : vector<8x128xf32>
    %349 = arith.mulf %343, %348 : vector<8x128xf32>
    %c0_177 = arith.constant 0 : index
    %c0_178 = arith.constant 0 : index
    %350 = vector.load %arg15[%c0_177, %c0_178] : memref<8x128xf32, #tpu.memory_space<vmem>>, vector<8x128xf32>
    tpu.vector_store %arg15[%c0_177, %c0_178], %347 {strides = array<i32>} : memref<8x128xf32, #tpu.memory_space<vmem>>, vector<8x128xf32>,
    %c0_179 = arith.constant 0 : index
    %c0_180 = arith.constant 0 : index
    %351 = vector.load %arg14[%c0_179, %c0_180] : memref<8x128xf32, #tpu.memory_space<vmem>>, vector<8x128xf32>
    tpu.vector_store %arg14[%c0_179, %c0_180], %349 {strides = array<i32>} : memref<8x128xf32, #tpu.memory_space<vmem>>, vector<8x128xf32>,
    %c0_181 = arith.constant 0 : index
    %c0_182 = arith.constant 0 : index
    %352 = vector.load %arg14[%c0_181, %c0_182] : memref<8x128xf32, #tpu.memory_space<vmem>>, vector<8x128xf32>
    %cst_183 = arith.constant dense<0.000000e+00> : vector<8x512xf32>
    %353 = tpu.matmul %352, %287, %cst_183 {dimension_numbers = #tpu.dot_dimension_numbers<[1], [0], [0], [1], [0, 0, 1, 1], [], []>} : vector<8x128xf32>, vector<128x512xf32>, vector<8x512xf32> -> vector<8x512xf32>
    %c16_184 = arith.constant 16 : index
    %c0_185 = arith.constant 0 : index
    %354 = vector.load %arg13[%c16_184, %c0_185] : memref<64x512xf32, #tpu.memory_space<vmem>>, vector<8x512xf32>
    %355 = arith.addf %353, %354 : vector<8x512xf32>
    %356 = vector.extract_strided_slice %355 {offsets = [0, 0], sizes = [8, 128], strides = [1, 1]} : vector<8x512xf32> to vector<8x128xf32>
    %357 = arith.negf %356 : vector<8x128xf32>
    %358 = math.exp %357 : vector<8x128xf32>
    %cst_186 = arith.constant 1.000000e+00 : f32
    %359 = vector.broadcast %cst_186 : f32 to vector<8x128xf32>
    %360 = arith.addf %359, %358 : vector<8x128xf32>
    %361 = arith.divf %359, %360 : vector<8x128xf32>
    %362 = vector.extract_strided_slice %355 {offsets = [0, 128], sizes = [8, 128], strides = [1, 1]} : vector<8x512xf32> to vector<8x128xf32>
    %363 = arith.negf %362 : vector<8x128xf32>
    %364 = math.exp %363 : vector<8x128xf32>
    %cst_187 = arith.constant 1.000000e+00 : f32
    %365 = vector.broadcast %cst_187 : f32 to vector<8x128xf32>
    %366 = arith.addf %365, %364 : vector<8x128xf32>
    %367 = arith.divf %365, %366 : vector<8x128xf32>
    %368 = vector.extract_strided_slice %355 {offsets = [0, 256], sizes = [8, 128], strides = [1, 1]} : vector<8x512xf32> to vector<8x128xf32>
    %369 = math.tanh %368 : vector<8x128xf32>
    %370 = vector.extract_strided_slice %355 {offsets = [0, 384], sizes = [8, 128], strides = [1, 1]} : vector<8x512xf32> to vector<8x128xf32>
    %371 = arith.negf %370 : vector<8x128xf32>
    %372 = math.exp %371 : vector<8x128xf32>
    %cst_188 = arith.constant 1.000000e+00 : f32
    %373 = vector.broadcast %cst_188 : f32 to vector<8x128xf32>
    %374 = arith.addf %373, %372 : vector<8x128xf32>
    %375 = arith.divf %373, %374 : vector<8x128xf32>
    %c0_189 = arith.constant 0 : index
    %c0_190 = arith.constant 0 : index
    %376 = vector.load %arg15[%c0_189, %c0_190] : memref<8x128xf32, #tpu.memory_space<vmem>>, vector<8x128xf32>
    %377 = arith.mulf %367, %376 : vector<8x128xf32>
    %378 = arith.mulf %361, %369 : vector<8x128xf32>
    %379 = arith.addf %377, %378 : vector<8x128xf32>
    %380 = math.tanh %379 : vector<8x128xf32>
    %381 = arith.mulf %375, %380 : vector<8x128xf32>
    %c0_191 = arith.constant 0 : index
    %c0_192 = arith.constant 0 : index
    %382 = vector.load %arg15[%c0_191, %c0_192] : memref<8x128xf32, #tpu.memory_space<vmem>>, vector<8x128xf32>
    tpu.vector_store %arg15[%c0_191, %c0_192], %379 {strides = array<i32>} : memref<8x128xf32, #tpu.memory_space<vmem>>, vector<8x128xf32>,
    %c0_193 = arith.constant 0 : index
    %c0_194 = arith.constant 0 : index
    %383 = vector.load %arg14[%c0_193, %c0_194] : memref<8x128xf32, #tpu.memory_space<vmem>>, vector<8x128xf32>
    tpu.vector_store %arg14[%c0_193, %c0_194], %381 {strides = array<i32>} : memref<8x128xf32, #tpu.memory_space<vmem>>, vector<8x128xf32>,
    %c0_195 = arith.constant 0 : index
    %c0_196 = arith.constant 0 : index
    %384 = vector.load %arg14[%c0_195, %c0_196] : memref<8x128xf32, #tpu.memory_space<vmem>>, vector<8x128xf32>
    %cst_197 = arith.constant dense<0.000000e+00> : vector<8x512xf32>
    %385 = tpu.matmul %384, %287, %cst_197 {dimension_numbers = #tpu.dot_dimension_numbers<[1], [0], [0], [1], [0, 0, 1, 1], [], []>} : vector<8x128xf32>, vector<128x512xf32>, vector<8x512xf32> -> vector<8x512xf32>
    %c24_198 = arith.constant 24 : index
    %c0_199 = arith.constant 0 : index
    %386 = vector.load %arg13[%c24_198, %c0_199] : memref<64x512xf32, #tpu.memory_space<vmem>>, vector<8x512xf32>
    %387 = arith.addf %385, %386 : vector<8x512xf32>
    %388 = vector.extract_strided_slice %387 {offsets = [0, 0], sizes = [8, 128], strides = [1, 1]} : vector<8x512xf32> to vector<8x128xf32>
    %389 = arith.negf %388 : vector<8x128xf32>
    %390 = math.exp %389 : vector<8x128xf32>
    %cst_200 = arith.constant 1.000000e+00 : f32
    %391 = vector.broadcast %cst_200 : f32 to vector<8x128xf32>
    %392 = arith.addf %391, %390 : vector<8x128xf32>
    %393 = arith.divf %391, %392 : vector<8x128xf32>
    %394 = vector.extract_strided_slice %387 {offsets = [0, 128], sizes = [8, 128], strides = [1, 1]} : vector<8x512xf32> to vector<8x128xf32>
    %395 = arith.negf %394 : vector<8x128xf32>
    %396 = math.exp %395 : vector<8x128xf32>
    %cst_201 = arith.constant 1.000000e+00 : f32
    %397 = vector.broadcast %cst_201 : f32 to vector<8x128xf32>
    %398 = arith.addf %397, %396 : vector<8x128xf32>
    %399 = arith.divf %397, %398 : vector<8x128xf32>
    %400 = vector.extract_strided_slice %387 {offsets = [0, 256], sizes = [8, 128], strides = [1, 1]} : vector<8x512xf32> to vector<8x128xf32>
    %401 = math.tanh %400 : vector<8x128xf32>
    %402 = vector.extract_strided_slice %387 {offsets = [0, 384], sizes = [8, 128], strides = [1, 1]} : vector<8x512xf32> to vector<8x128xf32>
    %403 = arith.negf %402 : vector<8x128xf32>
    %404 = math.exp %403 : vector<8x128xf32>
    %cst_202 = arith.constant 1.000000e+00 : f32
    %405 = vector.broadcast %cst_202 : f32 to vector<8x128xf32>
    %406 = arith.addf %405, %404 : vector<8x128xf32>
    %407 = arith.divf %405, %406 : vector<8x128xf32>
    %c0_203 = arith.constant 0 : index
    %c0_204 = arith.constant 0 : index
    %408 = vector.load %arg15[%c0_203, %c0_204] : memref<8x128xf32, #tpu.memory_space<vmem>>, vector<8x128xf32>
    %409 = arith.mulf %399, %408 : vector<8x128xf32>
    %410 = arith.mulf %393, %401 : vector<8x128xf32>
    %411 = arith.addf %409, %410 : vector<8x128xf32>
    %412 = math.tanh %411 : vector<8x128xf32>
    %413 = arith.mulf %407, %412 : vector<8x128xf32>
    %c0_205 = arith.constant 0 : index
    %c0_206 = arith.constant 0 : index
    %414 = vector.load %arg15[%c0_205, %c0_206] : memref<8x128xf32, #tpu.memory_space<vmem>>, vector<8x128xf32>
    tpu.vector_store %arg15[%c0_205, %c0_206], %411 {strides = array<i32>} : memref<8x128xf32, #tpu.memory_space<vmem>>, vector<8x128xf32>,
    %c0_207 = arith.constant 0 : index
    %c0_208 = arith.constant 0 : index
    %415 = vector.load %arg14[%c0_207, %c0_208] : memref<8x128xf32, #tpu.memory_space<vmem>>, vector<8x128xf32>
    tpu.vector_store %arg14[%c0_207, %c0_208], %413 {strides = array<i32>} : memref<8x128xf32, #tpu.memory_space<vmem>>, vector<8x128xf32>,
    %c0_209 = arith.constant 0 : index
    %c0_210 = arith.constant 0 : index
    %416 = vector.load %arg14[%c0_209, %c0_210] : memref<8x128xf32, #tpu.memory_space<vmem>>, vector<8x128xf32>
    %cst_211 = arith.constant dense<0.000000e+00> : vector<8x512xf32>
    %417 = tpu.matmul %416, %287, %cst_211 {dimension_numbers = #tpu.dot_dimension_numbers<[1], [0], [0], [1], [0, 0, 1, 1], [], []>} : vector<8x128xf32>, vector<128x512xf32>, vector<8x512xf32> -> vector<8x512xf32>
    %c32_212 = arith.constant 32 : index
    %c0_213 = arith.constant 0 : index
    %418 = vector.load %arg13[%c32_212, %c0_213] : memref<64x512xf32, #tpu.memory_space<vmem>>, vector<8x512xf32>
    %419 = arith.addf %417, %418 : vector<8x512xf32>
    %420 = vector.extract_strided_slice %419 {offsets = [0, 0], sizes = [8, 128], strides = [1, 1]} : vector<8x512xf32> to vector<8x128xf32>
    %421 = arith.negf %420 : vector<8x128xf32>
    %422 = math.exp %421 : vector<8x128xf32>
    %cst_214 = arith.constant 1.000000e+00 : f32
    %423 = vector.broadcast %cst_214 : f32 to vector<8x128xf32>
    %424 = arith.addf %423, %422 : vector<8x128xf32>
    %425 = arith.divf %423, %424 : vector<8x128xf32>
    %426 = vector.extract_strided_slice %419 {offsets = [0, 128], sizes = [8, 128], strides = [1, 1]} : vector<8x512xf32> to vector<8x128xf32>
    %427 = arith.negf %426 : vector<8x128xf32>
    %428 = math.exp %427 : vector<8x128xf32>
    %cst_215 = arith.constant 1.000000e+00 : f32
    %429 = vector.broadcast %cst_215 : f32 to vector<8x128xf32>
    %430 = arith.addf %429, %428 : vector<8x128xf32>
    %431 = arith.divf %429, %430 : vector<8x128xf32>
    %432 = vector.extract_strided_slice %419 {offsets = [0, 256], sizes = [8, 128], strides = [1, 1]} : vector<8x512xf32> to vector<8x128xf32>
    %433 = math.tanh %432 : vector<8x128xf32>
    %434 = vector.extract_strided_slice %419 {offsets = [0, 384], sizes = [8, 128], strides = [1, 1]} : vector<8x512xf32> to vector<8x128xf32>
    %435 = arith.negf %434 : vector<8x128xf32>
    %436 = math.exp %435 : vector<8x128xf32>
    %cst_216 = arith.constant 1.000000e+00 : f32
    %437 = vector.broadcast %cst_216 : f32 to vector<8x128xf32>
    %438 = arith.addf %437, %436 : vector<8x128xf32>
    %439 = arith.divf %437, %438 : vector<8x128xf32>
    %c0_217 = arith.constant 0 : index
    %c0_218 = arith.constant 0 : index
    %440 = vector.load %arg15[%c0_217, %c0_218] : memref<8x128xf32, #tpu.memory_space<vmem>>, vector<8x128xf32>
    %441 = arith.mulf %431, %440 : vector<8x128xf32>
    %442 = arith.mulf %425, %433 : vector<8x128xf32>
    %443 = arith.addf %441, %442 : vector<8x128xf32>
    %444 = math.tanh %443 : vector<8x128xf32>
    %445 = arith.mulf %439, %444 : vector<8x128xf32>
    %c0_219 = arith.constant 0 : index
    %c0_220 = arith.constant 0 : index
    %446 = vector.load %arg15[%c0_219, %c0_220] : memref<8x128xf32, #tpu.memory_space<vmem>>, vector<8x128xf32>
    tpu.vector_store %arg15[%c0_219, %c0_220], %443 {strides = array<i32>} : memref<8x128xf32, #tpu.memory_space<vmem>>, vector<8x128xf32>,
    %c0_221 = arith.constant 0 : index
    %c0_222 = arith.constant 0 : index
    %447 = vector.load %arg14[%c0_221, %c0_222] : memref<8x128xf32, #tpu.memory_space<vmem>>, vector<8x128xf32>
    tpu.vector_store %arg14[%c0_221, %c0_222], %445 {strides = array<i32>} : memref<8x128xf32, #tpu.memory_space<vmem>>, vector<8x128xf32>,
    %c0_223 = arith.constant 0 : index
    %c0_224 = arith.constant 0 : index
    %448 = vector.load %arg14[%c0_223, %c0_224] : memref<8x128xf32, #tpu.memory_space<vmem>>, vector<8x128xf32>
    %cst_225 = arith.constant dense<0.000000e+00> : vector<8x512xf32>
    %449 = tpu.matmul %448, %287, %cst_225 {dimension_numbers = #tpu.dot_dimension_numbers<[1], [0], [0], [1], [0, 0, 1, 1], [], []>} : vector<8x128xf32>, vector<128x512xf32>, vector<8x512xf32> -> vector<8x512xf32>
    %c40_226 = arith.constant 40 : index
    %c0_227 = arith.constant 0 : index
    %450 = vector.load %arg13[%c40_226, %c0_227] : memref<64x512xf32, #tpu.memory_space<vmem>>, vector<8x512xf32>
    %451 = arith.addf %449, %450 : vector<8x512xf32>
    %452 = vector.extract_strided_slice %451 {offsets = [0, 0], sizes = [8, 128], strides = [1, 1]} : vector<8x512xf32> to vector<8x128xf32>
    %453 = arith.negf %452 : vector<8x128xf32>
    %454 = math.exp %453 : vector<8x128xf32>
    %cst_228 = arith.constant 1.000000e+00 : f32
    %455 = vector.broadcast %cst_228 : f32 to vector<8x128xf32>
    %456 = arith.addf %455, %454 : vector<8x128xf32>
    %457 = arith.divf %455, %456 : vector<8x128xf32>
    %458 = vector.extract_strided_slice %451 {offsets = [0, 128], sizes = [8, 128], strides = [1, 1]} : vector<8x512xf32> to vector<8x128xf32>
    %459 = arith.negf %458 : vector<8x128xf32>
    %460 = math.exp %459 : vector<8x128xf32>
    %cst_229 = arith.constant 1.000000e+00 : f32
    %461 = vector.broadcast %cst_229 : f32 to vector<8x128xf32>
    %462 = arith.addf %461, %460 : vector<8x128xf32>
    %463 = arith.divf %461, %462 : vector<8x128xf32>
    %464 = vector.extract_strided_slice %451 {offsets = [0, 256], sizes = [8, 128], strides = [1, 1]} : vector<8x512xf32> to vector<8x128xf32>
    %465 = math.tanh %464 : vector<8x128xf32>
    %466 = vector.extract_strided_slice %451 {offsets = [0, 384], sizes = [8, 128], strides = [1, 1]} : vector<8x512xf32> to vector<8x128xf32>
    %467 = arith.negf %466 : vector<8x128xf32>
    %468 = math.exp %467 : vector<8x128xf32>
    %cst_230 = arith.constant 1.000000e+00 : f32
    %469 = vector.broadcast %cst_230 : f32 to vector<8x128xf32>
    %470 = arith.addf %469, %468 : vector<8x128xf32>
    %471 = arith.divf %469, %470 : vector<8x128xf32>
    %c0_231 = arith.constant 0 : index
    %c0_232 = arith.constant 0 : index
    %472 = vector.load %arg15[%c0_231, %c0_232] : memref<8x128xf32, #tpu.memory_space<vmem>>, vector<8x128xf32>
    %473 = arith.mulf %463, %472 : vector<8x128xf32>
    %474 = arith.mulf %457, %465 : vector<8x128xf32>
    %475 = arith.addf %473, %474 : vector<8x128xf32>
    %476 = math.tanh %475 : vector<8x128xf32>
    %477 = arith.mulf %471, %476 : vector<8x128xf32>
    %c0_233 = arith.constant 0 : index
    %c0_234 = arith.constant 0 : index
    %478 = vector.load %arg15[%c0_233, %c0_234] : memref<8x128xf32, #tpu.memory_space<vmem>>, vector<8x128xf32>
    tpu.vector_store %arg15[%c0_233, %c0_234], %475 {strides = array<i32>} : memref<8x128xf32, #tpu.memory_space<vmem>>, vector<8x128xf32>,
    %c0_235 = arith.constant 0 : index
    %c0_236 = arith.constant 0 : index
    %479 = vector.load %arg14[%c0_235, %c0_236] : memref<8x128xf32, #tpu.memory_space<vmem>>, vector<8x128xf32>
    tpu.vector_store %arg14[%c0_235, %c0_236], %477 {strides = array<i32>} : memref<8x128xf32, #tpu.memory_space<vmem>>, vector<8x128xf32>,
    %c0_237 = arith.constant 0 : index
    %c0_238 = arith.constant 0 : index
    %480 = vector.load %arg14[%c0_237, %c0_238] : memref<8x128xf32, #tpu.memory_space<vmem>>, vector<8x128xf32>
    %cst_239 = arith.constant dense<0.000000e+00> : vector<8x512xf32>
    %481 = tpu.matmul %480, %287, %cst_239 {dimension_numbers = #tpu.dot_dimension_numbers<[1], [0], [0], [1], [0, 0, 1, 1], [], []>} : vector<8x128xf32>, vector<128x512xf32>, vector<8x512xf32> -> vector<8x512xf32>
    %c48_240 = arith.constant 48 : index
    %c0_241 = arith.constant 0 : index
    %482 = vector.load %arg13[%c48_240, %c0_241] : memref<64x512xf32, #tpu.memory_space<vmem>>, vector<8x512xf32>
    %483 = arith.addf %481, %482 : vector<8x512xf32>
    %484 = vector.extract_strided_slice %483 {offsets = [0, 0], sizes = [8, 128], strides = [1, 1]} : vector<8x512xf32> to vector<8x128xf32>
    %485 = arith.negf %484 : vector<8x128xf32>
    %486 = math.exp %485 : vector<8x128xf32>
    %cst_242 = arith.constant 1.000000e+00 : f32
    %487 = vector.broadcast %cst_242 : f32 to vector<8x128xf32>
    %488 = arith.addf %487, %486 : vector<8x128xf32>
    %489 = arith.divf %487, %488 : vector<8x128xf32>
    %490 = vector.extract_strided_slice %483 {offsets = [0, 128], sizes = [8, 128], strides = [1, 1]} : vector<8x512xf32> to vector<8x128xf32>
    %491 = arith.negf %490 : vector<8x128xf32>
    %492 = math.exp %491 : vector<8x128xf32>
    %cst_243 = arith.constant 1.000000e+00 : f32
    %493 = vector.broadcast %cst_243 : f32 to vector<8x128xf32>
    %494 = arith.addf %493, %492 : vector<8x128xf32>
    %495 = arith.divf %493, %494 : vector<8x128xf32>
    %496 = vector.extract_strided_slice %483 {offsets = [0, 256], sizes = [8, 128], strides = [1, 1]} : vector<8x512xf32> to vector<8x128xf32>
    %497 = math.tanh %496 : vector<8x128xf32>
    %498 = vector.extract_strided_slice %483 {offsets = [0, 384], sizes = [8, 128], strides = [1, 1]} : vector<8x512xf32> to vector<8x128xf32>
    %499 = arith.negf %498 : vector<8x128xf32>
    %500 = math.exp %499 : vector<8x128xf32>
    %cst_244 = arith.constant 1.000000e+00 : f32
    %501 = vector.broadcast %cst_244 : f32 to vector<8x128xf32>
    %502 = arith.addf %501, %500 : vector<8x128xf32>
    %503 = arith.divf %501, %502 : vector<8x128xf32>
    %c0_245 = arith.constant 0 : index
    %c0_246 = arith.constant 0 : index
    %504 = vector.load %arg15[%c0_245, %c0_246] : memref<8x128xf32, #tpu.memory_space<vmem>>, vector<8x128xf32>
    %505 = arith.mulf %495, %504 : vector<8x128xf32>
    %506 = arith.mulf %489, %497 : vector<8x128xf32>
    %507 = arith.addf %505, %506 : vector<8x128xf32>
    %508 = math.tanh %507 : vector<8x128xf32>
    %509 = arith.mulf %503, %508 : vector<8x128xf32>
    %c0_247 = arith.constant 0 : index
    %c0_248 = arith.constant 0 : index
    %510 = vector.load %arg15[%c0_247, %c0_248] : memref<8x128xf32, #tpu.memory_space<vmem>>, vector<8x128xf32>
    tpu.vector_store %arg15[%c0_247, %c0_248], %507 {strides = array<i32>} : memref<8x128xf32, #tpu.memory_space<vmem>>, vector<8x128xf32>,
    %c0_249 = arith.constant 0 : index
    %c0_250 = arith.constant 0 : index
    %511 = vector.load %arg14[%c0_249, %c0_250] : memref<8x128xf32, #tpu.memory_space<vmem>>, vector<8x128xf32>
    tpu.vector_store %arg14[%c0_249, %c0_250], %509 {strides = array<i32>} : memref<8x128xf32, #tpu.memory_space<vmem>>, vector<8x128xf32>,
    %c0_251 = arith.constant 0 : index
    %c0_252 = arith.constant 0 : index
    %512 = vector.load %arg14[%c0_251, %c0_252] : memref<8x128xf32, #tpu.memory_space<vmem>>, vector<8x128xf32>
    %cst_253 = arith.constant dense<0.000000e+00> : vector<8x512xf32>
    %513 = tpu.matmul %512, %287, %cst_253 {dimension_numbers = #tpu.dot_dimension_numbers<[1], [0], [0], [1], [0, 0, 1, 1], [], []>} : vector<8x128xf32>, vector<128x512xf32>, vector<8x512xf32> -> vector<8x512xf32>
    %c56_254 = arith.constant 56 : index
    %c0_255 = arith.constant 0 : index
    %514 = vector.load %arg13[%c56_254, %c0_255] : memref<64x512xf32, #tpu.memory_space<vmem>>, vector<8x512xf32>
    %515 = arith.addf %513, %514 : vector<8x512xf32>
    %516 = vector.extract_strided_slice %515 {offsets = [0, 0], sizes = [8, 128], strides = [1, 1]} : vector<8x512xf32> to vector<8x128xf32>
    %517 = arith.negf %516 : vector<8x128xf32>
    %518 = math.exp %517 : vector<8x128xf32>
    %cst_256 = arith.constant 1.000000e+00 : f32
    %519 = vector.broadcast %cst_256 : f32 to vector<8x128xf32>
    %520 = arith.addf %519, %518 : vector<8x128xf32>
    %521 = arith.divf %519, %520 : vector<8x128xf32>
    %522 = vector.extract_strided_slice %515 {offsets = [0, 128], sizes = [8, 128], strides = [1, 1]} : vector<8x512xf32> to vector<8x128xf32>
    %523 = arith.negf %522 : vector<8x128xf32>
    %524 = math.exp %523 : vector<8x128xf32>
    %cst_257 = arith.constant 1.000000e+00 : f32
    %525 = vector.broadcast %cst_257 : f32 to vector<8x128xf32>
    %526 = arith.addf %525, %524 : vector<8x128xf32>
    %527 = arith.divf %525, %526 : vector<8x128xf32>
    %528 = vector.extract_strided_slice %515 {offsets = [0, 256], sizes = [8, 128], strides = [1, 1]} : vector<8x512xf32> to vector<8x128xf32>
    %529 = math.tanh %528 : vector<8x128xf32>
    %530 = vector.extract_strided_slice %515 {offsets = [0, 384], sizes = [8, 128], strides = [1, 1]} : vector<8x512xf32> to vector<8x128xf32>
    %531 = arith.negf %530 : vector<8x128xf32>
    %532 = math.exp %531 : vector<8x128xf32>
    %cst_258 = arith.constant 1.000000e+00 : f32
    %533 = vector.broadcast %cst_258 : f32 to vector<8x128xf32>
    %534 = arith.addf %533, %532 : vector<8x128xf32>
    %535 = arith.divf %533, %534 : vector<8x128xf32>
    %c0_259 = arith.constant 0 : index
    %c0_260 = arith.constant 0 : index
    %536 = vector.load %arg15[%c0_259, %c0_260] : memref<8x128xf32, #tpu.memory_space<vmem>>, vector<8x128xf32>
    %537 = arith.mulf %527, %536 : vector<8x128xf32>
    %538 = arith.mulf %521, %529 : vector<8x128xf32>
    %539 = arith.addf %537, %538 : vector<8x128xf32>
    %540 = math.tanh %539 : vector<8x128xf32>
    %541 = arith.mulf %535, %540 : vector<8x128xf32>
    %c0_261 = arith.constant 0 : index
    %c0_262 = arith.constant 0 : index
    %542 = vector.load %arg15[%c0_261, %c0_262] : memref<8x128xf32, #tpu.memory_space<vmem>>, vector<8x128xf32>
    tpu.vector_store %arg15[%c0_261, %c0_262], %539 {strides = array<i32>} : memref<8x128xf32, #tpu.memory_space<vmem>>, vector<8x128xf32>,
    %c0_263 = arith.constant 0 : index
    %c0_264 = arith.constant 0 : index
    %543 = vector.load %arg14[%c0_263, %c0_264] : memref<8x128xf32, #tpu.memory_space<vmem>>, vector<8x128xf32>
    tpu.vector_store %arg14[%c0_263, %c0_264], %541 {strides = array<i32>} : memref<8x128xf32, #tpu.memory_space<vmem>>, vector<8x128xf32>,
    %c0_265 = arith.constant 0 : index
    %c0_266 = arith.constant 0 : index
    %544 = vector.load %arg14[%c0_265, %c0_266] : memref<8x128xf32, #tpu.memory_space<vmem>>, vector<8x128xf32>
    %c0_267 = arith.constant 0 : index
    %c0_268 = arith.constant 0 : index
    %545 = vector.load %arg8[%c0_267, %c0_268] : memref<128x128xf32, #tpu.memory_space<vmem>>, vector<128x128xf32>
    %cst_269 = arith.constant dense<0.000000e+00> : vector<8x128xf32>
    %546 = tpu.matmul %544, %545, %cst_269 {dimension_numbers = #tpu.dot_dimension_numbers<[1], [0], [0], [1], [0, 0, 1, 1], [], []>} : vector<8x128xf32>, vector<128x128xf32>, vector<8x128xf32> -> vector<8x128xf32>
    %c0_270 = arith.constant 0 : index
    %c0_271 = arith.constant 0 : index
    %547 = vector.load %arg1[%c0_270, %c0_271] : memref<8x4xf32, #tpu.memory_space<vmem>>, vector<8x4xf32>
    %c0_272 = arith.constant 0 : index
    %c0_273 = arith.constant 0 : index
    %548 = vector.load %arg9[%c0_272, %c0_273] : memref<4x128xf32, #tpu.memory_space<vmem>>, vector<4x128xf32>
    %cst_274 = arith.constant dense<0.000000e+00> : vector<8x128xf32>
    %549 = tpu.matmul %547, %548, %cst_274 {dimension_numbers = #tpu.dot_dimension_numbers<[1], [0], [0], [1], [0, 0, 1, 1], [], []>} : vector<8x4xf32>, vector<4x128xf32>, vector<8x128xf32> -> vector<8x128xf32>
    %550 = arith.addf %546, %549 : vector<8x128xf32>
    %c0_275 = arith.constant 0 : index
    %c0_276 = arith.constant 0 : index
    %551 = vector.load %arg10[%c0_275, %c0_276] : memref<1x128xf32, #tpu.memory_space<vmem>>, vector<1x128xf32>
    %552 = vector.broadcast %551 : vector<1x128xf32> to vector<8x128xf32>
    %553 = arith.addf %550, %552 : vector<8x128xf32>
    %c0_277 = arith.constant 0 : index
    %c0_278 = arith.constant 0 : index
    %554 = vector.load %arg11[%c0_277, %c0_278] : memref<8x128xf32, #tpu.memory_space<vmem>>, vector<8x128xf32>
    tpu.vector_store %arg11[%c0_277, %c0_278], %553 {strides = array<i32>} : memref<8x128xf32, #tpu.memory_space<vmem>>, vector<8x128xf32>,
    return
  }
}

</mosaic_0001>

<bundles_post_ra>
// kernel: example_lstm_forward.1
= control target key start
LH: loop header
LB: loop body
LE: loop exit
PB: predicated region body
PF: predicated region fallthrough
CT: control target
= control target key end

     0   :  { %16 = vsyncpa [#allocation7], 0  ;;  %s6627_s0 = inlined_call_operand.vmem [shape: f32[64,6], index: 0, kind: input, shape index: {}]   ;;  %s6628_s1 = inlined_call_operand.vmem [shape: f32[8,4], index: 1, kind: input, shape index: {}]   ;;  %s6629_s2 = inlined_call_operand.vmem [shape: f32[6,512], index: 2, kind: input, shape index: {}]   ;;  %s6630_s3 = inlined_call_operand.hbm [shape: f32[128,512], index: 3, kind: input, shape index: {}]   ;;  %s6631_s4 = inlined_call_operand.vmem [shape: f32[1,512], index: 4, kind: input, shape index: {}]   ;;  %s6632_s5 = inlined_call_operand.hbm [shape: f32[128,512], index: 5, kind: input, shape index: {}]   ;;  %s6633_s6 = inlined_call_operand.hbm [shape: f32[128,512], index: 6, kind: input, shape index: {}]   ;;  %s6634_s7 = inlined_call_operand.vmem [shape: f32[1,512], index: 7, kind: input, shape index: {}]   ;;  %s6635_s8 = inlined_call_operand.hbm [shape: f32[128,128], index: 8, kind: input, shape index: {}]   ;;  %s6636_s9 = inlined_call_operand.vmem [shape: f32[4,128], index: 9, kind: input, shape index: {}]   ;;  %s6637_s10 = inlined_call_operand.vmem [shape: f32[1,128], index: 10, kind: input, shape index: {}]   ;;  %s6638_s11 = inlined_call_operand.vmem [shape: f32[8,128], index: 11, kind: output, shape index: {}]  }
   0x1   :  { %17 = vsyncpa [#allocation9], 0 }
   0x2   :  { %18 = vsyncpa [#allocation12], 0  ;;  %s4492_s17 = smov [#allocation8]   ;;  %s4493_s19 = smov [#allocation6]  }
   0x3   :  { %s44_s18 = sshll.u32 %s4492_s17, 4  ;;  %s30_s20 = sshll.u32 %s4493_s19, 4  ;;  %s45_s18 = int_to_ptr.vmem [resolvable:$true] %s44_s18  ;;  %s31_s20 = int_to_ptr.vmem [resolvable:$true] %s30_s20 }
   0x4   :  { %s4414_s21 = scalar_lea.vmem %s45_s18, 8192  ;;  %p4419_p1 = scmp.lt.s32.totalorder %s45_s18, %s45_s18 }
   0x5   :  { %p4415_p0 = scmp.ne.s32.totalorder %s45_s18, %s4414_s21  ;;  %p4420_p2 = scmp.lt.s32.totalorder %s4414_s21, %s4414_s21 }
   0x7   :  { %p4421_p3 = por %p4420_p2, %p4419_p1 }
   0x9   :  { %p4422_p4 = pnand %p4421_p3, %p4415_p0 }
   0xb   :  { %4425 = shalt.err (!%p4422_p4)
}
   0xc   :  { %s4494_s22 = smov 512   ;;  %s4495_s23 = smov 32  }
   0xd   :  { %50 = dma.hbm_to_vmem [thread:$0]  %s6632_s5, 8192, %s45_s18, [#allocation9], %s4494_s22, %s4494_s22, %s4495_s23  }
   0xe   :  { %s4434_s26 = scalar_lea.vmem %s31_s20, 8192  ;;  %p4439_p6 = scmp.lt.s32.totalorder %s31_s20, %s31_s20 }
   0xf   :  { %p4435_p5 = scmp.ne.s32.totalorder %s31_s20, %s4434_s26  ;;  %p4440_p7 = scmp.lt.s32.totalorder %s4434_s26, %s4434_s26 }
  0x11   :  { %p4441_p8 = por %p4440_p7, %p4439_p6 }
  0x13   :  { %p4442_p9 = pnand %p4441_p8, %p4435_p5 }
  0x15   :  { %4445 = shalt.err (!%p4442_p9)
}
  0x16   :  { %36 = dma.hbm_to_vmem [thread:$0]  %s6630_s3, 8192, %s31_s20, [#allocation7], %s4494_s22, %s4494_s22, %s4495_s23  }
  0x17   :  { %s4496_s29 = smov [#allocation10]   ;;  %s4497_s12 = smov [#allocation11]  }
  0x18   :  { %s56_s30 = sshll.u32 %s4496_s29, 4  ;;  %s70_s13 = sshll.u32 %s4497_s12, 4  ;;  %s57_s30 = int_to_ptr.vmem [resolvable:$true] %s56_s30  ;;  %s71_s13 = int_to_ptr.vmem [resolvable:$true] %s70_s13 }
  0x19   :  { %s4454_s14 = scalar_lea.vmem %s57_s30, 8192  ;;  %p4459_p11 = scmp.lt.s32.totalorder %s57_s30, %s57_s30 }
  0x1a   :  { %p4455_p10 = scmp.ne.s32.totalorder %s57_s30, %s4454_s14  ;;  %p4460_p12 = scmp.lt.s32.totalorder %s4454_s14, %s4454_s14 }
  0x1c   :  { %p4461_p13 = por %p4460_p12, %p4459_p11 }
  0x1e   :  { %p4462_p0 = pnand %p4461_p13, %p4455_p10 }
  0x20   :  { %4465 = shalt.err (!%p4462_p0)
}
  0x21   :  { %62 = dma.hbm_to_vmem [thread:$0]  %s6633_s6, 8192, %s57_s30, [#allocation9], %s4494_s22, %s4494_s22, %s4495_s23  }
  0x22   :  { %s4474_s16 = scalar_lea.vmem %s71_s13, 2048  ;;  %p4479_p2 = scmp.lt.s32.totalorder %s71_s13, %s71_s13 }
  0x23   :  { %p4475_p1 = scmp.ne.s32.totalorder %s71_s13, %s4474_s16  ;;  %p4480_p3 = scmp.lt.s32.totalorder %s4474_s16, %s4474_s16 }
  0x25   :  { %p4481_p4 = por %p4480_p3, %p4479_p2 }
  0x27   :  { %p4482_p5 = pnand %p4481_p4, %p4475_p1 }
  0x29   :  { %4485 = shalt.err (!%p4482_p5)
}
  0x2a   :  { %s4498_s3 = smov 128   ;;  %s4499_s17 = smov 8  }
  0x2b   :  { %76 = dma.hbm_to_vmem [thread:$0]  %s6635_s8, 2048, %s71_s13, [#allocation12], %s4498_s3, %s4498_s3, %s4499_s17  }
  0x2c   :  { %4486 = dma.done.wait [#allocation7], 8192  }
  0x2d   :  { %4487 = vsyncadd [#allocation7], 4294959104 }
  0x2e   :  { %4488 = dma.done.wait [#allocation9], 16384  }
  0x2f   :  { %4489 = vsyncadd [#allocation9], 4294950912 }
  0x30   :  { %4490 = dma.done.wait [#allocation12], 2048  }
  0x31   :  { %4491 = vsyncadd [#allocation12], 4294965248  ;;  %v6639_v0 = vmov 0.0   ;;  %vm152_vm0 = vcmask 1045504   ;;  %vm127_vm1 = vcmask 48128   ;;  %v93_v5 = vld [vmem:[%s6627_s0] sm:$0xff] }
  0x32   :  { %229 = vmatprep.mubr.f32.mxu0 %v6639_v0  ;;  %342 = vmatprep.mubr.f32.mxu1 %v6639_v0  ;;  %v102_v1 = vld [vmem:[%s6629_s2 + $0x8] sm:$0x3f]  ;;  %v104_v2 = vld [vmem:[%s6629_s2 + $0x18] sm:$0x3f]  ;;  %v101_v3 = vld [vmem:[%s6629_s2] sm:$0x3f] }
  0x33   :  { %3882 = vmatprep.subr.msk.mxu0 %vm152_vm0, %v102_v1  ;;  %3892 = vmatprep.subr.msk.mxu1 %vm152_vm0, %v104_v2  ;;  %v103_v4 = vld [vmem:[%s6629_s2 + $0x10] sm:$0x3f]  ;;  %v4591_v6 = vld [vmem:[#allocation6 + $0x1e8] sm:$0xff]  ;;  %v4593_v7 = vld [vmem:[#allocation6 + $0x1f8] sm:$0xff]  ;;  %vm3722_vm2 = vcmask 1043456   ;;  %vm4501_vm3 = vmmov 0  }
  0x34   :  { %6845 = vst [vmem:[#allocation16_spill] sm:$0xff] %v4591_v6  ;;  %3883 = vmatpush1.msk.msra.mxu0 %vm152_vm0, %v101_v3  ;;  %3893 = vmatpush1.msk.msra.mxu1 %vm152_vm0, %v103_v4  ;;  %6846 = vst [vmem:[#allocation17_spill] sm:$0xff] %v4593_v7  ;;  %v4595_v8 = vld [vmem:[#allocation6 + $0x1e0] sm:$0xff]  ;;  %v4597_v9 = vld [vmem:[#allocation6 + $0x1f0] sm:$0xff]  ;;  %vm3718_vm4 = vcmask 31744  }
  0x35   :  { %3884 = vmatmul.mubr.msk.f32.vlgmr.msra.gmra.mxu0 %vm127_vm1, %v93_v5  ;;  %3894 = vmatmul.mubr.msk.f32.vlgmr.msra.gmra.mxu1 %vm127_vm1, %v93_v5  ;;  %v4601_v10 = vld [vmem:[#allocation6 + $0x1c8] sm:$0xff]  ;;  %v4603_v11 = vld [vmem:[#allocation6 + $0x1d8] sm:$0xff]  ;;  %v4609_v12 = vld [vmem:[#allocation6 + $0x1c0] sm:$0xff] }
  0x36   :  { %494 = vmatprep.subr.mxu0 %v4591_v6  ;;  %565 = vmatprep.subr.mxu1 %v4593_v7  ;;  %v4611_v13 = vld [vmem:[#allocation6 + $0x1d0] sm:$0xff]  ;;  %v94_v14 = vld [vmem:[%s6627_s0 + $0x8] sm:$0xff]  ;;  %v4622_v16 = vld [vmem:[#allocation6 + $0x1b8] sm:$0xff] }
  0x37   :  { %495 = vmatpush1.msra.mxu0 %v4595_v8  ;;  %566 = vmatpush1.msra.mxu1 %v4597_v9  ;;  %v4620_v15 = vld [vmem:[#allocation6 + $0x1a8] sm:$0xff]  ;;  %v4626_v17 = vld [vmem:[#allocation6 + $0x1a0] sm:$0xff]  ;;  %v4628_v18 = vld [vmem:[#allocation6 + $0x1b0] sm:$0xff] }
  0x38   :  { %496 = vmatprep.subr.mxu0 %v4601_v10  ;;  %567 = vmatprep.subr.mxu1 %v4603_v11  ;;  %v4632_v19 = vld [vmem:[#allocation6 + $0x188] sm:$0xff]  ;;  %v4634_v20 = vld [vmem:[#allocation6 + $0x198] sm:$0xff]  ;;  %v4640_v21 = vld [vmem:[#allocation6 + $0x180] sm:$0xff] }
  0x39   :  { %235 = vmatprep.mubr.f32.mxu0 %v6639_v0  ;;  %348 = vmatprep.mubr.f32.mxu1 %v6639_v0  ;;  %v4642_v22 = vld [vmem:[#allocation6 + $0x190] sm:$0xff]  ;;  %v4651_v24 = vld [vmem:[#allocation6 + $0x168] sm:$0xff]  ;;  %v4653_v25 = vld [vmem:[#allocation6 + $0x178] sm:$0xff] }
  0x3a   :  { %497 = vmatpush1.msra.mxu0 %v4609_v12  ;;  %568 = vmatpush1.msra.mxu1 %v4611_v13  ;;  %v95_v23 = vld [vmem:[%s6627_s0 + $0x10] sm:$0xff]  ;;  %v4657_v26 = vld [vmem:[#allocation6 + $0x160] sm:$0xff]  ;;  %v4663_v28 = vld [vmem:[#allocation6 + $0x148] sm:$0xff] }
  0x3b   :  { %3885 = vmatmul.mubr.msk.f32.gmra.mxu0 %vm127_vm1, %v94_v14  ;;  %3895 = vmatmul.mubr.msk.f32.gmra.mxu1 %vm127_vm1, %v94_v14  ;;  %v4659_v27 = vld [vmem:[#allocation6 + $0x170] sm:$0xff]  ;;  %v4665_v29 = vld [vmem:[#allocation6 + $0x158] sm:$0xff]  ;;  %v4671_v30 = vld [vmem:[#allocation6 + $0x140] sm:$0xff] }
  0x3c   :  { %498 = vmatprep.subr.mxu0 %v4620_v15  ;;  %569 = vmatprep.subr.mxu1 %v4622_v16  ;;  %v4673_v31 = vld [vmem:[#allocation6 + $0x150] sm:$0xff]  ;;  %v96_v32 = vld [vmem:[%s6627_s0 + $0x18] sm:$0xff]  ;;  %v4682_v33 = vld [vmem:[#allocation6 + $0x128] sm:$0xff] }
  0x3d   :  { %499 = vmatpush1.msra.mxu0 %v4626_v17  ;;  %570 = vmatpush1.msra.mxu1 %v4628_v18  ;;  %v4684_v34 = vld [vmem:[#allocation6 + $0x138] sm:$0xff]  ;;  %v4688_v35 = vld [vmem:[#allocation6 + $0x120] sm:$0xff]  ;;  %v4690_v36 = vld [vmem:[#allocation6 + $0x130] sm:$0xff] }
  0x3e   :  { %500 = vmatprep.subr.mxu0 %v4632_v19  ;;  %571 = vmatprep.subr.mxu1 %v4634_v20  ;;  %v4694_v37 = vld [vmem:[#allocation6 + $0x108] sm:$0xff]  ;;  %v4696_v38 = vld [vmem:[#allocation6 + $0x118] sm:$0xff]  ;;  %v4702_v39 = vld [vmem:[#allocation6 + $0x100] sm:$0xff] }
  0x3f   :  { %241 = vmatprep.mubr.f32.mxu0 %v6639_v0  ;;  %354 = vmatprep.mubr.f32.mxu1 %v6639_v0  ;;  %v4704_v40 = vld [vmem:[#allocation6 + $0x110] sm:$0xff]  ;;  %v97_v41 = vld [vmem:[%s6627_s0 + $0x20] sm:$0xff]  ;;  %v4713_v42 = vld [vmem:[#allocation6 + $0xe8] sm:$0xff] }
  0x40   :  { %501 = vmatpush1.msra.mxu0 %v4640_v21  ;;  %572 = vmatpush1.msra.mxu1 %v4642_v22  ;;  %v4715_v43 = vld [vmem:[#allocation6 + $0xf8] sm:$0xff]  ;;  %v4719_v44 = vld [vmem:[#allocation6 + $0xe0] sm:$0xff]  ;;  %v4721_v45 = vld [vmem:[#allocation6 + $0xf0] sm:$0xff] }
  0x41   :  { %3886 = vmatmul.mubr.msk.f32.gmra.mxu0 %vm127_vm1, %v95_v23  ;;  %3896 = vmatmul.mubr.msk.f32.gmra.mxu1 %vm127_vm1, %v95_v23  ;;  %v4725_v46 = vld [vmem:[#allocation6 + $0xc8] sm:$0xff]  ;;  %v4727_v47 = vld [vmem:[#allocation6 + $0xd8] sm:$0xff]  ;;  %v4733_v48 = vld [vmem:[#allocation6 + $0xc0] sm:$0xff] }
  0x42   :  { %502 = vmatprep.subr.mxu0 %v4651_v24  ;;  %573 = vmatprep.subr.mxu1 %v4653_v25  ;;  %v4735_v49 = vld [vmem:[#allocation6 + $0xd0] sm:$0xff]  ;;  %v98_v50 = vld [vmem:[%s6627_s0 + $0x28] sm:$0xff]  ;;  %v4746_v52 = vld [vmem:[#allocation6 + $0xb8] sm:$0xff] }
  0x43   :  { %503 = vmatpush1.msra.mxu0 %v4657_v26  ;;  %574 = vmatpush1.msra.mxu1 %v4659_v27  ;;  %v4744_v51 = vld [vmem:[#allocation6 + $0xa8] sm:$0xff]  ;;  %v4750_v53 = vld [vmem:[#allocation6 + $0xa0] sm:$0xff]  ;;  %v4752_v54 = vld [vmem:[#allocation6 + $0xb0] sm:$0xff] }
  0x44   :  { %504 = vmatprep.subr.mxu0 %v4663_v28  ;;  %575 = vmatprep.subr.mxu1 %v4665_v29  ;;  %6847 = vst [vmem:[#allocation18_spill] sm:$0xff] %v4752_v54  ;;  %v4756_v55 = vld [vmem:[#allocation6 + $0x88] sm:$0xff]  ;;  %v4758_v56 = vld [vmem:[#allocation6 + $0x98] sm:$0xff]  ;;  %v4764_v57 = vld [vmem:[#allocation6 + $0x80] sm:$0xff] }
  0x45   :  { %247 = vmatprep.mubr.f32.mxu0 %v6639_v0  ;;  %360 = vmatprep.mubr.f32.mxu1 %v6639_v0  ;;  %6848 = vst [vmem:[#allocation19_spill] sm:$0xff] %v4756_v55  ;;  %6849 = vst [vmem:[#allocation20_spill] sm:$0xff] %v4758_v56  ;;  %v4766_v58 = vld [vmem:[#allocation6 + $0x90] sm:$0xff]  ;;  %v4775_v60 = vld [vmem:[#allocation6 + $0x68] sm:$0xff] }
  0x46   :  { %505 = vmatpush1.msra.mxu0 %v4671_v30  ;;  %576 = vmatpush1.msra.mxu1 %v4673_v31  ;;  %6850 = vst [vmem:[#allocation21_spill] sm:$0xff] %v4764_v57  ;;  %6851 = vst [vmem:[#allocation22_spill] sm:$0xff] %v4766_v58  ;;  %v99_v59 = vld [vmem:[%s6627_s0 + $0x30] sm:$0xff]  ;;  %v4777_v61 = vld [vmem:[#allocation6 + $0x78] sm:$0xff] }
  0x47   :  { %3887 = vmatmul.mubr.msk.f32.gmra.mxu0 %vm127_vm1, %v96_v32  ;;  %3897 = vmatmul.mubr.msk.f32.gmra.mxu1 %vm127_vm1, %v96_v32  ;;  %6852 = vst [vmem:[#allocation23_spill] sm:$0xff] %v4775_v60  ;;  %6853 = vst [vmem:[#allocation24_spill] sm:$0xff] %v4777_v61  ;;  %v4781_v62 = vld [vmem:[#allocation6 + $0x60] sm:$0xff]  ;;  %v4783_v63 = vld [vmem:[#allocation6 + $0x70] sm:$0xff] }
  0x48   :  { %506 = vmatprep.subr.mxu0 %v4682_v33  ;;  %577 = vmatprep.subr.mxu1 %v4684_v34  ;;  %6854 = vst [vmem:[#allocation25_spill] sm:$0xff] %v4781_v62  ;;  %6855 = vst [vmem:[#allocation26_spill] sm:$0xff] %v4783_v63  ;;  %v4787_v1 = vld [vmem:[#allocation6 + $0x48] sm:$0xff]  ;;  %v4789_v2 = vld [vmem:[#allocation6 + $0x58] sm:$0xff] }
  0x49   :  { %507 = vmatpush1.msra.mxu0 %v4688_v35  ;;  %578 = vmatpush1.msra.mxu1 %v4690_v36  ;;  %6856 = vst [vmem:[#allocation27_spill] sm:$0xff] %v4787_v1  ;;  %6857 = vst [vmem:[#allocation28_spill] sm:$0xff] %v4789_v2  ;;  %v4795_v3 = vld [vmem:[#allocation6 + $0x40] sm:$0xff]  ;;  %v4797_v4 = vld [vmem:[#allocation6 + $0x50] sm:$0xff] }
  0x4a   :  { %508 = vmatprep.subr.mxu0 %v4694_v37  ;;  %579 = vmatprep.subr.mxu1 %v4696_v38  ;;  %6858 = vst [vmem:[#allocation29_spill] sm:$0xff] %v4795_v3  ;;  %6859 = vst [vmem:[#allocation30_spill] sm:$0xff] %v4797_v4  ;;  %v100_v5 = vld [vmem:[%s6627_s0 + $0x38] sm:$0xff]  ;;  %v4806_v14 = vld [vmem:[#allocation6 + $0x28] sm:$0xff] }
  0x4b   :  { %253 = vmatprep.mubr.f32.mxu0 %v6639_v0  ;;  %366 = vmatprep.mubr.f32.mxu1 %v6639_v0  ;;  %6860 = vst [vmem:[#allocation31_spill] sm:$0xff] %v4806_v14  ;;  %v4808_v23 = vld [vmem:[#allocation6 + $0x38] sm:$0xff]  ;;  %v4812_v32 = vld [vmem:[#allocation6 + $0x20] sm:$0xff] }
  0x4c   :  { %509 = vmatpush1.msra.mxu0 %v4702_v39  ;;  %580 = vmatpush1.msra.mxu1 %v4704_v40  ;;  %6861 = vst [vmem:[#allocation32_spill] sm:$0xff] %v4808_v23  ;;  %6862 = vst [vmem:[#allocation33_spill] sm:$0xff] %v4812_v32 }
  0x4d   :  { %3888 = vmatmul.mubr.msk.f32.gmra.mxu0 %vm127_vm1, %v97_v41  ;;  %3898 = vmatmul.mubr.msk.f32.gmra.mxu1 %vm127_vm1, %v97_v41  ;;  %v4814_v41 = vld [vmem:[#allocation6 + $0x30] sm:$0xff] }
  0x4e   :  { %510 = vmatprep.subr.mxu0 %v4713_v42  ;;  %581 = vmatprep.subr.mxu1 %v4715_v43  ;;  %6863 = vst [vmem:[#allocation34_spill] sm:$0xff] %v4814_v41 }
  0x4f   :  { %511 = vmatpush1.msra.mxu0 %v4719_v44  ;;  %582 = vmatpush1.msra.mxu1 %v4721_v45 }
  0x50   :  { %512 = vmatprep.subr.mxu0 %v4725_v46  ;;  %583 = vmatprep.subr.mxu1 %v4727_v47 }
  0x51   :  { %259 = vmatprep.mubr.f32.mxu0 %v6639_v0  ;;  %372 = vmatprep.mubr.f32.mxu1 %v6639_v0 }
  0x52   :  { %513 = vmatpush1.msra.mxu0 %v4733_v48  ;;  %584 = vmatpush1.msra.mxu1 %v4735_v49 }
  0x53   :  { %3889 = vmatmul.mubr.msk.f32.gmra.mxu0 %vm127_vm1, %v98_v50  ;;  %3899 = vmatmul.mubr.msk.f32.gmra.mxu1 %vm127_vm1, %v98_v50  ;;  %v4818_v50 = vld [vmem:[#allocation6 + $0x8] sm:$0xff] }
  0x54   :  { %514 = vmatprep.subr.mxu0 %v4744_v51  ;;  %585 = vmatprep.subr.mxu1 %v4746_v52  ;;  %6864 = vst [vmem:[#allocation35_spill] sm:$0xff] %v4818_v50 }
  0x55   :  { %515 = vmatpush1.msra.mxu0 %v4750_v53  ;;  %586 = vmatpush1.msra.mxu1 %v4752_v54 }
  0x56   :  { %516 = vmatprep.subr.mxu0 %v4756_v55  ;;  %587 = vmatprep.subr.mxu1 %v4758_v56 }
  0x57   :  { %265 = vmatprep.mubr.f32.mxu0 %v6639_v0  ;;  %378 = vmatprep.mubr.f32.mxu1 %v6639_v0 }
  0x58   :  { %517 = vmatpush1.msra.mxu0 %v4764_v57  ;;  %588 = vmatpush1.msra.mxu1 %v4766_v58 }
  0x59   :  { %3890 = vmatmul.mubr.msk.f32.gmra.mxu0 %vm127_vm1, %v99_v59  ;;  %3900 = vmatmul.mubr.msk.f32.gmra.mxu1 %vm127_vm1, %v99_v59  ;;  %v4820_v59 = vld [vmem:[#allocation6 + $0x18] sm:$0xff] }
  0x5a   :  { %518 = vmatprep.subr.mxu0 %v4775_v60  ;;  %589 = vmatprep.subr.mxu1 %v4777_v61  ;;  %6865 = vst [vmem:[#allocation36_spill] sm:$0xff] %v4820_v59 }
  0x5b   :  { %519 = vmatpush1.msra.mxu0 %v4781_v62  ;;  %590 = vmatpush1.msra.mxu1 %v4783_v63 }
  0x5c   :  { %520 = vmatprep.subr.mxu0 %v4787_v1  ;;  %591 = vmatprep.subr.mxu1 %v4789_v2 }
  0x5d   :  { %271 = vmatprep.mubr.f32.mxu0 %v6639_v0  ;;  %384 = vmatprep.mubr.f32.mxu1 %v6639_v0  ;;  %v4824_v0 = vld [vmem:[#allocation6] sm:$0xff] }
  0x5e   :  { %521 = vmatpush1.msra.mxu0 %v4795_v3  ;;  %592 = vmatpush1.msra.mxu1 %v4797_v4  ;;  %6866 = vst [vmem:[#allocation37_spill] sm:$0xff] %v4824_v0  ;;  %v4828_v4 = vld [vmem:[#allocation6 + $0x10] sm:$0xff] }
  0x5f   :  { %3891 = vmatmul.mubr.msk.f32.gmra.mxu0 %vm127_vm1, %v100_v5  ;;  %3901 = vmatmul.mubr.msk.f32.gmra.mxu1 %vm127_vm1, %v100_v5  ;;  %6867 = vst [vmem:[#allocation38_spill] sm:$0xff] %v4828_v4  ;;  %v6868_v5 = vmov 0.0  }
  0x60   :  { %522 = vmatprep.subr.mxu0 %v4806_v14  ;;  %593 = vmatprep.subr.mxu1 %v4808_v23 }
  0x61   :  { %523 = vmatpush1.msra.mxu0 %v4812_v32  ;;  %594 = vmatpush1.msra.mxu1 %v4814_v41 }
  0x62   :  { %524 = vmatprep.subr.mxu0 %v4818_v50  ;;  %595 = vmatprep.subr.mxu1 %v4820_v59 }
  0x63   :  { %525 = vmatpush1.msra.mxu0 %v4824_v0  ;;  %558 = vmatprep.mubr.f32.mxu0 %v6868_v5 }
  0x64   :  { %596 = vmatpush1.msra.mxu1 %v4828_v4  ;;  %629 = vmatprep.mubr.f32.mxu1 %v6868_v5 }
  0x65   :  { %559 = vmatmul.mubr.f32.vlgmr.msra.gmra.mxu0 %v6868_v5  ;;  %630 = vmatmul.mubr.f32.vlgmr.msra.gmra.mxu1 %v6868_v5 }
  0x66   :  { %669 = vmatprep.subr.mxu0 %v4591_v6  ;;  %740 = vmatprep.subr.mxu1 %v4593_v7 }
  0x67   :  { %670 = vmatpush1.msra.mxu0 %v4595_v8  ;;  %741 = vmatpush1.msra.mxu1 %v4597_v9 }
  0x68   :  { %671 = vmatprep.subr.mxu0 %v4601_v10  ;;  %742 = vmatprep.subr.mxu1 %v4603_v11 }
  0x69   :  { %672 = vmatpush1.msra.mxu0 %v4609_v12  ;;  %743 = vmatpush1.msra.mxu1 %v4611_v13 }
  0x6a   :  { %673 = vmatprep.subr.mxu0 %v4620_v15  ;;  %744 = vmatprep.subr.mxu1 %v4622_v16 }
  0x6b   :  { %674 = vmatpush1.msra.mxu0 %v4626_v17  ;;  %745 = vmatpush1.msra.mxu1 %v4628_v18 }
  0x6c   :  { %675 = vmatprep.subr.mxu0 %v4632_v19  ;;  %746 = vmatprep.subr.mxu1 %v4634_v20 }
  0x6d   :  { %676 = vmatpush1.msra.mxu0 %v4640_v21  ;;  %747 = vmatpush1.msra.mxu1 %v4642_v22 }
  0x6e   :  { %677 = vmatprep.subr.mxu0 %v4651_v24  ;;  %748 = vmatprep.subr.mxu1 %v4653_v25 }
  0x6f   :  { %678 = vmatpush1.msra.mxu0 %v4657_v26  ;;  %749 = vmatpush1.msra.mxu1 %v4659_v27 }
  0x70   :  { %679 = vmatprep.subr.mxu0 %v4663_v28  ;;  %750 = vmatprep.subr.mxu1 %v4665_v29 }
  0x71   :  { %680 = vmatpush1.msra.mxu0 %v4671_v30  ;;  %751 = vmatpush1.msra.mxu1 %v4673_v31 }
  0x72   :  { %681 = vmatprep.subr.mxu0 %v4682_v33  ;;  %752 = vmatprep.subr.mxu1 %v4684_v34 }
  0x73   :  { %682 = vmatpush1.msra.mxu0 %v4688_v35  ;;  %753 = vmatpush1.msra.mxu1 %v4690_v36 }
  0x74   :  { %683 = vmatprep.subr.mxu0 %v4694_v37  ;;  %754 = vmatprep.subr.mxu1 %v4696_v38 }
  0x75   :  { %684 = vmatpush1.msra.mxu0 %v4702_v39  ;;  %755 = vmatpush1.msra.mxu1 %v4704_v40 }
  0x76   :  { %685 = vmatprep.subr.mxu0 %v4713_v42  ;;  %756 = vmatprep.subr.mxu1 %v4715_v43 }
  0x77   :  { %686 = vmatpush1.msra.mxu0 %v4719_v44  ;;  %757 = vmatpush1.msra.mxu1 %v4721_v45 }
  0x78   :  { %687 = vmatprep.subr.mxu0 %v4725_v46  ;;  %758 = vmatprep.subr.mxu1 %v4727_v47 }
  0x79   :  { %688 = vmatpush1.msra.mxu0 %v4733_v48  ;;  %759 = vmatpush1.msra.mxu1 %v4735_v49 }
  0x7a   :  { %689 = vmatprep.subr.mxu0 %v4744_v51  ;;  %760 = vmatprep.subr.mxu1 %v4746_v52 }
  0x7b   :  { %690 = vmatpush1.msra.mxu0 %v4750_v53  ;;  %761 = vmatpush1.msra.mxu1 %v4752_v54 }
  0x7c   :  { %691 = vmatprep.subr.mxu0 %v4756_v55  ;;  %762 = vmatprep.subr.mxu1 %v4758_v56  ;;  %v6869_v55 = vld [vmem:[#allocation30_spill] sm:$0xff] }
  0x7d   :  { %692 = vmatpush1.msra.mxu0 %v4764_v57  ;;  %763 = vmatpush1.msra.mxu1 %v4766_v58 }
  0x7e   :  { %693 = vmatprep.subr.mxu0 %v4775_v60  ;;  %764 = vmatprep.subr.mxu1 %v4777_v61 }
  0x7f   :  { %694 = vmatpush1.msra.mxu0 %v4781_v62  ;;  %765 = vmatpush1.msra.mxu1 %v4783_v63 }
  0x80   :  { %695 = vmatprep.subr.mxu0 %v4787_v1  ;;  %766 = vmatprep.subr.mxu1 %v4789_v2 }
  0x81   :  { %696 = vmatpush1.msra.mxu0 %v4795_v3  ;;  %767 = vmatpush1.msra.mxu1 %v6869_v55 }
  0x82   :  { %697 = vmatprep.subr.mxu0 %v4806_v14  ;;  %768 = vmatprep.subr.mxu1 %v4808_v23  ;;  %v107_v23 = vlaneseq }
  0x83   :  { %698 = vmatpush1.msra.mxu0 %v4812_v32  ;;  %769 = vmatpush1.msra.mxu1 %v4814_v41 }
  0x84   :  { %699 = vmatprep.subr.mxu0 %v4818_v50  ;;  %770 = vmatprep.subr.mxu1 %v4820_v59  ;;  %v4906_v32 = vshrl.u32 %v107_v23, 7 }
  0x85   :  { %700 = vmatpush1.msra.mxu0 %v4824_v0  ;;  %733 = vmatprep.mubr.f32.mxu0 %v6868_v5 }
  0x86   :  { %771 = vmatpush1.msra.mxu1 %v4828_v4  ;;  %804 = vmatprep.mubr.f32.mxu1 %v6868_v5  ;;  %6870 = vst [vmem:[#allocation39_spill] sm:$0xff] %v4906_v32  ;;  %v6678_v59 = vsub.s32 0, %v4906_v32  ;;  %v6681_v0 = vsub.s32 2, %v4906_v32  ;;  %v105_v4 = vld [vmem:[%s6631_s4] sm:$0xf]  ;;  %v6689_v23 = vsub.s32 3, %v4906_v32 }
  0x87   :  { %844 = vmatprep.subr.mxu0 %v4591_v6  ;;  %915 = vmatprep.subr.mxu1 %v4593_v7  ;;  %v6688_v7 = vsub.s32 1, %v4906_v32 }
  0x88   :  { %v110_v14 = vrot.slane %v105_v4, %v6678_v59  ;;  %v4927_v55 = vrot.slane %v105_v4, %v6681_v0  ;;  %v4933_v63 = vrot.slane %v105_v4, %v6689_v23 }
  0x89   :  { %v114_v1 = vrot.slane %v105_v4, %v6688_v7 }
  0xf5   :  { %v4908_v41 = vpop.f32.mrf.mxu0  ;;  %v4910_v50 = vpop.f32.mrf.mxu1 }
  0xf7   :  { %v4917_v5 = vpop.f32.mrf.mxu0  ;;  %v4919_v6 = vpop.f32.mrf.mxu1 }
  0xfb   :  { %v237_v3 = vpop.f32.mrf.mxu0  ;;  %v350_v2 = vpop.f32.mrf.mxu1 }
  0xfc   :  { %v4935_v62 = vadd.f32 %v237_v3, %v110_v14  ;;  %v4938_v61 = vadd.f32 %v350_v2, %v4927_v55 }
  0xfd   :  { %v239_v60 = vpop.f32.mrf.mxu0  ;;  %v352_v59 = vpop.f32.mrf.mxu1 }
  0xfe   :  { %6871 = vst [vmem:[#allocation40_spill] sm:$0xff] %v4938_v61  ;;  %v4940_v58 = vadd.f32 %v239_v60, %v114_v1  ;;  %v4943_v0 = vadd.f32 %v352_v59, %v4933_v63 }
 0x100   :  { %6872 = vst [vmem:[#allocation41_spill] sm:$0xff] %v4940_v58  ;;  %6873 = vst [vmem:[#allocation42_spill] sm:$0xff] %v4943_v0 }
 0x101   :  { %v243_v57 = vpop.f32.mrf.mxu0  ;;  %v356_v56 = vpop.f32.mrf.mxu1 }
 0x102   :  { %v4945_v54 = vadd.f32 %v243_v57, %v110_v14  ;;  %v4948_v7 = vadd.f32 %v356_v56, %v4927_v55 }
 0x103   :  { %v245_v4 = vpop.f32.mrf.mxu0  ;;  %v358_v3 = vpop.f32.mrf.mxu1 }
 0x104   :  { %6874 = vst [vmem:[#allocation43_spill] sm:$0xff] %v4945_v54  ;;  %6875 = vst [vmem:[#allocation44_spill] sm:$0xff] %v4948_v7  ;;  %v4950_v23 = vadd.f32 %v245_v4, %v114_v1  ;;  %v4953_v2 = vadd.f32 %v358_v3, %v4933_v63 }
 0x106   :  { %6876 = vst [vmem:[#allocation45_spill] sm:$0xff] %v4950_v23  ;;  %6877 = vst [vmem:[#allocation46_spill] sm:$0xff] %v4953_v2 }
 0x107   :  { %v249_v32 = vpop.f32.mrf.mxu0  ;;  %v362_v60 = vpop.f32.mrf.mxu1 }
 0x108   :  { %v4955_v61 = vadd.f32 %v249_v32, %v110_v14  ;;  %v4958_v59 = vadd.f32 %v362_v60, %v4927_v55 }
 0x109   :  { %v251_v0 = vpop.f32.mrf.mxu0  ;;  %v364_v57 = vpop.f32.mrf.mxu1 }
 0x10a   :  { %6878 = vst [vmem:[#allocation47_spill] sm:$0xff] %v4955_v61  ;;  %6879 = vst [vmem:[#allocation48_spill] sm:$0xff] %v4958_v59  ;;  %v4960_v54 = vadd.f32 %v251_v0, %v114_v1  ;;  %v4963_v56 = vadd.f32 %v364_v57, %v4933_v63 }
 0x10c   :  { %6880 = vst [vmem:[#allocation49_spill] sm:$0xff] %v4960_v54  ;;  %6881 = vst [vmem:[#allocation50_spill] sm:$0xff] %v4963_v56 }
 0x10d   :  { %v255_v7 = vpop.f32.mrf.mxu0  ;;  %v368_v4 = vpop.f32.mrf.mxu1 }
 0x10e   :  { %v4965_v23 = vadd.f32 %v255_v7, %v110_v14  ;;  %v4968_v3 = vadd.f32 %v368_v4, %v4927_v55 }
 0x10f   :  { %v257_v2 = vpop.f32.mrf.mxu0  ;;  %v370_v32 = vpop.f32.mrf.mxu1 }
 0x110   :  { %6882 = vst [vmem:[#allocation51_spill] sm:$0xff] %v4965_v23  ;;  %6883 = vst [vmem:[#allocation52_spill] sm:$0xff] %v4968_v3  ;;  %v4970_v61 = vadd.f32 %v257_v2, %v114_v1  ;;  %v4973_v60 = vadd.f32 %v370_v32, %v4933_v63 }
 0x112   :  { %6884 = vst [vmem:[#allocation53_spill] sm:$0xff] %v4970_v61  ;;  %6885 = vst [vmem:[#allocation54_spill] sm:$0xff] %v4973_v60 }
 0x113   :  { %v261_v59 = vpop.f32.mrf.mxu0  ;;  %v374_v0 = vpop.f32.mrf.mxu1 }
 0x114   :  { %v4975_v54 = vadd.f32 %v261_v59, %v110_v14  ;;  %v4978_v57 = vadd.f32 %v374_v0, %v4927_v55 }
 0x115   :  { %v263_v56 = vpop.f32.mrf.mxu0  ;;  %v376_v7 = vpop.f32.mrf.mxu1 }
 0x116   :  { %6886 = vst [vmem:[#allocation55_spill] sm:$0xff] %v4975_v54  ;;  %6887 = vst [vmem:[#allocation56_spill] sm:$0xff] %v4978_v57  ;;  %v4980_v23 = vadd.f32 %v263_v56, %v114_v1  ;;  %v4983_v4 = vadd.f32 %v376_v7, %v4933_v63 }
 0x118   :  { %6888 = vst [vmem:[#allocation57_spill] sm:$0xff] %v4980_v23  ;;  %6889 = vst [vmem:[#allocation58_spill] sm:$0xff] %v4983_v4 }
 0x119   :  { %v267_v3 = vpop.f32.mrf.mxu0  ;;  %v380_v2 = vpop.f32.mrf.mxu1 }
 0x11a   :  { %v4985_v61 = vadd.f32 %v267_v3, %v110_v14  ;;  %v4988_v32 = vadd.f32 %v380_v2, %v4927_v55 }
 0x11b   :  { %v269_v60 = vpop.f32.mrf.mxu0  ;;  %v382_v59 = vpop.f32.mrf.mxu1 }
 0x11c   :  { %6890 = vst [vmem:[#allocation59_spill] sm:$0xff] %v4985_v61  ;;  %6891 = vst [vmem:[#allocation60_spill] sm:$0xff] %v4988_v32  ;;  %v4990_v54 = vadd.f32 %v269_v60, %v114_v1  ;;  %v4993_v0 = vadd.f32 %v382_v59, %v4933_v63  ;;  %v232_v60 = vadd.f32 %v4908_v41, %v110_v14 }
 0x11d   :  { %v234_v59 = vadd.f32 %v4917_v5, %v114_v1 }
 0x11e   :  { %6892 = vst [vmem:[#allocation61_spill] sm:$0xff] %v4990_v54  ;;  %6893 = vst [vmem:[#allocation62_spill] sm:$0xff] %v4993_v0 }
 0x11f   :  { %v273_v57 = vpop.f32.mrf.mxu0  ;;  %v386_v56 = vpop.f32.mrf.mxu1 }
 0x120   :  { %v4995_v23 = vadd.f32 %v273_v57, %v110_v14  ;;  %v4998_v7 = vadd.f32 %v386_v56, %v4927_v55 }
 0x121   :  { %v275_v4 = vpop.f32.mrf.mxu0  ;;  %v388_v3 = vpop.f32.mrf.mxu1 }
 0x122   :  { %6894 = vst [vmem:[#allocation63_spill] sm:$0xff] %v4995_v23  ;;  %6895 = vst [vmem:[#allocation64_spill] sm:$0xff] %v4998_v7  ;;  %v5000_v61 = vadd.f32 %v275_v4, %v114_v1  ;;  %v5003_v2 = vadd.f32 %v388_v3, %v4933_v63  ;;  %v347_v4 = vadd.f32 %v4919_v6, %v4933_v63 }
 0x123   :  { %v345_v3 = vadd.f32 %v4910_v50, %v4927_v55 }
 0x124   :  { %6896 = vst [vmem:[#allocation65_spill] sm:$0xff] %v5000_v61  ;;  %6897 = vst [vmem:[#allocation66_spill] sm:$0xff] %v5003_v2 }
 0x125   :  { %v560_v32 = vpop.f32.mrf.mxu0  ;;  %v631_v23 = vpop.f32.mrf.mxu1 }
 0x126   :  { %v561_v0 = vadd.f32 %v560_v32, %v232_v60  ;;  %v632_v2 = vadd.f32 %v631_v23, %v345_v3  ;;  %v6899_v23 = vld [vmem:[#allocation18_spill] sm:$0xff]  ;;  %v6904_v3 = vld [vmem:[#allocation23_spill] sm:$0xff] }
 0x127   :  { %v562_v54 = vpop.f32.mrf.mxu0  ;;  %v633_v7 = vpop.f32.mrf.mxu1 }
 0x128   :  { %v3902_v58 = vmul.f32 -1.442695, %v561_v0  ;;  %v563_v57 = vadd.f32 %v562_v54, %v234_v59  ;;  %v634_v61 = vadd.f32 %v633_v7, %v347_v4  ;;  %v6903_v4 = vld [vmem:[#allocation22_spill] sm:$0xff] }
 0x12a   :  { %4022 = vpow2.f32 %v3902_v58  ;;  %v3903_v56 = vmul.f32 -1.442695, %v563_v57  ;;  %v3904_v14 = vmul.f32 -1.442695, %v634_v61  ;;  %v6901_v57 = vld [vmem:[#allocation20_spill] sm:$0xff] }
 0x12c   :  { %4024 = vpow2.f32 %v3903_v56  ;;  %v6902_v56 = vld [vmem:[#allocation21_spill] sm:$0xff] }
 0x12d   :  { %4026 = vpow2.f32 %v3904_v14  ;;  %v6905_v14 = vld [vmem:[#allocation24_spill] sm:$0xff] }
 0x137   :  { %v4023_v41 = vpop.eup %4022 }
 0x138   :  { %v639_v1 = vadd.f32 1.0, %v4023_v41  ;;  %v6906_v41 = vld [vmem:[#allocation25_spill] sm:$0xff] }
 0x139   :  { %v4025_v5 = vpop.eup %4024 }
 0x13a   :  { %4028 = vrcp.f32 %v639_v1  ;;  %v645_v54 = vadd.f32 1.0, %v4025_v5  ;;  %v4027_v58 = vpop.eup %4026  ;;  %v6907_v1 = vld [vmem:[#allocation26_spill] sm:$0xff]  ;;  %v6908_v5 = vld [vmem:[#allocation27_spill] sm:$0xff] }
 0x13b   :  { %4030 = vtanh.f32 %v632_v2  ;;  %v652_v59 = vadd.f32 1.0, %v4027_v58  ;;  %v6900_v2 = vld [vmem:[#allocation19_spill] sm:$0xff]  ;;  %v6910_v58 = vld [vmem:[#allocation29_spill] sm:$0xff] }
 0x13c   :  { %4032 = vrcp.f32 %v645_v54  ;;  %v6909_v54 = vld [vmem:[#allocation28_spill] sm:$0xff] }
 0x13d   :  { %4034 = vrcp.f32 %v652_v59  ;;  %v6914_v59 = vld [vmem:[#allocation33_spill] sm:$0xff] }
 0x147   :  { %v4029_v32 = vpop.eup %4028 }
 0x148   :  { %v4031_v0 = vpop.eup %4030 }
 0x149   :  { %v4033_v60 = vpop.eup %4032  ;;  %v657_v63 = vmul.f32 %v4031_v0, %v4029_v32  ;;  %v6911_v32 = vld [vmem:[#allocation30_spill] sm:$0xff]  ;;  %v6912_v0 = vld [vmem:[#allocation31_spill] sm:$0xff] }
 0x14a   :  { %v656_v6 = vmul.f32 0.0, %v4033_v60  ;;  %v4035_v55 = vpop.eup %4034  ;;  %v6913_v60 = vld [vmem:[#allocation32_spill] sm:$0xff] }
 0x14c   :  { %v5011_v7 = vadd.f32 %v657_v63, %v656_v6  ;;  %v6915_v6 = vld [vmem:[#allocation34_spill] sm:$0xff]  ;;  %v6916_v63 = vld [vmem:[#allocation35_spill] sm:$0xff] }
 0x14e   :  { %4036 = vtanh.f32 %v5011_v7 }
 0x15b   :  { %v4037_v61 = vpop.eup %4036 }
 0x15c   :  { %v5014_v50 = vmul.f32 %v4037_v61, %v4035_v55  ;;  %v6917_v55 = vld [vmem:[#allocation36_spill] sm:$0xff]  ;;  %v6918_v61 = vld [vmem:[#allocation37_spill] sm:$0xff] }
 0x15e   :  { %6898 = vst [vmem:[#allocation67_spill] sm:$0xff] %v5014_v50  ;;  %734 = vmatmul.mubr.f32.vlgmr.msra.gmra.mxu0 %v5014_v50  ;;  %805 = vmatmul.mubr.f32.vlgmr.msra.gmra.mxu1 %v5014_v50  ;;  %v6919_v50 = vmov 0.0  }
 0x15f   :  { %845 = vmatpush1.msra.mxu0 %v4595_v8  ;;  %916 = vmatpush1.msra.mxu1 %v4597_v9 }
 0x160   :  { %846 = vmatprep.subr.mxu0 %v4601_v10  ;;  %917 = vmatprep.subr.mxu1 %v4603_v11 }
 0x161   :  { %847 = vmatpush1.msra.mxu0 %v4609_v12  ;;  %918 = vmatpush1.msra.mxu1 %v4611_v13 }
 0x162   :  { %848 = vmatprep.subr.mxu0 %v4620_v15  ;;  %919 = vmatprep.subr.mxu1 %v4622_v16 }
 0x163   :  { %849 = vmatpush1.msra.mxu0 %v4626_v17  ;;  %920 = vmatpush1.msra.mxu1 %v4628_v18 }
 0x164   :  { %850 = vmatprep.subr.mxu0 %v4632_v19  ;;  %921 = vmatprep.subr.mxu1 %v4634_v20 }
 0x165   :  { %851 = vmatpush1.msra.mxu0 %v4640_v21  ;;  %922 = vmatpush1.msra.mxu1 %v4642_v22 }
 0x166   :  { %852 = vmatprep.subr.mxu0 %v4651_v24  ;;  %923 = vmatprep.subr.mxu1 %v4653_v25 }
 0x167   :  { %853 = vmatpush1.msra.mxu0 %v4657_v26  ;;  %924 = vmatpush1.msra.mxu1 %v4659_v27 }
 0x168   :  { %854 = vmatprep.subr.mxu0 %v4663_v28  ;;  %925 = vmatprep.subr.mxu1 %v4665_v29 }
 0x169   :  { %855 = vmatpush1.msra.mxu0 %v4671_v30  ;;  %926 = vmatpush1.msra.mxu1 %v4673_v31 }
 0x16a   :  { %856 = vmatprep.subr.mxu0 %v4682_v33  ;;  %927 = vmatprep.subr.mxu1 %v4684_v34 }
 0x16b   :  { %857 = vmatpush1.msra.mxu0 %v4688_v35  ;;  %928 = vmatpush1.msra.mxu1 %v4690_v36 }
 0x16c   :  { %858 = vmatprep.subr.mxu0 %v4694_v37  ;;  %929 = vmatprep.subr.mxu1 %v4696_v38 }
 0x16d   :  { %859 = vmatpush1.msra.mxu0 %v4702_v39  ;;  %930 = vmatpush1.msra.mxu1 %v4704_v40 }
 0x16e   :  { %860 = vmatprep.subr.mxu0 %v4713_v42  ;;  %931 = vmatprep.subr.mxu1 %v4715_v43 }
 0x16f   :  { %861 = vmatpush1.msra.mxu0 %v4719_v44  ;;  %932 = vmatpush1.msra.mxu1 %v4721_v45 }
 0x170   :  { %862 = vmatprep.subr.mxu0 %v4725_v46  ;;  %933 = vmatprep.subr.mxu1 %v4727_v47 }
 0x171   :  { %863 = vmatpush1.msra.mxu0 %v4733_v48  ;;  %934 = vmatpush1.msra.mxu1 %v4735_v49 }
 0x172   :  { %864 = vmatprep.subr.mxu0 %v4744_v51  ;;  %935 = vmatprep.subr.mxu1 %v4746_v52 }
 0x173   :  { %865 = vmatpush1.msra.mxu0 %v4750_v53  ;;  %936 = vmatpush1.msra.mxu1 %v6899_v23 }
 0x174   :  { %866 = vmatprep.subr.mxu0 %v6900_v2  ;;  %937 = vmatprep.subr.mxu1 %v6901_v57 }
 0x175   :  { %867 = vmatpush1.msra.mxu0 %v6902_v56  ;;  %938 = vmatpush1.msra.mxu1 %v6903_v4 }
 0x176   :  { %868 = vmatprep.subr.mxu0 %v6904_v3  ;;  %939 = vmatprep.subr.mxu1 %v6905_v14  ;;  %v6925_v14 = vld [vmem:[#allocation40_spill] sm:$0xff] }
 0x177   :  { %869 = vmatpush1.msra.mxu0 %v6906_v41  ;;  %940 = vmatpush1.msra.mxu1 %v6907_v1  ;;  %v6924_v41 = vld [vmem:[#allocation42_spill] sm:$0xff] }
 0x178   :  { %870 = vmatprep.subr.mxu0 %v6908_v5  ;;  %941 = vmatprep.subr.mxu1 %v6909_v54  ;;  %v6920_v54 = vld [vmem:[#allocation38_spill] sm:$0xff] }
 0x179   :  { %871 = vmatpush1.msra.mxu0 %v6910_v58  ;;  %942 = vmatpush1.msra.mxu1 %v6911_v32  ;;  %v6921_v32 = vld [vmem:[#allocation16_spill] sm:$0xff] }
 0x17a   :  { %872 = vmatprep.subr.mxu0 %v6912_v0  ;;  %943 = vmatprep.subr.mxu1 %v6913_v60  ;;  %v6922_v0 = vld [vmem:[#allocation17_spill] sm:$0xff] }
 0x17b   :  { %873 = vmatpush1.msra.mxu0 %v6914_v59  ;;  %944 = vmatpush1.msra.mxu1 %v6915_v6 }
 0x17c   :  { %874 = vmatprep.subr.mxu0 %v6916_v63  ;;  %945 = vmatprep.subr.mxu1 %v6917_v55  ;;  %v6923_v63 = vld [vmem:[#allocation41_spill] sm:$0xff] }
 0x17d   :  { %875 = vmatpush1.msra.mxu0 %v6918_v61  ;;  %908 = vmatprep.mubr.f32.mxu0 %v6919_v50 }
 0x17e   :  { %946 = vmatpush1.msra.mxu1 %v6920_v54  ;;  %979 = vmatprep.mubr.f32.mxu1 %v6919_v50 }
 0x17f   :  { %1019 = vmatprep.subr.mxu0 %v6921_v32  ;;  %1090 = vmatprep.subr.mxu1 %v6922_v0 }
 0x21e   :  { %v735_v60 = vpop.f32.mrf.mxu0  ;;  %v806_v55 = vpop.f32.mrf.mxu1 }
 0x21f   :  { %v736_v59 = vadd.f32 %v735_v60, %v4935_v62  ;;  %v807_v50 = vadd.f32 %v806_v55, %v6925_v14 }
 0x220   :  { %v737_v6 = vpop.f32.mrf.mxu0  ;;  %v808_v1 = vpop.f32.mrf.mxu1 }
 0x221   :  { %v3905_v58 = vmul.f32 -1.442695, %v736_v59  ;;  %v738_v5 = vadd.f32 %v737_v6, %v6923_v63  ;;  %v809_v54 = vadd.f32 %v808_v1, %v6924_v41 }
 0x223   :  { %4038 = vpow2.f32 %v3905_v58  ;;  %v3906_v61 = vmul.f32 -1.442695, %v738_v5  ;;  %v3907_v3 = vmul.f32 -1.442695, %v809_v54 }
 0x225   :  { %4040 = vpow2.f32 %v3906_v61 }
 0x226   :  { %4042 = vtanh.f32 %v807_v50 }
 0x227   :  { %4044 = vpow2.f32 %v3907_v3 }
 0x230   :  { %v4039_v32 = vpop.eup %4038 }
 0x231   :  { %v814_v4 = vadd.f32 1.0, %v4039_v32 }
 0x232   :  { %v4041_v0 = vpop.eup %4040 }
 0x233   :  { %4046 = vrcp.f32 %v814_v4  ;;  %v820_v62 = vadd.f32 1.0, %v4041_v0  ;;  %v4043_v60 = vpop.eup %4042  ;;  %v6948_v4 = vld [vmem:[#allocation45_spill] sm:$0xff]  ;;  %v6949_v0 = vld [vmem:[#allocation46_spill] sm:$0xff] }
 0x234   :  { %v4045_v59 = vpop.eup %4044 }
 0x235   :  { %4048 = vrcp.f32 %v820_v62  ;;  %v827_v63 = vadd.f32 1.0, %v4045_v59 }
 0x237   :  { %4050 = vrcp.f32 %v827_v63 }
 0x240   :  { %v4047_v58 = vpop.eup %4046 }
 0x241   :  { %v832_v6 = vmul.f32 %v4047_v58, %v4043_v60  ;;  %v6950_v60 = vld [vmem:[#allocation44_spill] sm:$0xff] }
 0x242   :  { %v4049_v5 = vpop.eup %4048 }
 0x243   :  { %v831_v61 = vmul.f32 %v4049_v5, %v5011_v7 }
 0x244   :  { %v4051_v14 = vpop.eup %4050 }
 0x245   :  { %v5089_v41 = vadd.f32 %v832_v6, %v831_v61 }
 0x247   :  { %4052 = vtanh.f32 %v5089_v41 }
 0x254   :  { %v4053_v50 = vpop.eup %4052 }
 0x255   :  { %v5092_v1 = vmul.f32 %v4053_v50, %v4051_v14 }
 0x257   :  { %6926 = vst [vmem:[#allocation18_spill] sm:$0xff] %v5092_v1  ;;  %909 = vmatmul.mubr.f32.vlgmr.msra.gmra.mxu0 %v5092_v1  ;;  %980 = vmatmul.mubr.f32.vlgmr.msra.gmra.mxu1 %v5092_v1  ;;  %v5241_v1 = vld [vmem:[#allocation6 + $0x150] sm:$0xff] }
 0x258   :  { %1020 = vmatpush1.msra.mxu0 %v4595_v8  ;;  %1091 = vmatpush1.msra.mxu1 %v4597_v9  ;;  %v6927_v8 = vld [vmem:[#allocation22_spill] sm:$0xff]  ;;  %v6928_v9 = vld [vmem:[#allocation23_spill] sm:$0xff] }
 0x259   :  { %1021 = vmatprep.subr.mxu0 %v4601_v10  ;;  %1092 = vmatprep.subr.mxu1 %v4603_v11  ;;  %v6929_v10 = vld [vmem:[#allocation24_spill] sm:$0xff]  ;;  %v6930_v11 = vld [vmem:[#allocation25_spill] sm:$0xff] }
 0x25a   :  { %1022 = vmatpush1.msra.mxu0 %v4609_v12  ;;  %1093 = vmatpush1.msra.mxu1 %v4611_v13  ;;  %v6931_v12 = vld [vmem:[#allocation26_spill] sm:$0xff]  ;;  %v6932_v13 = vld [vmem:[#allocation27_spill] sm:$0xff] }
 0x25b   :  { %1023 = vmatprep.subr.mxu0 %v4620_v15  ;;  %1094 = vmatprep.subr.mxu1 %v4622_v16  ;;  %v6933_v15 = vld [vmem:[#allocation28_spill] sm:$0xff]  ;;  %v6934_v16 = vld [vmem:[#allocation29_spill] sm:$0xff] }
 0x25c   :  { %1024 = vmatpush1.msra.mxu0 %v4626_v17  ;;  %1095 = vmatpush1.msra.mxu1 %v4628_v18  ;;  %v6935_v17 = vld [vmem:[#allocation30_spill] sm:$0xff]  ;;  %v6936_v18 = vld [vmem:[#allocation31_spill] sm:$0xff] }
 0x25d   :  { %1025 = vmatprep.subr.mxu0 %v4632_v19  ;;  %1096 = vmatprep.subr.mxu1 %v4634_v20  ;;  %v6937_v19 = vld [vmem:[#allocation32_spill] sm:$0xff]  ;;  %v6938_v20 = vld [vmem:[#allocation33_spill] sm:$0xff] }
 0x25e   :  { %1026 = vmatpush1.msra.mxu0 %v4640_v21  ;;  %1097 = vmatpush1.msra.mxu1 %v4642_v22  ;;  %v6939_v21 = vld [vmem:[#allocation34_spill] sm:$0xff]  ;;  %v6940_v22 = vld [vmem:[#allocation35_spill] sm:$0xff] }
 0x25f   :  { %1027 = vmatprep.subr.mxu0 %v4651_v24  ;;  %1098 = vmatprep.subr.mxu1 %v4653_v25  ;;  %v6941_v24 = vld [vmem:[#allocation36_spill] sm:$0xff]  ;;  %v6942_v25 = vld [vmem:[#allocation37_spill] sm:$0xff] }
 0x260   :  { %1028 = vmatpush1.msra.mxu0 %v4657_v26  ;;  %1099 = vmatpush1.msra.mxu1 %v4659_v27  ;;  %v6943_v26 = vmov 0.0   ;;  %v6944_v27 = vld [vmem:[#allocation38_spill] sm:$0xff] }
 0x261   :  { %1029 = vmatprep.subr.mxu0 %v4663_v28  ;;  %1100 = vmatprep.subr.mxu1 %v4665_v29  ;;  %v5160_v28 = vld [vmem:[#allocation6 + $0x1e8] sm:$0xff]  ;;  %v5163_v29 = vld [vmem:[#allocation6 + $0x1f8] sm:$0xff] }
 0x262   :  { %1030 = vmatpush1.msra.mxu0 %v4671_v30  ;;  %1101 = vmatpush1.msra.mxu1 %v4673_v31  ;;  %6945 = vst [vmem:[#allocation19_spill] sm:$0xff] %v5160_v28  ;;  %6946 = vst [vmem:[#allocation20_spill] sm:$0xff] %v5163_v29  ;;  %v6947_v31 = vld [vmem:[#allocation43_spill] sm:$0xff] }
 0x263   :  { %1031 = vmatprep.subr.mxu0 %v4682_v33  ;;  %1102 = vmatprep.subr.mxu1 %v4684_v34 }
 0x264   :  { %1032 = vmatpush1.msra.mxu0 %v4688_v35  ;;  %1103 = vmatpush1.msra.mxu1 %v4690_v36 }
 0x265   :  { %1033 = vmatprep.subr.mxu0 %v4694_v37  ;;  %1104 = vmatprep.subr.mxu1 %v4696_v38 }
 0x266   :  { %1034 = vmatpush1.msra.mxu0 %v4702_v39  ;;  %1105 = vmatpush1.msra.mxu1 %v4704_v40 }
 0x267   :  { %1035 = vmatprep.subr.mxu0 %v4713_v42  ;;  %1106 = vmatprep.subr.mxu1 %v4715_v43 }
 0x268   :  { %1036 = vmatpush1.msra.mxu0 %v4719_v44  ;;  %1107 = vmatpush1.msra.mxu1 %v4721_v45 }
 0x269   :  { %1037 = vmatprep.subr.mxu0 %v4725_v46  ;;  %1108 = vmatprep.subr.mxu1 %v4727_v47 }
 0x26a   :  { %1038 = vmatpush1.msra.mxu0 %v4733_v48  ;;  %1109 = vmatpush1.msra.mxu1 %v4735_v49 }
 0x26b   :  { %1039 = vmatprep.subr.mxu0 %v4744_v51  ;;  %1110 = vmatprep.subr.mxu1 %v4746_v52 }
 0x26c   :  { %1040 = vmatpush1.msra.mxu0 %v4750_v53  ;;  %1111 = vmatpush1.msra.mxu1 %v6899_v23 }
 0x26d   :  { %1041 = vmatprep.subr.mxu0 %v6900_v2  ;;  %1112 = vmatprep.subr.mxu1 %v6901_v57 }
 0x26e   :  { %1042 = vmatpush1.msra.mxu0 %v6902_v56  ;;  %1113 = vmatpush1.msra.mxu1 %v6927_v8 }
 0x26f   :  { %1043 = vmatprep.subr.mxu0 %v6928_v9  ;;  %1114 = vmatprep.subr.mxu1 %v6929_v10 }
 0x270   :  { %1044 = vmatpush1.msra.mxu0 %v6930_v11  ;;  %1115 = vmatpush1.msra.mxu1 %v6931_v12 }
 0x271   :  { %1045 = vmatprep.subr.mxu0 %v6932_v13  ;;  %1116 = vmatprep.subr.mxu1 %v6933_v15 }
 0x272   :  { %1046 = vmatpush1.msra.mxu0 %v6934_v16  ;;  %1117 = vmatpush1.msra.mxu1 %v6935_v17 }
 0x273   :  { %1047 = vmatprep.subr.mxu0 %v6936_v18  ;;  %1118 = vmatprep.subr.mxu1 %v6937_v19 }
 0x274   :  { %1048 = vmatpush1.msra.mxu0 %v6938_v20  ;;  %1119 = vmatpush1.msra.mxu1 %v6939_v21 }
 0x275   :  { %1049 = vmatprep.subr.mxu0 %v6940_v22  ;;  %1120 = vmatprep.subr.mxu1 %v6941_v24 }
 0x276   :  { %1050 = vmatpush1.msra.mxu0 %v6942_v25  ;;  %1083 = vmatprep.mubr.f32.mxu0 %v6943_v26 }
 0x277   :  { %1121 = vmatpush1.msra.mxu1 %v6944_v27  ;;  %1154 = vmatprep.mubr.f32.mxu1 %v6943_v26 }
 0x278   :  { %1194 = vmatprep.subr.mxu0 %v5160_v28  ;;  %1265 = vmatprep.subr.mxu1 %v5163_v29 }
 0x317   :  { %v910_v30 = vpop.f32.mrf.mxu0  ;;  %v981_v54 = vpop.f32.mrf.mxu1 }
 0x318   :  { %v911_v33 = vadd.f32 %v910_v30, %v6947_v31  ;;  %v982_v59 = vadd.f32 %v981_v54, %v6950_v60  ;;  %v5190_v60 = vld [vmem:[#allocation6 + $0x1c0] sm:$0xff] }
 0x319   :  { %v912_v34 = vpop.f32.mrf.mxu0  ;;  %v983_v32 = vpop.f32.mrf.mxu1 }
 0x31a   :  { %v3908_v7 = vmul.f32 -1.442695, %v911_v33  ;;  %v913_v3 = vadd.f32 %v912_v34, %v6948_v4  ;;  %v984_v62 = vadd.f32 %v983_v32, %v6949_v0  ;;  %v5178_v32 = vld [vmem:[#allocation6 + $0x1e0] sm:$0xff]  ;;  %v5181_v0 = vld [vmem:[#allocation6 + $0x1f0] sm:$0xff] }
 0x31c   :  { %4054 = vpow2.f32 %v3908_v7  ;;  %v3909_v55 = vmul.f32 -1.442695, %v913_v3  ;;  %v3910_v58 = vmul.f32 -1.442695, %v984_v62  ;;  %v5187_v62 = vld [vmem:[#allocation6 + $0x1d8] sm:$0xff] }
 0x31e   :  { %4056 = vpow2.f32 %v3909_v55 }
 0x31f   :  { %4058 = vtanh.f32 %v982_v59  ;;  %v5193_v59 = vld [vmem:[#allocation6 + $0x1d0] sm:$0xff] }
 0x320   :  { %4060 = vpow2.f32 %v3910_v58  ;;  %v5196_v58 = vld [vmem:[#allocation6 + $0x1a8] sm:$0xff] }
 0x329   :  { %v4055_v6 = vpop.eup %4054 }
 0x32a   :  { %v989_v5 = vadd.f32 1.0, %v4055_v6  ;;  %v5199_v6 = vld [vmem:[#allocation6 + $0x1b8] sm:$0xff] }
 0x32b   :  { %v4057_v63 = vpop.eup %4056 }
 0x32c   :  { %4062 = vrcp.f32 %v989_v5  ;;  %v995_v61 = vadd.f32 1.0, %v4057_v63  ;;  %v4059_v14 = vpop.eup %4058  ;;  %v5202_v5 = vld [vmem:[#allocation6 + $0x1a0] sm:$0xff]  ;;  %v5205_v63 = vld [vmem:[#allocation6 + $0x1b0] sm:$0xff] }
 0x32d   :  { %v4061_v50 = vpop.eup %4060 }
 0x32e   :  { %4064 = vrcp.f32 %v995_v61  ;;  %v1002_v34 = vadd.f32 1.0, %v4061_v50  ;;  %v5208_v61 = vld [vmem:[#allocation6 + $0x188] sm:$0xff]  ;;  %v5214_v50 = vld [vmem:[#allocation6 + $0x180] sm:$0xff] }
 0x330   :  { %4066 = vrcp.f32 %v1002_v34  ;;  %v5226_v34 = vld [vmem:[#allocation6 + $0x160] sm:$0xff] }
 0x331   :  { %6952 = vst [vmem:[#allocation16_spill] sm:$0xff] %v5226_v34 }
 0x339   :  { %v4063_v30 = vpop.eup %4062 }
 0x33a   :  { %v1007_v31 = vmul.f32 %v4063_v30, %v4059_v14  ;;  %v5211_v14 = vld [vmem:[#allocation6 + $0x198] sm:$0xff]  ;;  %v5217_v30 = vld [vmem:[#allocation6 + $0x190] sm:$0xff] }
 0x33b   :  { %v4065_v33 = vpop.eup %4064 }
 0x33c   :  { %v1006_v7 = vmul.f32 %v4065_v33, %v5089_v41  ;;  %v5184_v41 = vld [vmem:[#allocation6 + $0x1c8] sm:$0xff]  ;;  %v5223_v33 = vld [vmem:[#allocation6 + $0x178] sm:$0xff] }
 0x33d   :  { %v4067_v3 = vpop.eup %4066 }
 0x33e   :  { %v5171_v4 = vadd.f32 %v1007_v31, %v1006_v7  ;;  %v5220_v31 = vld [vmem:[#allocation6 + $0x168] sm:$0xff]  ;;  %v5229_v7 = vld [vmem:[#allocation6 + $0x170] sm:$0xff] }
 0x33f   :  { %6953 = vst [vmem:[#allocation17_spill] sm:$0xff] %v5229_v7 }
 0x340   :  { %4068 = vtanh.f32 %v5171_v4 }
 0x34d   :  { %v4069_v54 = vpop.eup %4068 }
 0x34e   :  { %v5174_v55 = vmul.f32 %v4069_v54, %v4067_v3  ;;  %v5232_v3 = vld [vmem:[#allocation6 + $0x148] sm:$0xff]  ;;  %v5235_v54 = vld [vmem:[#allocation6 + $0x158] sm:$0xff] }
 0x350   :  { %6951 = vst [vmem:[#allocation21_spill] sm:$0xff] %v5174_v55  ;;  %1084 = vmatmul.mubr.f32.vlgmr.msra.gmra.mxu0 %v5174_v55  ;;  %1155 = vmatmul.mubr.f32.vlgmr.msra.gmra.mxu1 %v5174_v55  ;;  %v5238_v55 = vld [vmem:[#allocation6 + $0x140] sm:$0xff] }
 0x351   :  { %1195 = vmatpush1.msra.mxu0 %v5178_v32  ;;  %1266 = vmatpush1.msra.mxu1 %v5181_v0 }
 0x352   :  { %1196 = vmatprep.subr.mxu0 %v5184_v41  ;;  %1267 = vmatprep.subr.mxu1 %v5187_v62 }
 0x353   :  { %1197 = vmatpush1.msra.mxu0 %v5190_v60  ;;  %1268 = vmatpush1.msra.mxu1 %v5193_v59 }
 0x354   :  { %1198 = vmatprep.subr.mxu0 %v5196_v58  ;;  %1269 = vmatprep.subr.mxu1 %v5199_v6 }
 0x355   :  { %1199 = vmatpush1.msra.mxu0 %v5202_v5  ;;  %1270 = vmatpush1.msra.mxu1 %v5205_v63 }
 0x356   :  { %1200 = vmatprep.subr.mxu0 %v5208_v61  ;;  %1271 = vmatprep.subr.mxu1 %v5211_v14 }
 0x357   :  { %1201 = vmatpush1.msra.mxu0 %v5214_v50  ;;  %1272 = vmatpush1.msra.mxu1 %v5217_v30 }
 0x358   :  { %1202 = vmatprep.subr.mxu0 %v5220_v31  ;;  %1273 = vmatprep.subr.mxu1 %v5223_v33 }
 0x359   :  { %1203 = vmatpush1.msra.mxu0 %v5226_v34  ;;  %1274 = vmatpush1.msra.mxu1 %v5229_v7  ;;  %v5244_v34 = vld [vmem:[#allocation6 + $0x128] sm:$0xff]  ;;  %v5247_v7 = vld [vmem:[#allocation6 + $0x138] sm:$0xff] }
 0x35a   :  { %1204 = vmatprep.subr.mxu0 %v5232_v3  ;;  %1275 = vmatprep.subr.mxu1 %v5235_v54 }
 0x35b   :  { %1205 = vmatpush1.msra.mxu0 %v5238_v55  ;;  %1276 = vmatpush1.msra.mxu1 %v5241_v1 }
 0x35c   :  { %1206 = vmatprep.subr.mxu0 %v5244_v34  ;;  %1277 = vmatprep.subr.mxu1 %v5247_v7 }
 0x35d   :  { %1207 = vmatpush1.msra.mxu0 %v4688_v35  ;;  %1278 = vmatpush1.msra.mxu1 %v4690_v36  ;;  %v6954_v36 = vld [vmem:[#allocation47_spill] sm:$0xff] }
 0x35e   :  { %1208 = vmatprep.subr.mxu0 %v4694_v37  ;;  %1279 = vmatprep.subr.mxu1 %v4696_v38 }
 0x35f   :  { %1209 = vmatpush1.msra.mxu0 %v4702_v39  ;;  %1280 = vmatpush1.msra.mxu1 %v4704_v40  ;;  %v6955_v40 = vld [vmem:[#allocation49_spill] sm:$0xff] }
 0x360   :  { %1210 = vmatprep.subr.mxu0 %v4713_v42  ;;  %1281 = vmatprep.subr.mxu1 %v4715_v43 }
 0x361   :  { %1211 = vmatpush1.msra.mxu0 %v4719_v44  ;;  %1282 = vmatpush1.msra.mxu1 %v4721_v45 }
 0x362   :  { %1212 = vmatprep.subr.mxu0 %v4725_v46  ;;  %1283 = vmatprep.subr.mxu1 %v4727_v47  ;;  %v6956_v46 = vld [vmem:[#allocation50_spill] sm:$0xff] }
 0x363   :  { %1213 = vmatpush1.msra.mxu0 %v4733_v48  ;;  %1284 = vmatpush1.msra.mxu1 %v4735_v49  ;;  %v6957_v48 = vld [vmem:[#allocation48_spill] sm:$0xff] }
 0x364   :  { %1214 = vmatprep.subr.mxu0 %v4744_v51  ;;  %1285 = vmatprep.subr.mxu1 %v4746_v52 }
 0x365   :  { %1215 = vmatpush1.msra.mxu0 %v4750_v53  ;;  %1286 = vmatpush1.msra.mxu1 %v6899_v23 }
 0x366   :  { %1216 = vmatprep.subr.mxu0 %v6900_v2  ;;  %1287 = vmatprep.subr.mxu1 %v6901_v57 }
 0x367   :  { %1217 = vmatpush1.msra.mxu0 %v6902_v56  ;;  %1288 = vmatpush1.msra.mxu1 %v6927_v8 }
 0x368   :  { %1218 = vmatprep.subr.mxu0 %v6928_v9  ;;  %1289 = vmatprep.subr.mxu1 %v6929_v10 }
 0x369   :  { %1219 = vmatpush1.msra.mxu0 %v6930_v11  ;;  %1290 = vmatpush1.msra.mxu1 %v6931_v12 }
 0x36a   :  { %1220 = vmatprep.subr.mxu0 %v6932_v13  ;;  %1291 = vmatprep.subr.mxu1 %v6933_v15 }
 0x36b   :  { %1221 = vmatpush1.msra.mxu0 %v6934_v16  ;;  %1292 = vmatpush1.msra.mxu1 %v6935_v17 }
 0x36c   :  { %1222 = vmatprep.subr.mxu0 %v6936_v18  ;;  %1293 = vmatprep.subr.mxu1 %v6937_v19  ;;  %v6959_v18 = vld [vmem:[#allocation16_spill] sm:$0xff]  ;;  %v6960_v19 = vld [vmem:[#allocation17_spill] sm:$0xff] }
 0x36d   :  { %1223 = vmatpush1.msra.mxu0 %v6938_v20  ;;  %1294 = vmatpush1.msra.mxu1 %v6939_v21  ;;  %v5328_v20 = vld [vmem:[#allocation6 + $0x120] sm:$0xff]  ;;  %v5331_v21 = vld [vmem:[#allocation6 + $0x130] sm:$0xff] }
 0x36e   :  { %1224 = vmatprep.subr.mxu0 %v6940_v22  ;;  %1295 = vmatprep.subr.mxu1 %v6941_v24  ;;  %v5334_v22 = vld [vmem:[#allocation6 + $0x108] sm:$0xff]  ;;  %v5337_v24 = vld [vmem:[#allocation6 + $0x118] sm:$0xff] }
 0x36f   :  { %1225 = vmatpush1.msra.mxu0 %v6942_v25  ;;  %1258 = vmatprep.mubr.f32.mxu0 %v6943_v26  ;;  %v5340_v25 = vld [vmem:[#allocation6 + $0x100] sm:$0xff] }
 0x370   :  { %1296 = vmatpush1.msra.mxu1 %v6944_v27  ;;  %1329 = vmatprep.mubr.f32.mxu1 %v6943_v26  ;;  %v5343_v27 = vld [vmem:[#allocation6 + $0x110] sm:$0xff] }
 0x371   :  { %1369 = vmatprep.subr.mxu0 %v5160_v28  ;;  %1440 = vmatprep.subr.mxu1 %v5163_v29 }
 0x410   :  { %v1085_v35 = vpop.f32.mrf.mxu0  ;;  %v1156_v43 = vpop.f32.mrf.mxu1 }
 0x411   :  { %v1086_v37 = vadd.f32 %v1085_v35, %v6954_v36  ;;  %v1157_v49 = vadd.f32 %v1156_v43, %v6957_v48  ;;  %v5349_v35 = vld [vmem:[#allocation6 + $0xf8] sm:$0xff]  ;;  %v5352_v36 = vld [vmem:[#allocation6 + $0xe0] sm:$0xff]  ;;  %v5370_v43 = vld [vmem:[#allocation6 + $0xa8] sm:$0xff] }
 0x412   :  { %v1087_v38 = vpop.f32.mrf.mxu0  ;;  %v1158_v45 = vpop.f32.mrf.mxu1  ;;  %v5385_v48 = vld [vmem:[#allocation6 + $0x98] sm:$0xff] }
 0x413   :  { %v3911_v39 = vmul.f32 -1.442695, %v1086_v37  ;;  %v1088_v42 = vadd.f32 %v1087_v38, %v6955_v40  ;;  %v1159_v47 = vadd.f32 %v1158_v45, %v6956_v46  ;;  %v5355_v37 = vld [vmem:[#allocation6 + $0xf0] sm:$0xff]  ;;  %v5358_v38 = vld [vmem:[#allocation6 + $0xc8] sm:$0xff]  ;;  %v5364_v40 = vld [vmem:[#allocation6 + $0xc0] sm:$0xff] }
 0x414   :  { %v5376_v45 = vld [vmem:[#allocation6 + $0xa0] sm:$0xff]  ;;  %v5379_v46 = vld [vmem:[#allocation6 + $0xb0] sm:$0xff] }
 0x415   :  { %4070 = vpow2.f32 %v3911_v39  ;;  %v3912_v44 = vmul.f32 -1.442695, %v1088_v42  ;;  %v3913_v51 = vmul.f32 -1.442695, %v1159_v47  ;;  %v5361_v39 = vld [vmem:[#allocation6 + $0xd8] sm:$0xff]  ;;  %v5367_v42 = vld [vmem:[#allocation6 + $0xd0] sm:$0xff] }
 0x416   :  { %v5382_v47 = vld [vmem:[#allocation6 + $0x88] sm:$0xff] }
 0x417   :  { %4072 = vpow2.f32 %v3912_v44  ;;  %v5373_v44 = vld [vmem:[#allocation6 + $0xb8] sm:$0xff] }
 0x418   :  { %4074 = vtanh.f32 %v1157_v49  ;;  %v5388_v49 = vld [vmem:[#allocation6 + $0x80] sm:$0xff] }
 0x419   :  { %4076 = vpow2.f32 %v3913_v51  ;;  %v5391_v51 = vld [vmem:[#allocation6 + $0x90] sm:$0xff] }
 0x41a   :  { %6961 = vst [vmem:[#allocation42_spill] sm:$0xff] %v5391_v51 }
 0x422   :  { %v4071_v52 = vpop.eup %4070 }
 0x423   :  { %v1164_v53 = vadd.f32 1.0, %v4071_v52  ;;  %v5394_v52 = vld [vmem:[#allocation6 + $0x68] sm:$0xff] }
 0x424   :  { %v4073_v23 = vpop.eup %4072  ;;  %6962 = vst [vmem:[#allocation40_spill] sm:$0xff] %v5394_v52 }
 0x425   :  { %4078 = vrcp.f32 %v1164_v53  ;;  %v1170_v2 = vadd.f32 1.0, %v4073_v23  ;;  %v4075_v57 = vpop.eup %4074  ;;  %v5397_v53 = vld [vmem:[#allocation6 + $0x78] sm:$0xff]  ;;  %v5400_v23 = vld [vmem:[#allocation6 + $0x60] sm:$0xff] }
 0x426   :  { %v4077_v56 = vpop.eup %4076  ;;  %6963 = vst [vmem:[#allocation22_spill] sm:$0xff] %v5397_v53  ;;  %6964 = vst [vmem:[#allocation23_spill] sm:$0xff] %v5400_v23 }
 0x427   :  { %4080 = vrcp.f32 %v1170_v2  ;;  %v1177_v11 = vadd.f32 1.0, %v4077_v56  ;;  %v5403_v2 = vld [vmem:[#allocation6 + $0x70] sm:$0xff]  ;;  %v5409_v56 = vld [vmem:[#allocation6 + $0x58] sm:$0xff] }
 0x428   :  { %6965 = vst [vmem:[#allocation24_spill] sm:$0xff] %v5403_v2  ;;  %6967 = vst [vmem:[#allocation26_spill] sm:$0xff] %v5409_v56 }
 0x429   :  { %4082 = vrcp.f32 %v1177_v11  ;;  %v5421_v11 = vld [vmem:[#allocation6 + $0x38] sm:$0xff] }
 0x42a   :  { %6971 = vst [vmem:[#allocation30_spill] sm:$0xff] %v5421_v11 }
 0x432   :  { %v4079_v8 = vpop.eup %4078 }
 0x433   :  { %v1182_v9 = vmul.f32 %v4079_v8, %v4075_v57  ;;  %v5406_v57 = vld [vmem:[#allocation6 + $0x48] sm:$0xff]  ;;  %v5412_v8 = vld [vmem:[#allocation6 + $0x40] sm:$0xff] }
 0x434   :  { %v4081_v10 = vpop.eup %4080  ;;  %6966 = vst [vmem:[#allocation25_spill] sm:$0xff] %v5406_v57  ;;  %6968 = vst [vmem:[#allocation27_spill] sm:$0xff] %v5412_v8 }
 0x435   :  { %v1181_v12 = vmul.f32 %v4081_v10, %v5171_v4  ;;  %v5346_v4 = vld [vmem:[#allocation6 + $0xe8] sm:$0xff] }
 0x436   :  { %v4083_v15 = vpop.eup %4082  ;;  %v5418_v10 = vld [vmem:[#allocation6 + $0x28] sm:$0xff] }
 0x437   :  { %v5297_v13 = vadd.f32 %v1182_v9, %v1181_v12  ;;  %v5415_v9 = vld [vmem:[#allocation6 + $0x50] sm:$0xff]  ;;  %6970 = vst [vmem:[#allocation29_spill] sm:$0xff] %v5418_v10  ;;  %v5424_v12 = vld [vmem:[#allocation6 + $0x20] sm:$0xff] }
 0x438   :  { %6969 = vst [vmem:[#allocation28_spill] sm:$0xff] %v5415_v9  ;;  %6972 = vst [vmem:[#allocation31_spill] sm:$0xff] %v5424_v12 }
 0x439   :  { %4084 = vtanh.f32 %v5297_v13 }
 0x446   :  { %v4085_v16 = vpop.eup %4084 }
 0x447   :  { %v5300_v17 = vmul.f32 %v4085_v16, %v4083_v15  ;;  %v5427_v15 = vld [vmem:[#allocation6 + $0x30] sm:$0xff]  ;;  %v5430_v16 = vld [vmem:[#allocation6 + $0x8] sm:$0xff] }
 0x448   :  { %6973 = vst [vmem:[#allocation32_spill] sm:$0xff] %v5427_v15  ;;  %6974 = vst [vmem:[#allocation33_spill] sm:$0xff] %v5430_v16 }
 0x449   :  { %6958 = vst [vmem:[#allocation41_spill] sm:$0xff] %v5300_v17  ;;  %1259 = vmatmul.mubr.f32.vlgmr.msra.gmra.mxu0 %v5300_v17  ;;  %1330 = vmatmul.mubr.f32.vlgmr.msra.gmra.mxu1 %v5300_v17  ;;  %v5433_v17 = vld [vmem:[#allocation6 + $0x18] sm:$0xff] }
 0x44a   :  { %1370 = vmatpush1.msra.mxu0 %v5178_v32  ;;  %1441 = vmatpush1.msra.mxu1 %v5181_v0  ;;  %6975 = vst [vmem:[#allocation34_spill] sm:$0xff] %v5433_v17 }
 0x44b   :  { %1371 = vmatprep.subr.mxu0 %v5184_v41  ;;  %1442 = vmatprep.subr.mxu1 %v5187_v62 }
 0x44c   :  { %1372 = vmatpush1.msra.mxu0 %v5190_v60  ;;  %1443 = vmatpush1.msra.mxu1 %v5193_v59 }
 0x44d   :  { %1373 = vmatprep.subr.mxu0 %v5196_v58  ;;  %1444 = vmatprep.subr.mxu1 %v5199_v6 }
 0x44e   :  { %1374 = vmatpush1.msra.mxu0 %v5202_v5  ;;  %1445 = vmatpush1.msra.mxu1 %v5205_v63 }
 0x44f   :  { %1375 = vmatprep.subr.mxu0 %v5208_v61  ;;  %1446 = vmatprep.subr.mxu1 %v5211_v14 }
 0x450   :  { %1376 = vmatpush1.msra.mxu0 %v5214_v50  ;;  %1447 = vmatpush1.msra.mxu1 %v5217_v30 }
 0x451   :  { %1377 = vmatprep.subr.mxu0 %v5220_v31  ;;  %1448 = vmatprep.subr.mxu1 %v5223_v33 }
 0x452   :  { %1378 = vmatpush1.msra.mxu0 %v6959_v18  ;;  %1449 = vmatpush1.msra.mxu1 %v6960_v19 }
 0x453   :  { %1379 = vmatprep.subr.mxu0 %v5232_v3  ;;  %1450 = vmatprep.subr.mxu1 %v5235_v54 }
 0x454   :  { %1380 = vmatpush1.msra.mxu0 %v5238_v55  ;;  %1451 = vmatpush1.msra.mxu1 %v5241_v1 }
 0x455   :  { %1381 = vmatprep.subr.mxu0 %v5244_v34  ;;  %1452 = vmatprep.subr.mxu1 %v5247_v7 }
 0x456   :  { %1382 = vmatpush1.msra.mxu0 %v5328_v20  ;;  %1453 = vmatpush1.msra.mxu1 %v5331_v21 }
 0x457   :  { %1383 = vmatprep.subr.mxu0 %v5334_v22  ;;  %1454 = vmatprep.subr.mxu1 %v5337_v24 }
 0x458   :  { %1384 = vmatpush1.msra.mxu0 %v5340_v25  ;;  %1455 = vmatpush1.msra.mxu1 %v5343_v27 }
 0x459   :  { %1385 = vmatprep.subr.mxu0 %v5346_v4  ;;  %1456 = vmatprep.subr.mxu1 %v5349_v35 }
 0x45a   :  { %1386 = vmatpush1.msra.mxu0 %v5352_v36  ;;  %1457 = vmatpush1.msra.mxu1 %v5355_v37 }
 0x45b   :  { %1387 = vmatprep.subr.mxu0 %v5358_v38  ;;  %1458 = vmatprep.subr.mxu1 %v5361_v39 }
 0x45c   :  { %1388 = vmatpush1.msra.mxu0 %v5364_v40  ;;  %1459 = vmatpush1.msra.mxu1 %v5367_v42 }
 0x45d   :  { %1389 = vmatprep.subr.mxu0 %v5370_v43  ;;  %1460 = vmatprep.subr.mxu1 %v5373_v44 }
 0x45e   :  { %1390 = vmatpush1.msra.mxu0 %v5376_v45  ;;  %1461 = vmatpush1.msra.mxu1 %v5379_v46 }
 0x45f   :  { %1391 = vmatprep.subr.mxu0 %v5382_v47  ;;  %1462 = vmatprep.subr.mxu1 %v5385_v48 }
 0x460   :  { %1392 = vmatpush1.msra.mxu0 %v5388_v49  ;;  %1463 = vmatpush1.msra.mxu1 %v5391_v51 }
 0x461   :  { %1393 = vmatprep.subr.mxu0 %v5394_v52  ;;  %1464 = vmatprep.subr.mxu1 %v5397_v53  ;;  %v6981_v53 = vld [vmem:[#allocation52_spill] sm:$0xff] }
 0x462   :  { %1394 = vmatpush1.msra.mxu0 %v5400_v23  ;;  %1465 = vmatpush1.msra.mxu1 %v5403_v2  ;;  %v6980_v23 = vld [vmem:[#allocation54_spill] sm:$0xff] }
 0x463   :  { %1395 = vmatprep.subr.mxu0 %v5406_v57  ;;  %1466 = vmatprep.subr.mxu1 %v5409_v56 }
 0x464   :  { %1396 = vmatpush1.msra.mxu0 %v5412_v8  ;;  %1467 = vmatpush1.msra.mxu1 %v5415_v9  ;;  %v6979_v8 = vld [vmem:[#allocation53_spill] sm:$0xff] }
 0x465   :  { %1397 = vmatprep.subr.mxu0 %v5418_v10  ;;  %1468 = vmatprep.subr.mxu1 %v5421_v11  ;;  %v5436_v10 = vld [vmem:[#allocation6] sm:$0xff]  ;;  %v5440_v11 = vld [vmem:[#allocation6 + $0x10] sm:$0xff] }
 0x466   :  { %1398 = vmatpush1.msra.mxu0 %v5424_v12  ;;  %1469 = vmatpush1.msra.mxu1 %v5427_v15  ;;  %6976 = vst [vmem:[#allocation35_spill] sm:$0xff] %v5436_v10  ;;  %6977 = vst [vmem:[#allocation36_spill] sm:$0xff] %v5440_v11  ;;  %v6978_v15 = vld [vmem:[#allocation51_spill] sm:$0xff] }
 0x467   :  { %1399 = vmatprep.subr.mxu0 %v5430_v16  ;;  %1470 = vmatprep.subr.mxu1 %v5433_v17 }
 0x468   :  { %1400 = vmatpush1.msra.mxu0 %v5436_v10  ;;  %1433 = vmatprep.mubr.f32.mxu0 %v6943_v26 }
 0x469   :  { %1471 = vmatpush1.msra.mxu1 %v5440_v11  ;;  %1504 = vmatprep.mubr.f32.mxu1 %v6943_v26 }
 0x46a   :  { %1544 = vmatprep.subr.mxu0 %v5160_v28  ;;  %1615 = vmatprep.subr.mxu1 %v5163_v29 }
 0x509   :  { %v1260_v16 = vpop.f32.mrf.mxu0  ;;  %v1331_v10 = vpop.f32.mrf.mxu1 }
 0x50a   :  { %v1261_v12 = vadd.f32 %v1260_v16, %v6978_v15  ;;  %v1332_v26 = vadd.f32 %v1331_v10, %v6981_v53  ;;  %v6988_v10 = vld [vmem:[#allocation25_spill] sm:$0xff] }
 0x50b   :  { %v1262_v17 = vpop.f32.mrf.mxu0  ;;  %v1333_v2 = vpop.f32.mrf.mxu1 }
 0x50c   :  { %v3914_v9 = vmul.f32 -1.442695, %v1261_v12  ;;  %v1263_v56 = vadd.f32 %v1262_v17, %v6979_v8  ;;  %v1334_v11 = vadd.f32 %v1333_v2, %v6980_v23  ;;  %v6987_v2 = vld [vmem:[#allocation24_spill] sm:$0xff] }
 0x50e   :  { %4086 = vpow2.f32 %v3914_v9  ;;  %v3915_v57 = vmul.f32 -1.442695, %v1263_v56  ;;  %v3916_v52 = vmul.f32 -1.442695, %v1334_v11  ;;  %v6989_v11 = vld [vmem:[#allocation26_spill] sm:$0xff] }
 0x510   :  { %4088 = vpow2.f32 %v3915_v57 }
 0x511   :  { %4090 = vtanh.f32 %v1332_v26 }
 0x512   :  { %4092 = vpow2.f32 %v3916_v52  ;;  %v6986_v52 = vld [vmem:[#allocation23_spill] sm:$0xff] }
 0x51b   :  { %v4087_v28 = vpop.eup %4086 }
 0x51c   :  { %v1339_v51 = vadd.f32 1.0, %v4087_v28 }
 0x51d   :  { %v4089_v29 = vpop.eup %4088 }
 0x51e   :  { %4094 = vrcp.f32 %v1339_v51  ;;  %v1345_v15 = vadd.f32 1.0, %v4089_v29  ;;  %v4091_v12 = vpop.eup %4090  ;;  %v6983_v29 = vld [vmem:[#allocation42_spill] sm:$0xff] }
 0x51f   :  { %v4093_v17 = vpop.eup %4092  ;;  %v6985_v51 = vld [vmem:[#allocation22_spill] sm:$0xff] }
 0x520   :  { %4096 = vrcp.f32 %v1345_v15  ;;  %v1352_v57 = vadd.f32 1.0, %v4093_v17  ;;  %v6990_v15 = vld [vmem:[#allocation27_spill] sm:$0xff]  ;;  %v6992_v17 = vld [vmem:[#allocation29_spill] sm:$0xff] }
 0x522   :  { %4098 = vrcp.f32 %v1352_v57  ;;  %v6996_v57 = vld [vmem:[#allocation33_spill] sm:$0xff] }
 0x52b   :  { %v4095_v8 = vpop.eup %4094 }
 0x52c   :  { %v1357_v9 = vmul.f32 %v4095_v8, %v4091_v12  ;;  %v6991_v12 = vld [vmem:[#allocation28_spill] sm:$0xff]  ;;  %v6993_v8 = vld [vmem:[#allocation30_spill] sm:$0xff] }
 0x52d   :  { %v4097_v56 = vpop.eup %4096 }
 0x52e   :  { %v1356_v16 = vmul.f32 %v4097_v56, %v5297_v13  ;;  %v6984_v13 = vld [vmem:[#allocation40_spill] sm:$0xff] }
 0x52f   :  { %v4099_v28 = vpop.eup %4098  ;;  %v6995_v56 = vld [vmem:[#allocation32_spill] sm:$0xff] }
 0x530   :  { %v5451_v23 = vadd.f32 %v1357_v9, %v1356_v16  ;;  %v6994_v9 = vld [vmem:[#allocation31_spill] sm:$0xff]  ;;  %v6997_v16 = vld [vmem:[#allocation34_spill] sm:$0xff] }
 0x532   :  { %4100 = vtanh.f32 %v5451_v23 }
 0x53f   :  { %v4101_v26 = vpop.eup %4100 }
 0x540   :  { %v5454_v53 = vmul.f32 %v4101_v26, %v4099_v28  ;;  %v6998_v28 = vld [vmem:[#allocation35_spill] sm:$0xff]  ;;  %v6999_v26 = vmov 0.0  }
 0x542   :  { %6982 = vst [vmem:[#allocation37_spill] sm:$0xff] %v5454_v53  ;;  %1434 = vmatmul.mubr.f32.vlgmr.msra.gmra.mxu0 %v5454_v53  ;;  %1505 = vmatmul.mubr.f32.vlgmr.msra.gmra.mxu1 %v5454_v53  ;;  %v7000_v53 = vld [vmem:[#allocation36_spill] sm:$0xff] }
 0x543   :  { %1545 = vmatpush1.msra.mxu0 %v5178_v32  ;;  %1616 = vmatpush1.msra.mxu1 %v5181_v0 }
 0x544   :  { %1546 = vmatprep.subr.mxu0 %v5184_v41  ;;  %1617 = vmatprep.subr.mxu1 %v5187_v62 }
 0x545   :  { %1547 = vmatpush1.msra.mxu0 %v5190_v60  ;;  %1618 = vmatpush1.msra.mxu1 %v5193_v59 }
 0x546   :  { %1548 = vmatprep.subr.mxu0 %v5196_v58  ;;  %1619 = vmatprep.subr.mxu1 %v5199_v6 }
 0x547   :  { %1549 = vmatpush1.msra.mxu0 %v5202_v5  ;;  %1620 = vmatpush1.msra.mxu1 %v5205_v63 }
 0x548   :  { %1550 = vmatprep.subr.mxu0 %v5208_v61  ;;  %1621 = vmatprep.subr.mxu1 %v5211_v14 }
 0x549   :  { %1551 = vmatpush1.msra.mxu0 %v5214_v50  ;;  %1622 = vmatpush1.msra.mxu1 %v5217_v30 }
 0x54a   :  { %1552 = vmatprep.subr.mxu0 %v5220_v31  ;;  %1623 = vmatprep.subr.mxu1 %v5223_v33 }
 0x54b   :  { %1553 = vmatpush1.msra.mxu0 %v6959_v18  ;;  %1624 = vmatpush1.msra.mxu1 %v6960_v19 }
 0x54c   :  { %1554 = vmatprep.subr.mxu0 %v5232_v3  ;;  %1625 = vmatprep.subr.mxu1 %v5235_v54 }
 0x54d   :  { %1555 = vmatpush1.msra.mxu0 %v5238_v55  ;;  %1626 = vmatpush1.msra.mxu1 %v5241_v1 }
 0x54e   :  { %1556 = vmatprep.subr.mxu0 %v5244_v34  ;;  %1627 = vmatprep.subr.mxu1 %v5247_v7 }
 0x54f   :  { %1557 = vmatpush1.msra.mxu0 %v5328_v20  ;;  %1628 = vmatpush1.msra.mxu1 %v5331_v21 }
 0x550   :  { %1558 = vmatprep.subr.mxu0 %v5334_v22  ;;  %1629 = vmatprep.subr.mxu1 %v5337_v24 }
 0x551   :  { %1559 = vmatpush1.msra.mxu0 %v5340_v25  ;;  %1630 = vmatpush1.msra.mxu1 %v5343_v27 }
 0x552   :  { %1560 = vmatprep.subr.mxu0 %v5346_v4  ;;  %1631 = vmatprep.subr.mxu1 %v5349_v35 }
 0x553   :  { %1561 = vmatpush1.msra.mxu0 %v5352_v36  ;;  %1632 = vmatpush1.msra.mxu1 %v5355_v37 }
 0x554   :  { %1562 = vmatprep.subr.mxu0 %v5358_v38  ;;  %1633 = vmatprep.subr.mxu1 %v5361_v39 }
 0x555   :  { %1563 = vmatpush1.msra.mxu0 %v5364_v40  ;;  %1634 = vmatpush1.msra.mxu1 %v5367_v42 }
 0x556   :  { %1564 = vmatprep.subr.mxu0 %v5370_v43  ;;  %1635 = vmatprep.subr.mxu1 %v5373_v44 }
 0x557   :  { %1565 = vmatpush1.msra.mxu0 %v5376_v45  ;;  %1636 = vmatpush1.msra.mxu1 %v5379_v46 }
 0x558   :  { %1566 = vmatprep.subr.mxu0 %v5382_v47  ;;  %1637 = vmatprep.subr.mxu1 %v5385_v48 }
 0x559   :  { %1567 = vmatpush1.msra.mxu0 %v5388_v49  ;;  %1638 = vmatpush1.msra.mxu1 %v6983_v29 }
 0x55a   :  { %1568 = vmatprep.subr.mxu0 %v6984_v13  ;;  %1639 = vmatprep.subr.mxu1 %v6985_v51  ;;  %v7006_v51 = vld [vmem:[#allocation56_spill] sm:$0xff] }
 0x55b   :  { %1569 = vmatpush1.msra.mxu0 %v6986_v52  ;;  %1640 = vmatpush1.msra.mxu1 %v6987_v2  ;;  %v7005_v52 = vld [vmem:[#allocation58_spill] sm:$0xff] }
 0x55c   :  { %1570 = vmatprep.subr.mxu0 %v6988_v10  ;;  %1641 = vmatprep.subr.mxu1 %v6989_v11 }
 0x55d   :  { %1571 = vmatpush1.msra.mxu0 %v6990_v15  ;;  %1642 = vmatpush1.msra.mxu1 %v6991_v12  ;;  %v7001_v12 = vld [vmem:[#allocation19_spill] sm:$0xff] }
 0x55e   :  { %1572 = vmatprep.subr.mxu0 %v6992_v17  ;;  %1643 = vmatprep.subr.mxu1 %v6993_v8  ;;  %v7002_v17 = vld [vmem:[#allocation20_spill] sm:$0xff] }
 0x55f   :  { %1573 = vmatpush1.msra.mxu0 %v6994_v9  ;;  %1644 = vmatpush1.msra.mxu1 %v6995_v56  ;;  %v7003_v9 = vld [vmem:[#allocation55_spill] sm:$0xff] }
 0x560   :  { %1574 = vmatprep.subr.mxu0 %v6996_v57  ;;  %1645 = vmatprep.subr.mxu1 %v6997_v16  ;;  %v7004_v57 = vld [vmem:[#allocation57_spill] sm:$0xff] }
 0x561   :  { %1575 = vmatpush1.msra.mxu0 %v6998_v28  ;;  %1608 = vmatprep.mubr.f32.mxu0 %v6999_v26 }
 0x562   :  { %1646 = vmatpush1.msra.mxu1 %v7000_v53  ;;  %1679 = vmatprep.mubr.f32.mxu1 %v6999_v26 }
 0x563   :  { %1719 = vmatprep.subr.mxu0 %v7001_v12  ;;  %1790 = vmatprep.subr.mxu1 %v7002_v17 }
 0x602   :  { %v1435_v8 = vpop.f32.mrf.mxu0  ;;  %v1506_v16 = vpop.f32.mrf.mxu1 }
 0x603   :  { %v1436_v15 = vadd.f32 %v1435_v8, %v7003_v9  ;;  %v1507_v26 = vadd.f32 %v1506_v16, %v7006_v51 }
 0x604   :  { %v1437_v56 = vpop.f32.mrf.mxu0  ;;  %v1508_v2 = vpop.f32.mrf.mxu1 }
 0x605   :  { %v3917_v11 = vmul.f32 -1.442695, %v1436_v15  ;;  %v1438_v10 = vadd.f32 %v1437_v56, %v7004_v57  ;;  %v1509_v53 = vadd.f32 %v1508_v2, %v7005_v52 }
 0x607   :  { %4102 = vpow2.f32 %v3917_v11  ;;  %v3918_v28 = vmul.f32 -1.442695, %v1438_v10  ;;  %v3919_v13 = vmul.f32 -1.442695, %v1509_v53 }
 0x609   :  { %4104 = vpow2.f32 %v3918_v28 }
 0x60a   :  { %4106 = vtanh.f32 %v1507_v26 }
 0x60b   :  { %4108 = vpow2.f32 %v3919_v13 }
 0x614   :  { %v4103_v12 = vpop.eup %4102 }
 0x615   :  { %v1514_v29 = vadd.f32 1.0, %v4103_v12  ;;  %v1957_v12 = vld [vmem:[#allocation8 + $0x1e0] sm:$0xff] }
 0x616   :  { %v4105_v17 = vpop.eup %4104 }
 0x617   :  { %4110 = vrcp.f32 %v1514_v29  ;;  %v1520_v8 = vadd.f32 1.0, %v4105_v17  ;;  %v4107_v15 = vpop.eup %4106  ;;  %v1959_v17 = vld [vmem:[#allocation8 + $0x1f0] sm:$0xff] }
 0x618   :  { %v4109_v9 = vpop.eup %4108 }
 0x619   :  { %4112 = vrcp.f32 %v1520_v8  ;;  %v1527_v57 = vadd.f32 1.0, %v4109_v9  ;;  %v1954_v8 = vld [vmem:[#allocation8 + $0x1c8] sm:$0xff]  ;;  %v1953_v9 = vld [vmem:[#allocation8 + $0x1c0] sm:$0xff] }
 0x61b   :  { %4114 = vrcp.f32 %v1527_v57  ;;  %v1949_v57 = vld [vmem:[#allocation8 + $0x1a0] sm:$0xff] }
 0x624   :  { %v4111_v11 = vpop.eup %4110 }
 0x625   :  { %v1532_v56 = vmul.f32 %v4111_v11, %v4107_v15  ;;  %v1956_v15 = vld [vmem:[#allocation8 + $0x1d8] sm:$0xff]  ;;  %v1955_v11 = vld [vmem:[#allocation8 + $0x1d0] sm:$0xff] }
 0x626   :  { %v4113_v10 = vpop.eup %4112 }
 0x627   :  { %v1531_v28 = vmul.f32 %v4113_v10, %v5451_v23  ;;  %v1952_v10 = vld [vmem:[#allocation8 + $0x1b8] sm:$0xff] }
 0x628   :  { %v4115_v53 = vpop.eup %4114 }
 0x629   :  { %v5529_v52 = vadd.f32 %v1532_v56, %v1531_v28  ;;  %v1950_v56 = vld [vmem:[#allocation8 + $0x1a8] sm:$0xff]  ;;  %v1951_v28 = vld [vmem:[#allocation8 + $0x1b0] sm:$0xff] }
 0x62b   :  { %4116 = vtanh.f32 %v5529_v52 }
 0x638   :  { %v4117_v51 = vpop.eup %4116 }
 0x639   :  { %v5532_v2 = vmul.f32 %v4117_v51, %v4115_v53  ;;  %v1948_v53 = vld [vmem:[#allocation8 + $0x198] sm:$0xff]  ;;  %v1945_v51 = vld [vmem:[#allocation8 + $0x180] sm:$0xff] }
 0x63b   :  { %1609 = vmatmul.mubr.f32.vlgmr.msra.gmra.mxu0 %v5532_v2  ;;  %1680 = vmatmul.mubr.f32.vlgmr.msra.gmra.mxu1 %v5532_v2 }
 0x63c   :  { %1720 = vmatpush1.msra.mxu0 %v5178_v32  ;;  %1791 = vmatpush1.msra.mxu1 %v5181_v0  ;;  %v7009_v32 = vld [vmem:[#allocation22_spill] sm:$0xff]  ;;  %v7010_v0 = vld [vmem:[#allocation23_spill] sm:$0xff] }
 0x63d   :  { %1721 = vmatprep.subr.mxu0 %v5184_v41  ;;  %1792 = vmatprep.subr.mxu1 %v5187_v62  ;;  %v7011_v41 = vld [vmem:[#allocation24_spill] sm:$0xff]  ;;  %v7012_v62 = vld [vmem:[#allocation25_spill] sm:$0xff] }
 0x63e   :  { %1722 = vmatpush1.msra.mxu0 %v5190_v60  ;;  %1793 = vmatpush1.msra.mxu1 %v5193_v59  ;;  %v7013_v60 = vld [vmem:[#allocation26_spill] sm:$0xff]  ;;  %v7014_v59 = vld [vmem:[#allocation27_spill] sm:$0xff] }
 0x63f   :  { %1723 = vmatprep.subr.mxu0 %v5196_v58  ;;  %1794 = vmatprep.subr.mxu1 %v5199_v6  ;;  %v7015_v58 = vld [vmem:[#allocation28_spill] sm:$0xff]  ;;  %v7016_v6 = vld [vmem:[#allocation29_spill] sm:$0xff] }
 0x640   :  { %1724 = vmatpush1.msra.mxu0 %v5202_v5  ;;  %1795 = vmatpush1.msra.mxu1 %v5205_v63  ;;  %v7017_v5 = vld [vmem:[#allocation30_spill] sm:$0xff]  ;;  %v7018_v63 = vld [vmem:[#allocation31_spill] sm:$0xff] }
 0x641   :  { %1725 = vmatprep.subr.mxu0 %v5208_v61  ;;  %1796 = vmatprep.subr.mxu1 %v5211_v14  ;;  %v7019_v61 = vld [vmem:[#allocation32_spill] sm:$0xff]  ;;  %v7020_v14 = vld [vmem:[#allocation33_spill] sm:$0xff] }
 0x642   :  { %1726 = vmatpush1.msra.mxu0 %v5214_v50  ;;  %1797 = vmatpush1.msra.mxu1 %v5217_v30  ;;  %v7021_v50 = vld [vmem:[#allocation34_spill] sm:$0xff]  ;;  %v7022_v30 = vld [vmem:[#allocation35_spill] sm:$0xff] }
 0x643   :  { %1727 = vmatprep.subr.mxu0 %v5220_v31  ;;  %1798 = vmatprep.subr.mxu1 %v5223_v33  ;;  %v7023_v31 = vld [vmem:[#allocation36_spill] sm:$0xff]  ;;  %v7024_v33 = vmov 0.0  }
 0x644   :  { %1728 = vmatpush1.msra.mxu0 %v6959_v18  ;;  %1799 = vmatpush1.msra.mxu1 %v6960_v19 }
 0x645   :  { %1729 = vmatprep.subr.mxu0 %v5232_v3  ;;  %1800 = vmatprep.subr.mxu1 %v5235_v54  ;;  %v7025_v54 = vld [vmem:[#allocation59_spill] sm:$0xff] }
 0x646   :  { %1730 = vmatpush1.msra.mxu0 %v5238_v55  ;;  %1801 = vmatpush1.msra.mxu1 %v5241_v1  ;;  %v7007_v1 = vld [vmem:[#allocation42_spill] sm:$0xff]  ;;  %v7008_v55 = vld [vmem:[#allocation40_spill] sm:$0xff] }
 0x647   :  { %1731 = vmatprep.subr.mxu0 %v5244_v34  ;;  %1802 = vmatprep.subr.mxu1 %v5247_v7  ;;  %v1958_v34 = vld [vmem:[#allocation8 + $0x1e8] sm:$0xff]  ;;  %v1960_v7 = vld [vmem:[#allocation8 + $0x1f8] sm:$0xff] }
 0x648   :  { %1732 = vmatpush1.msra.mxu0 %v5328_v20  ;;  %1803 = vmatpush1.msra.mxu1 %v5331_v21  ;;  %v7026_v21 = vld [vmem:[#allocation61_spill] sm:$0xff] }
 0x649   :  { %1733 = vmatprep.subr.mxu0 %v5334_v22  ;;  %1804 = vmatprep.subr.mxu1 %v5337_v24 }
 0x64a   :  { %1734 = vmatpush1.msra.mxu0 %v5340_v25  ;;  %1805 = vmatpush1.msra.mxu1 %v5343_v27 }
 0x64b   :  { %1735 = vmatprep.subr.mxu0 %v5346_v4  ;;  %1806 = vmatprep.subr.mxu1 %v5349_v35  ;;  %v7027_v4 = vld [vmem:[#allocation62_spill] sm:$0xff] }
 0x64c   :  { %1736 = vmatpush1.msra.mxu0 %v5352_v36  ;;  %1807 = vmatpush1.msra.mxu1 %v5355_v37  ;;  %v7028_v36 = vld [vmem:[#allocation60_spill] sm:$0xff] }
 0x64d   :  { %1737 = vmatprep.subr.mxu0 %v5358_v38  ;;  %1808 = vmatprep.subr.mxu1 %v5361_v39 }
 0x64e   :  { %1738 = vmatpush1.msra.mxu0 %v5364_v40  ;;  %1809 = vmatpush1.msra.mxu1 %v5367_v42 }
 0x64f   :  { %1739 = vmatprep.subr.mxu0 %v5370_v43  ;;  %1810 = vmatprep.subr.mxu1 %v5373_v44 }
 0x650   :  { %1740 = vmatpush1.msra.mxu0 %v5376_v45  ;;  %1811 = vmatpush1.msra.mxu1 %v5379_v46 }
 0x651   :  { %1741 = vmatprep.subr.mxu0 %v5382_v47  ;;  %1812 = vmatprep.subr.mxu1 %v5385_v48 }
 0x652   :  { %1742 = vmatpush1.msra.mxu0 %v5388_v49  ;;  %1813 = vmatpush1.msra.mxu1 %v7007_v1  ;;  %v1947_v1 = vld [vmem:[#allocation8 + $0x190] sm:$0xff] }
 0x653   :  { %1743 = vmatprep.subr.mxu0 %v7008_v55  ;;  %1814 = vmatprep.subr.mxu1 %v7009_v32  ;;  %v1942_v55 = vld [vmem:[#allocation8 + $0x168] sm:$0xff]  ;;  %v1944_v32 = vld [vmem:[#allocation8 + $0x178] sm:$0xff] }
 0x654   :  { %1744 = vmatpush1.msra.mxu0 %v7010_v0  ;;  %1815 = vmatpush1.msra.mxu1 %v7011_v41  ;;  %v1941_v0 = vld [vmem:[#allocation8 + $0x160] sm:$0xff]  ;;  %v1943_v41 = vld [vmem:[#allocation8 + $0x170] sm:$0xff] }
 0x655   :  { %1745 = vmatprep.subr.mxu0 %v7012_v62  ;;  %1816 = vmatprep.subr.mxu1 %v7013_v60  ;;  %v1938_v62 = vld [vmem:[#allocation8 + $0x148] sm:$0xff]  ;;  %v1940_v60 = vld [vmem:[#allocation8 + $0x158] sm:$0xff] }
 0x656   :  { %1746 = vmatpush1.msra.mxu0 %v7014_v59  ;;  %1817 = vmatpush1.msra.mxu1 %v7015_v58  ;;  %v1937_v59 = vld [vmem:[#allocation8 + $0x140] sm:$0xff]  ;;  %v1939_v58 = vld [vmem:[#allocation8 + $0x150] sm:$0xff] }
 0x657   :  { %1747 = vmatprep.subr.mxu0 %v7016_v6  ;;  %1818 = vmatprep.subr.mxu1 %v7017_v5  ;;  %v1934_v6 = vld [vmem:[#allocation8 + $0x128] sm:$0xff]  ;;  %v1936_v5 = vld [vmem:[#allocation8 + $0x138] sm:$0xff] }
 0x658   :  { %1748 = vmatpush1.msra.mxu0 %v7018_v63  ;;  %1819 = vmatpush1.msra.mxu1 %v7019_v61  ;;  %v1933_v63 = vld [vmem:[#allocation8 + $0x120] sm:$0xff]  ;;  %v1935_v61 = vld [vmem:[#allocation8 + $0x130] sm:$0xff] }
 0x659   :  { %1749 = vmatprep.subr.mxu0 %v7020_v14  ;;  %1820 = vmatprep.subr.mxu1 %v7021_v50  ;;  %v1930_v14 = vld [vmem:[#allocation8 + $0x108] sm:$0xff]  ;;  %v1932_v50 = vld [vmem:[#allocation8 + $0x118] sm:$0xff] }
 0x65a   :  { %1750 = vmatpush1.msra.mxu0 %v7022_v30  ;;  %1821 = vmatpush1.msra.mxu1 %v7023_v31  ;;  %v1929_v30 = vld [vmem:[#allocation8 + $0x100] sm:$0xff]  ;;  %v1931_v31 = vld [vmem:[#allocation8 + $0x110] sm:$0xff] }
 0x65b   :  { %1783 = vmatprep.mubr.f32.mxu0 %v7024_v33  ;;  %1854 = vmatprep.mubr.f32.mxu1 %v7024_v33 }
 0x65c   :  { %1983 = vmatprep.subr.mxu0 %v1958_v34  ;;  %2096 = vmatprep.subr.mxu1 %v1960_v7  ;;  %v1926_v34 = vld [vmem:[#allocation8 + $0xe8] sm:$0xff]  ;;  %v1928_v7 = vld [vmem:[#allocation8 + $0xf8] sm:$0xff] }
 0x6fb   :  { %v1610_v3 = vpop.f32.mrf.mxu0  ;;  %v1681_v24 = vpop.f32.mrf.mxu1 }
 0x6fc   :  { %v1611_v18 = vadd.f32 %v1610_v3, %v7025_v54  ;;  %v1682_v37 = vadd.f32 %v1681_v24, %v7028_v36  ;;  %v1925_v3 = vld [vmem:[#allocation8 + $0xe0] sm:$0xff]  ;;  %v1927_v54 = vld [vmem:[#allocation8 + $0xf0] sm:$0xff]  ;;  %v1920_v24 = vld [vmem:[#allocation8 + $0xb8] sm:$0xff] }
 0x6fd   :  { %v1612_v19 = vpop.f32.mrf.mxu0  ;;  %v1683_v27 = vpop.f32.mrf.mxu1  ;;  %v1913_v36 = vld [vmem:[#allocation8 + $0x80] sm:$0xff] }
 0x6fe   :  { %v3920_v20 = vmul.f32 -1.442695, %v1611_v18  ;;  %v1613_v22 = vadd.f32 %v1612_v19, %v7026_v21  ;;  %v1684_v35 = vadd.f32 %v1683_v27, %v7027_v4  ;;  %v1922_v18 = vld [vmem:[#allocation8 + $0xc8] sm:$0xff]  ;;  %v1924_v19 = vld [vmem:[#allocation8 + $0xd8] sm:$0xff]  ;;  %v1923_v21 = vld [vmem:[#allocation8 + $0xd0] sm:$0xff] }
 0x6ff   :  { %v1919_v27 = vld [vmem:[#allocation8 + $0xb0] sm:$0xff]  ;;  %v1914_v4 = vld [vmem:[#allocation8 + $0x88] sm:$0xff] }
 0x700   :  { %4118 = vpow2.f32 %v3920_v20  ;;  %v3921_v25 = vmul.f32 -1.442695, %v1613_v22  ;;  %v3922_v38 = vmul.f32 -1.442695, %v1684_v35  ;;  %v1921_v20 = vld [vmem:[#allocation8 + $0xc0] sm:$0xff]  ;;  %v1918_v22 = vld [vmem:[#allocation8 + $0xa8] sm:$0xff] }
 0x701   :  { %v1916_v35 = vld [vmem:[#allocation8 + $0x98] sm:$0xff] }
 0x702   :  { %4120 = vpow2.f32 %v3921_v25  ;;  %v1917_v25 = vld [vmem:[#allocation8 + $0xa0] sm:$0xff] }
 0x703   :  { %4122 = vtanh.f32 %v1682_v37  ;;  %v1915_v37 = vld [vmem:[#allocation8 + $0x90] sm:$0xff] }
 0x704   :  { %4124 = vpow2.f32 %v3922_v38  ;;  %v1910_v38 = vld [vmem:[#allocation8 + $0x68] sm:$0xff] }
 0x70d   :  { %v4119_v39 = vpop.eup %4118 }
 0x70e   :  { %v1689_v40 = vadd.f32 1.0, %v4119_v39  ;;  %v1912_v39 = vld [vmem:[#allocation8 + $0x78] sm:$0xff] }
 0x70f   :  { %v4121_v42 = vpop.eup %4120 }
 0x710   :  { %4126 = vrcp.f32 %v1689_v40  ;;  %v1695_v43 = vadd.f32 1.0, %v4121_v42  ;;  %v4123_v44 = vpop.eup %4122  ;;  %v1909_v40 = vld [vmem:[#allocation8 + $0x60] sm:$0xff]  ;;  %v1911_v42 = vld [vmem:[#allocation8 + $0x70] sm:$0xff] }
 0x711   :  { %v4125_v45 = vpop.eup %4124 }
 0x712   :  { %4128 = vrcp.f32 %v1695_v43  ;;  %v1702_v49 = vadd.f32 1.0, %v4125_v45  ;;  %v1906_v43 = vld [vmem:[#allocation8 + $0x48] sm:$0xff]  ;;  %v1905_v45 = vld [vmem:[#allocation8 + $0x40] sm:$0xff] }
 0x714   :  { %4130 = vrcp.f32 %v1702_v49  ;;  %v1901_v49 = vld [vmem:[#allocation8 + $0x20] sm:$0xff] }
 0x71d   :  { %v4127_v46 = vpop.eup %4126 }
 0x71e   :  { %v1707_v47 = vmul.f32 %v4127_v46, %v4123_v44  ;;  %v1908_v44 = vld [vmem:[#allocation8 + $0x58] sm:$0xff]  ;;  %v1907_v46 = vld [vmem:[#allocation8 + $0x50] sm:$0xff] }
 0x71f   :  { %v4129_v48 = vpop.eup %4128 }
 0x720   :  { %v1706_v23 = vmul.f32 %v4129_v48, %v5529_v52  ;;  %v1946_v52 = vld [vmem:[#allocation8 + $0x188] sm:$0xff]  ;;  %v1904_v48 = vld [vmem:[#allocation8 + $0x38] sm:$0xff] }
 0x721   :  { %v4131_v13 = vpop.eup %4130 }
 0x722   :  { %v5605_v29 = vadd.f32 %v1707_v47, %v1706_v23  ;;  %v1902_v47 = vld [vmem:[#allocation8 + $0x28] sm:$0xff]  ;;  %v1903_v23 = vld [vmem:[#allocation8 + $0x30] sm:$0xff] }
 0x724   :  { %4132 = vtanh.f32 %v5605_v29 }
 0x731   :  { %v4133_v16 = vpop.eup %4132 }
 0x732   :  { %v5608_v26 = vmul.f32 %v4133_v16, %v4131_v13  ;;  %v1898_v13 = vld [vmem:[#allocation8 + $0x8] sm:$0xff]  ;;  %v1900_v16 = vld [vmem:[#allocation8 + $0x18] sm:$0xff] }
 0x734   :  { %1784 = vmatmul.mubr.f32.vlgmr.msra.gmra.mxu0 %v5608_v26  ;;  %1855 = vmatmul.mubr.f32.vlgmr.msra.gmra.mxu1 %v5608_v26 }
 0x735   :  { %1984 = vmatpush1.msra.mxu0 %v1957_v12  ;;  %2097 = vmatpush1.msra.mxu1 %v1959_v17  ;;  %v1897_v12 = vld [vmem:[#allocation8] sm:$0xff]  ;;  %v1899_v17 = vld [vmem:[#allocation8 + $0x10] sm:$0xff] }
 0x736   :  { %1985 = vmatprep.subr.mxu0 %v1954_v8  ;;  %2098 = vmatprep.subr.mxu1 %v1956_v15  ;;  %v7029_v8 = vld [vmem:[#allocation67_spill] sm:$0xff]  ;;  %v7030_v15 = vld [vmem:[#allocation18_spill] sm:$0xff] }
 0x737   :  { %1986 = vmatpush1.msra.mxu0 %v1953_v9  ;;  %2099 = vmatpush1.msra.mxu1 %v1955_v11  ;;  %v7031_v9 = vld [vmem:[#allocation21_spill] sm:$0xff] }
 0x738   :  { %1987 = vmatprep.subr.mxu0 %v1950_v56  ;;  %2100 = vmatprep.subr.mxu1 %v1952_v10  ;;  %v7032_v11 = vld [vmem:[#allocation41_spill] sm:$0xff] }
 0x739   :  { %1988 = vmatpush1.msra.mxu0 %v1949_v57  ;;  %2101 = vmatpush1.msra.mxu1 %v1951_v28  ;;  %v7033_v56 = vld [vmem:[#allocation37_spill] sm:$0xff]  ;;  %v5644_v57 = vld [vmem:[#allocation10 + $0x1f8] sm:$0xff]  ;;  %v5650_v28 = vld [vmem:[#allocation10 + $0x1f0] sm:$0xff] }
 0x73a   :  { %1989 = vmatprep.subr.mxu0 %v1946_v52  ;;  %2102 = vmatprep.subr.mxu1 %v1948_v53  ;;  %v5642_v10 = vld [vmem:[#allocation10 + $0x1e8] sm:$0xff]  ;;  %7035 = vst [vmem:[#allocation43_spill] sm:$0xff] %v5644_v57  ;;  %v5656_v52 = vld [vmem:[#allocation10 + $0x1d8] sm:$0xff]  ;;  %v5660_v53 = vld [vmem:[#allocation10 + $0x1c0] sm:$0xff] }
 0x73b   :  { %1990 = vmatpush1.msra.mxu0 %v1945_v51  ;;  %2103 = vmatpush1.msra.mxu1 %v1947_v1  ;;  %7034 = vst [vmem:[#allocation38_spill] sm:$0xff] %v5642_v10  ;;  %v5662_v51 = vld [vmem:[#allocation10 + $0x1d0] sm:$0xff]  ;;  %v5666_v1 = vld [vmem:[#allocation10 + $0x1a8] sm:$0xff] }
 0x73c   :  { %1991 = vmatprep.subr.mxu0 %v1942_v55  ;;  %2104 = vmatprep.subr.mxu1 %v1944_v32  ;;  %v5668_v55 = vld [vmem:[#allocation10 + $0x1b8] sm:$0xff]  ;;  %v5672_v32 = vld [vmem:[#allocation10 + $0x1a0] sm:$0xff] }
 0x73d   :  { %1992 = vmatpush1.msra.mxu0 %v1941_v0  ;;  %2105 = vmatpush1.msra.mxu1 %v1943_v41  ;;  %v5674_v0 = vld [vmem:[#allocation10 + $0x1b0] sm:$0xff]  ;;  %v5678_v41 = vld [vmem:[#allocation10 + $0x188] sm:$0xff] }
 0x73e   :  { %1993 = vmatprep.subr.mxu0 %v1938_v62  ;;  %2106 = vmatprep.subr.mxu1 %v1940_v60  ;;  %v5680_v62 = vld [vmem:[#allocation10 + $0x198] sm:$0xff]  ;;  %v5684_v60 = vld [vmem:[#allocation10 + $0x180] sm:$0xff] }
 0x73f   :  { %1994 = vmatpush1.msra.mxu0 %v1937_v59  ;;  %2107 = vmatpush1.msra.mxu1 %v1939_v58  ;;  %v5686_v59 = vld [vmem:[#allocation10 + $0x190] sm:$0xff]  ;;  %v5690_v58 = vld [vmem:[#allocation10 + $0x168] sm:$0xff] }
 0x740   :  { %1995 = vmatprep.subr.mxu0 %v1934_v6  ;;  %2108 = vmatprep.subr.mxu1 %v1936_v5  ;;  %v5692_v6 = vld [vmem:[#allocation10 + $0x178] sm:$0xff]  ;;  %v5696_v5 = vld [vmem:[#allocation10 + $0x160] sm:$0xff] }
 0x741   :  { %1996 = vmatpush1.msra.mxu0 %v1933_v63  ;;  %2109 = vmatpush1.msra.mxu1 %v1935_v61  ;;  %v5698_v63 = vld [vmem:[#allocation10 + $0x170] sm:$0xff]  ;;  %v5702_v61 = vld [vmem:[#allocation10 + $0x148] sm:$0xff] }
 0x742   :  { %1997 = vmatprep.subr.mxu0 %v1930_v14  ;;  %2110 = vmatprep.subr.mxu1 %v1932_v50  ;;  %v5704_v14 = vld [vmem:[#allocation10 + $0x158] sm:$0xff]  ;;  %v5708_v50 = vld [vmem:[#allocation10 + $0x140] sm:$0xff] }
 0x743   :  { %1998 = vmatpush1.msra.mxu0 %v1929_v30  ;;  %2111 = vmatpush1.msra.mxu1 %v1931_v31  ;;  %v5710_v30 = vld [vmem:[#allocation10 + $0x150] sm:$0xff]  ;;  %v5714_v31 = vld [vmem:[#allocation10 + $0x128] sm:$0xff] }
 0x744   :  { %1999 = vmatprep.subr.mxu0 %v1926_v34  ;;  %2112 = vmatprep.subr.mxu1 %v1928_v7  ;;  %v5716_v34 = vld [vmem:[#allocation10 + $0x138] sm:$0xff]  ;;  %v5720_v7 = vld [vmem:[#allocation10 + $0x120] sm:$0xff] }
 0x745   :  { %2000 = vmatpush1.msra.mxu0 %v1925_v3  ;;  %2113 = vmatpush1.msra.mxu1 %v1927_v54  ;;  %v5722_v3 = vld [vmem:[#allocation10 + $0x130] sm:$0xff]  ;;  %v5726_v54 = vld [vmem:[#allocation10 + $0x108] sm:$0xff] }
 0x746   :  { %2001 = vmatprep.subr.mxu0 %v1922_v18  ;;  %2114 = vmatprep.subr.mxu1 %v1924_v19  ;;  %v5728_v18 = vld [vmem:[#allocation10 + $0x118] sm:$0xff]  ;;  %v5732_v19 = vld [vmem:[#allocation10 + $0x100] sm:$0xff] }
 0x747   :  { %2002 = vmatpush1.msra.mxu0 %v1921_v20  ;;  %2115 = vmatpush1.msra.mxu1 %v1923_v21  ;;  %v5734_v20 = vld [vmem:[#allocation10 + $0x110] sm:$0xff]  ;;  %v5738_v21 = vld [vmem:[#allocation10 + $0xe8] sm:$0xff] }
 0x748   :  { %2003 = vmatprep.subr.mxu0 %v1918_v22  ;;  %2116 = vmatprep.subr.mxu1 %v1920_v24  ;;  %v5740_v22 = vld [vmem:[#allocation10 + $0xf8] sm:$0xff]  ;;  %v5744_v24 = vld [vmem:[#allocation10 + $0xe0] sm:$0xff] }
 0x749   :  { %2004 = vmatpush1.msra.mxu0 %v1917_v25  ;;  %2117 = vmatpush1.msra.mxu1 %v1919_v27  ;;  %v5746_v25 = vld [vmem:[#allocation10 + $0xf0] sm:$0xff]  ;;  %v5750_v27 = vld [vmem:[#allocation10 + $0xc8] sm:$0xff] }
 0x74a   :  { %2005 = vmatprep.subr.mxu0 %v1914_v4  ;;  %2118 = vmatprep.subr.mxu1 %v1916_v35  ;;  %v5752_v4 = vld [vmem:[#allocation10 + $0xd8] sm:$0xff]  ;;  %v5756_v35 = vld [vmem:[#allocation10 + $0xc0] sm:$0xff] }
 0x74b   :  { %2006 = vmatpush1.msra.mxu0 %v1913_v36  ;;  %2119 = vmatpush1.msra.mxu1 %v1915_v37  ;;  %v5758_v36 = vld [vmem:[#allocation10 + $0xd0] sm:$0xff]  ;;  %v5762_v37 = vld [vmem:[#allocation10 + $0xa8] sm:$0xff] }
 0x74c   :  { %2007 = vmatprep.subr.mxu0 %v1910_v38  ;;  %2120 = vmatprep.subr.mxu1 %v1912_v39  ;;  %v5764_v38 = vld [vmem:[#allocation10 + $0xb8] sm:$0xff]  ;;  %v5768_v39 = vld [vmem:[#allocation10 + $0xa0] sm:$0xff] }
 0x74d   :  { %2008 = vmatpush1.msra.mxu0 %v1909_v40  ;;  %2121 = vmatpush1.msra.mxu1 %v1911_v42  ;;  %v5770_v40 = vld [vmem:[#allocation10 + $0xb0] sm:$0xff]  ;;  %v5774_v42 = vld [vmem:[#allocation10 + $0x88] sm:$0xff] }
 0x74e   :  { %2009 = vmatprep.subr.mxu0 %v1906_v43  ;;  %2122 = vmatprep.subr.mxu1 %v1908_v44  ;;  %7036 = vst [vmem:[#allocation45_spill] sm:$0xff] %v5770_v40  ;;  %7037 = vst [vmem:[#allocation46_spill] sm:$0xff] %v5774_v42  ;;  %v5776_v43 = vld [vmem:[#allocation10 + $0x98] sm:$0xff]  ;;  %v5780_v44 = vld [vmem:[#allocation10 + $0x80] sm:$0xff] }
 0x74f   :  { %2010 = vmatpush1.msra.mxu0 %v1905_v45  ;;  %2123 = vmatpush1.msra.mxu1 %v1907_v46  ;;  %7038 = vst [vmem:[#allocation44_spill] sm:$0xff] %v5776_v43  ;;  %7039 = vst [vmem:[#allocation47_spill] sm:$0xff] %v5780_v44  ;;  %v5782_v45 = vld [vmem:[#allocation10 + $0x90] sm:$0xff]  ;;  %v5786_v46 = vld [vmem:[#allocation10 + $0x68] sm:$0xff] }
 0x750   :  { %2011 = vmatprep.subr.mxu0 %v1902_v47  ;;  %2124 = vmatprep.subr.mxu1 %v1904_v48  ;;  %7040 = vst [vmem:[#allocation49_spill] sm:$0xff] %v5782_v45  ;;  %7041 = vst [vmem:[#allocation50_spill] sm:$0xff] %v5786_v46  ;;  %v5788_v47 = vld [vmem:[#allocation10 + $0x78] sm:$0xff]  ;;  %v5792_v48 = vld [vmem:[#allocation10 + $0x60] sm:$0xff] }
 0x751   :  { %2012 = vmatpush1.msra.mxu0 %v1901_v49  ;;  %2125 = vmatpush1.msra.mxu1 %v1903_v23  ;;  %7042 = vst [vmem:[#allocation48_spill] sm:$0xff] %v5788_v47  ;;  %7043 = vst [vmem:[#allocation16_spill] sm:$0xff] %v5792_v48  ;;  %v5794_v49 = vld [vmem:[#allocation10 + $0x70] sm:$0xff]  ;;  %v5798_v23 = vld [vmem:[#allocation10 + $0x48] sm:$0xff] }
 0x752   :  { %2013 = vmatprep.subr.mxu0 %v1898_v13  ;;  %2126 = vmatprep.subr.mxu1 %v1900_v16  ;;  %7044 = vst [vmem:[#allocation17_spill] sm:$0xff] %v5794_v49  ;;  %7045 = vst [vmem:[#allocation51_spill] sm:$0xff] %v5798_v23  ;;  %v5800_v13 = vld [vmem:[#allocation10 + $0x58] sm:$0xff]  ;;  %v5804_v16 = vld [vmem:[#allocation10 + $0x40] sm:$0xff] }
 0x753   :  { %2014 = vmatpush1.msra.mxu0 %v1897_v12  ;;  %2047 = vmatprep.mubr.f32.mxu0 %v7024_v33  ;;  %7046 = vst [vmem:[#allocation53_spill] sm:$0xff] %v5800_v13  ;;  %7047 = vst [vmem:[#allocation54_spill] sm:$0xff] %v5804_v16  ;;  %v5806_v12 = vld [vmem:[#allocation10 + $0x50] sm:$0xff] }
 0x754   :  { %2127 = vmatpush1.msra.mxu1 %v1899_v17  ;;  %2160 = vmatprep.mubr.f32.mxu1 %v7024_v33  ;;  %7048 = vst [vmem:[#allocation52_spill] sm:$0xff] %v5806_v12  ;;  %v5810_v17 = vld [vmem:[#allocation10 + $0x28] sm:$0xff] }
 0x755   :  { %2048 = vmatmul.mubr.f32.vlgmr.msra.gmra.mxu0 %v7029_v8  ;;  %2161 = vmatmul.mubr.f32.vlgmr.msra.gmra.mxu1 %v7029_v8  ;;  %7049 = vst [vmem:[#allocation19_spill] sm:$0xff] %v5810_v17  ;;  %v5812_v8 = vld [vmem:[#allocation10 + $0x38] sm:$0xff] }
 0x756   :  { %2053 = vmatprep.mubr.f32.mxu0 %v7024_v33  ;;  %2166 = vmatprep.mubr.f32.mxu1 %v7024_v33  ;;  %7050 = vst [vmem:[#allocation20_spill] sm:$0xff] %v5812_v8 }
 0x757   :  { %2312 = vmatprep.subr.mxu0 %v5642_v10  ;;  %2383 = vmatprep.subr.mxu1 %v5644_v57 }
 0x758   :  { %2384 = vmatpush1.msra.mxu1 %v5650_v28 }
 0x759   :  { %2054 = vmatmul.mubr.f32.gmra.mxu0 %v7030_v15  ;;  %2167 = vmatmul.mubr.f32.gmra.mxu1 %v7030_v15  ;;  %v5816_v15 = vld [vmem:[#allocation10 + $0x20] sm:$0xff] }
 0x75a   :  { %2059 = vmatprep.mubr.f32.mxu0 %v7024_v33  ;;  %2172 = vmatprep.mubr.f32.mxu1 %v7024_v33  ;;  %7051 = vst [vmem:[#allocation55_spill] sm:$0xff] %v5816_v15 }
 0x75b   :  { %2385 = vmatprep.subr.mxu1 %v5656_v52 }
 0x75c   :  { %2386 = vmatpush1.msra.mxu1 %v5662_v51 }
 0x75d   :  { %2060 = vmatmul.mubr.f32.gmra.mxu0 %v7031_v9  ;;  %2173 = vmatmul.mubr.f32.gmra.mxu1 %v7031_v9  ;;  %v5818_v9 = vld [vmem:[#allocation10 + $0x30] sm:$0xff] }
 0x75e   :  { %2065 = vmatprep.mubr.f32.mxu0 %v7024_v33  ;;  %2178 = vmatprep.mubr.f32.mxu1 %v7024_v33  ;;  %7052 = vst [vmem:[#allocation57_spill] sm:$0xff] %v5818_v9 }
 0x75f   :  { %2387 = vmatprep.subr.mxu1 %v5668_v55 }
 0x760   :  { %2388 = vmatpush1.msra.mxu1 %v5674_v0 }
 0x761   :  { %2066 = vmatmul.mubr.f32.gmra.mxu0 %v7032_v11  ;;  %2179 = vmatmul.mubr.f32.gmra.mxu1 %v7032_v11  ;;  %v5822_v11 = vld [vmem:[#allocation10 + $0x8] sm:$0xff] }
 0x762   :  { %2071 = vmatprep.mubr.f32.mxu0 %v7024_v33  ;;  %2184 = vmatprep.mubr.f32.mxu1 %v7024_v33  ;;  %7053 = vst [vmem:[#allocation58_spill] sm:$0xff] %v5822_v11 }
 0x763   :  { %2389 = vmatprep.subr.mxu1 %v5680_v62 }
 0x764   :  { %2390 = vmatpush1.msra.mxu1 %v5686_v59 }
 0x765   :  { %2072 = vmatmul.mubr.f32.gmra.mxu0 %v7033_v56  ;;  %2185 = vmatmul.mubr.f32.gmra.mxu1 %v7033_v56  ;;  %v5824_v56 = vld [vmem:[#allocation10 + $0x18] sm:$0xff] }
 0x766   :  { %2077 = vmatprep.mubr.f32.mxu0 %v7024_v33  ;;  %2190 = vmatprep.mubr.f32.mxu1 %v7024_v33  ;;  %7054 = vst [vmem:[#allocation56_spill] sm:$0xff] %v5824_v56 }
 0x767   :  { %2391 = vmatprep.subr.mxu1 %v5692_v6 }
 0x768   :  { %2392 = vmatpush1.msra.mxu1 %v5698_v63 }
 0x769   :  { %2078 = vmatmul.mubr.f32.gmra.mxu0 %v5532_v2  ;;  %2191 = vmatmul.mubr.f32.gmra.mxu1 %v5532_v2  ;;  %v5648_v2 = vld [vmem:[#allocation10 + $0x1e0] sm:$0xff] }
 0x76a   :  { %2083 = vmatprep.mubr.f32.mxu0 %v7024_v33  ;;  %2196 = vmatprep.mubr.f32.mxu1 %v7024_v33 }
 0x76b   :  { %2313 = vmatpush1.msra.mxu0 %v5648_v2  ;;  %2393 = vmatprep.subr.mxu1 %v5704_v14 }
 0x76c   :  { %2394 = vmatpush1.msra.mxu1 %v5710_v30 }
 0x76d   :  { %2084 = vmatmul.mubr.f32.gmra.mxu0 %v5608_v26  ;;  %2197 = vmatmul.mubr.f32.gmra.mxu1 %v5608_v26  ;;  %v5654_v26 = vld [vmem:[#allocation10 + $0x1c8] sm:$0xff] }
 0x76e   :  { %2089 = vmatprep.mubr.f32.mxu0 %v7024_v33  ;;  %2202 = vmatprep.mubr.f32.mxu1 %v7024_v33 }
 0x76f   :  { %2314 = vmatprep.subr.mxu0 %v5654_v26  ;;  %2395 = vmatprep.subr.mxu1 %v5716_v34 }
 0x770   :  { %2315 = vmatpush1.msra.mxu0 %v5660_v53  ;;  %2396 = vmatpush1.msra.mxu1 %v5722_v3 }
 0x771   :  { %2316 = vmatprep.subr.mxu0 %v5666_v1  ;;  %2397 = vmatprep.subr.mxu1 %v5728_v18 }
 0x772   :  { %2317 = vmatpush1.msra.mxu0 %v5672_v32  ;;  %2398 = vmatpush1.msra.mxu1 %v5734_v20 }
 0x773   :  { %2318 = vmatprep.subr.mxu0 %v5678_v41  ;;  %2399 = vmatprep.subr.mxu1 %v5740_v22 }
 0x774   :  { %2319 = vmatpush1.msra.mxu0 %v5684_v60  ;;  %2400 = vmatpush1.msra.mxu1 %v5746_v25 }
 0x775   :  { %2320 = vmatprep.subr.mxu0 %v5690_v58  ;;  %2401 = vmatprep.subr.mxu1 %v5752_v4 }
 0x776   :  { %2321 = vmatpush1.msra.mxu0 %v5696_v5  ;;  %2402 = vmatpush1.msra.mxu1 %v5758_v36 }
 0x777   :  { %2322 = vmatprep.subr.mxu0 %v5702_v61  ;;  %2403 = vmatprep.subr.mxu1 %v5764_v38 }
 0x778   :  { %2323 = vmatpush1.msra.mxu0 %v5708_v50  ;;  %2404 = vmatpush1.msra.mxu1 %v5770_v40 }
 0x779   :  { %2324 = vmatprep.subr.mxu0 %v5714_v31  ;;  %2405 = vmatprep.subr.mxu1 %v5776_v43 }
 0x77a   :  { %2325 = vmatpush1.msra.mxu0 %v5720_v7  ;;  %2406 = vmatpush1.msra.mxu1 %v5782_v45 }
 0x77b   :  { %2326 = vmatprep.subr.mxu0 %v5726_v54  ;;  %2407 = vmatprep.subr.mxu1 %v5788_v47  ;;  %v7059_v47 = vld [vmem:[#allocation66_spill] sm:$0xff] }
 0x77c   :  { %2327 = vmatpush1.msra.mxu0 %v5732_v19  ;;  %2408 = vmatpush1.msra.mxu1 %v5794_v49 }
 0x77d   :  { %2328 = vmatprep.subr.mxu0 %v5738_v21  ;;  %2409 = vmatprep.subr.mxu1 %v5800_v13 }
 0x77e   :  { %2329 = vmatpush1.msra.mxu0 %v5744_v24  ;;  %2410 = vmatpush1.msra.mxu1 %v5806_v12  ;;  %v5826_v12 = vld [vmem:[#allocation10] sm:$0xff] }
 0x77f   :  { %2330 = vmatprep.subr.mxu0 %v5750_v27  ;;  %2411 = vmatprep.subr.mxu1 %v5812_v8  ;;  %7055 = vst [vmem:[#allocation42_spill] sm:$0xff] %v5826_v12 }
 0x780   :  { %2331 = vmatpush1.msra.mxu0 %v5756_v35  ;;  %2412 = vmatpush1.msra.mxu1 %v5818_v9 }
 0x781   :  { %2332 = vmatprep.subr.mxu0 %v5762_v37  ;;  %2413 = vmatprep.subr.mxu1 %v5824_v56 }
 0x782   :  { %2333 = vmatpush1.msra.mxu0 %v5768_v39 }
 0x783   :  { %2334 = vmatprep.subr.mxu0 %v5774_v42 }
 0x784   :  { %2335 = vmatpush1.msra.mxu0 %v5780_v44 }
 0x785   :  { %2336 = vmatprep.subr.mxu0 %v5786_v46  ;;  %v7060_v46 = vld [vmem:[#allocation64_spill] sm:$0xff] }
 0x786   :  { %2337 = vmatpush1.msra.mxu0 %v5792_v48 }
 0x787   :  { %2338 = vmatprep.subr.mxu0 %v5798_v23  ;;  %v7058_v23 = vld [vmem:[#allocation65_spill] sm:$0xff] }
 0x788   :  { %2339 = vmatpush1.msra.mxu0 %v5804_v16 }
 0x789   :  { %2340 = vmatprep.subr.mxu0 %v5810_v17  ;;  %v5830_v17 = vld [vmem:[#allocation10 + $0x10] sm:$0xff] }
 0x78a   :  { %2341 = vmatpush1.msra.mxu0 %v5816_v15  ;;  %7056 = vst [vmem:[#allocation40_spill] sm:$0xff] %v5830_v17  ;;  %2414 = vmatpush1.msra.mxu1 %v5830_v17  ;;  %v7057_v15 = vld [vmem:[#allocation63_spill] sm:$0xff] }
 0x78b   :  { %2342 = vmatprep.subr.mxu0 %v5822_v11  ;;  %2557 = vmatprep.subr.mxu1 %v5644_v57 }
 0x78c   :  { %2343 = vmatpush1.msra.mxu0 %v5826_v12 }
 0x78d   :  { %2486 = vmatprep.subr.mxu0 %v5642_v10 }
 0x7f4   :  { %v1785_v9 = vpop.f32.mrf.mxu0  ;;  %v1856_v11 = vpop.f32.mrf.mxu1 }
 0x7f5   :  { %v1786_v8 = vadd.f32 %v1785_v9, %v7057_v15  ;;  %v1857_v17 = vadd.f32 %v1856_v11, %v7060_v46  ;;  %v7067_v11 = vld [vmem:[#allocation51_spill] sm:$0xff] }
 0x7f6   :  { %v1787_v16 = vpop.f32.mrf.mxu0  ;;  %v1858_v48 = vpop.f32.mrf.mxu1 }
 0x7f7   :  { %v3923_v13 = vmul.f32 -1.442695, %v1786_v8  ;;  %v1788_v49 = vadd.f32 %v1787_v16, %v7058_v23  ;;  %v1859_v12 = vadd.f32 %v1858_v48, %v7059_v47 }
 0x7f9   :  { %4134 = vpow2.f32 %v3923_v13  ;;  %v3924_v56 = vmul.f32 -1.442695, %v1788_v49  ;;  %v3925_v45 = vmul.f32 -1.442695, %v1859_v12  ;;  %v7065_v12 = vld [vmem:[#allocation16_spill] sm:$0xff] }
 0x7fb   :  { %4136 = vpow2.f32 %v3924_v56 }
 0x7fc   :  { %4138 = vtanh.f32 %v1857_v17  ;;  %v7066_v17 = vld [vmem:[#allocation17_spill] sm:$0xff] }
 0x7fd   :  { %4140 = vpow2.f32 %v3925_v45  ;;  %v7064_v45 = vld [vmem:[#allocation48_spill] sm:$0xff] }
 0x806   :  { %v4135_v10 = vpop.eup %4134 }
 0x807   :  { %v1864_v44 = vadd.f32 1.0, %v4135_v10 }
 0x808   :  { %v4137_v57 = vpop.eup %4136 }
 0x809   :  { %4142 = vrcp.f32 %v1864_v44  ;;  %v1870_v15 = vadd.f32 1.0, %v4137_v57  ;;  %v4139_v8 = vpop.eup %4138  ;;  %v7062_v57 = vld [vmem:[#allocation49_spill] sm:$0xff]  ;;  %v7063_v44 = vld [vmem:[#allocation50_spill] sm:$0xff] }
 0x80a   :  { %v4141_v23 = vpop.eup %4140 }
 0x80b   :  { %4144 = vrcp.f32 %v1870_v15  ;;  %v1877_v9 = vadd.f32 1.0, %v4141_v23  ;;  %v7068_v15 = vld [vmem:[#allocation53_spill] sm:$0xff]  ;;  %v7070_v23 = vld [vmem:[#allocation52_spill] sm:$0xff] }
 0x80d   :  { %4146 = vrcp.f32 %v1877_v9  ;;  %v7074_v9 = vld [vmem:[#allocation57_spill] sm:$0xff] }
 0x816   :  { %v4143_v13 = vpop.eup %4142 }
 0x817   :  { %v1882_v16 = vmul.f32 %v4143_v13, %v4139_v8  ;;  %v7069_v8 = vld [vmem:[#allocation54_spill] sm:$0xff]  ;;  %v7071_v13 = vld [vmem:[#allocation19_spill] sm:$0xff] }
 0x818   :  { %v4145_v49 = vpop.eup %4144 }
 0x819   :  { %v1881_v56 = vmul.f32 %v4145_v49, %v5605_v29  ;;  %v7061_v29 = vld [vmem:[#allocation47_spill] sm:$0xff] }
 0x81a   :  { %v4147_v46 = vpop.eup %4146  ;;  %v7073_v49 = vld [vmem:[#allocation55_spill] sm:$0xff] }
 0x81b   :  { %v1883_v47 = vadd.f32 %v1882_v16, %v1881_v56  ;;  %v7072_v16 = vld [vmem:[#allocation20_spill] sm:$0xff]  ;;  %v7075_v56 = vld [vmem:[#allocation58_spill] sm:$0xff] }
 0x81d   :  { %4148 = vtanh.f32 %v1883_v47  ;;  %v7076_v47 = vld [vmem:[#allocation56_spill] sm:$0xff] }
 0x82a   :  { %v4149_v48 = vpop.eup %4148 }
 0x82b   :  { %v1885_v10 = vmul.f32 %v4149_v48, %v4147_v46  ;;  %v7077_v46 = vld [vmem:[#allocation42_spill] sm:$0xff]  ;;  %v7078_v48 = vld [vmem:[#allocation40_spill] sm:$0xff] }
 0x82d   :  { %2090 = vmatmul.mubr.f32.gmra.mxu0 %v1885_v10  ;;  %2203 = vmatmul.mubr.f32.gmra.mxu1 %v1885_v10  ;;  %v7079_v10 = vld [vmem:[#allocation38_spill] sm:$0xff] }
 0x82e   :  { %2376 = vmatprep.mubr.f32.mxu0 %v7024_v33  ;;  %2447 = vmatprep.mubr.f32.mxu1 %v7024_v33 }
 0x831   :  { %2377 = vmatmul.mubr.f32.vlgmr.msra.gmra.mxu0 %v7024_v33  ;;  %2448 = vmatmul.mubr.f32.vlgmr.msra.gmra.mxu1 %v7024_v33 }
 0x832   :  { %2487 = vmatpush1.msra.mxu0 %v5648_v2  ;;  %2558 = vmatpush1.msra.mxu1 %v5650_v28 }
 0x833   :  { %2488 = vmatprep.subr.mxu0 %v5654_v26  ;;  %2559 = vmatprep.subr.mxu1 %v5656_v52 }
 0x834   :  { %2489 = vmatpush1.msra.mxu0 %v5660_v53  ;;  %2560 = vmatpush1.msra.mxu1 %v5662_v51 }
 0x835   :  { %2490 = vmatprep.subr.mxu0 %v5666_v1  ;;  %2561 = vmatprep.subr.mxu1 %v5668_v55 }
 0x836   :  { %2491 = vmatpush1.msra.mxu0 %v5672_v32  ;;  %2562 = vmatpush1.msra.mxu1 %v5674_v0 }
 0x837   :  { %2492 = vmatprep.subr.mxu0 %v5678_v41  ;;  %2563 = vmatprep.subr.mxu1 %v5680_v62 }
 0x838   :  { %2493 = vmatpush1.msra.mxu0 %v5684_v60  ;;  %2564 = vmatpush1.msra.mxu1 %v5686_v59 }
 0x839   :  { %2494 = vmatprep.subr.mxu0 %v5690_v58  ;;  %2565 = vmatprep.subr.mxu1 %v5692_v6 }
 0x83a   :  { %2495 = vmatpush1.msra.mxu0 %v5696_v5  ;;  %2566 = vmatpush1.msra.mxu1 %v5698_v63 }
 0x83b   :  { %2496 = vmatprep.subr.mxu0 %v5702_v61  ;;  %2567 = vmatprep.subr.mxu1 %v5704_v14 }
 0x83c   :  { %2497 = vmatpush1.msra.mxu0 %v5708_v50  ;;  %2568 = vmatpush1.msra.mxu1 %v5710_v30 }
 0x83d   :  { %2498 = vmatprep.subr.mxu0 %v5714_v31  ;;  %2569 = vmatprep.subr.mxu1 %v5716_v34 }
 0x83e   :  { %2499 = vmatpush1.msra.mxu0 %v5720_v7  ;;  %2570 = vmatpush1.msra.mxu1 %v5722_v3 }
 0x83f   :  { %2500 = vmatprep.subr.mxu0 %v5726_v54  ;;  %2571 = vmatprep.subr.mxu1 %v5728_v18 }
 0x840   :  { %2501 = vmatpush1.msra.mxu0 %v5732_v19  ;;  %2572 = vmatpush1.msra.mxu1 %v5734_v20 }
 0x841   :  { %2502 = vmatprep.subr.mxu0 %v5738_v21  ;;  %2573 = vmatprep.subr.mxu1 %v5740_v22 }
 0x842   :  { %2503 = vmatpush1.msra.mxu0 %v5744_v24  ;;  %2574 = vmatpush1.msra.mxu1 %v5746_v25 }
 0x843   :  { %2504 = vmatprep.subr.mxu0 %v5750_v27  ;;  %2575 = vmatprep.subr.mxu1 %v5752_v4 }
 0x844   :  { %2505 = vmatpush1.msra.mxu0 %v5756_v35  ;;  %2576 = vmatpush1.msra.mxu1 %v5758_v36 }
 0x845   :  { %2506 = vmatprep.subr.mxu0 %v5762_v37  ;;  %2577 = vmatprep.subr.mxu1 %v5764_v38 }
 0x846   :  { %2507 = vmatpush1.msra.mxu0 %v5768_v39  ;;  %2578 = vmatpush1.msra.mxu1 %v5770_v40 }
 0x847   :  { %2508 = vmatprep.subr.mxu0 %v5774_v42  ;;  %2579 = vmatprep.subr.mxu1 %v5776_v43 }
 0x848   :  { %2509 = vmatpush1.msra.mxu0 %v7061_v29  ;;  %2580 = vmatpush1.msra.mxu1 %v7062_v57 }
 0x849   :  { %2510 = vmatprep.subr.mxu0 %v7063_v44  ;;  %2581 = vmatprep.subr.mxu1 %v7064_v45 }
 0x84a   :  { %2511 = vmatpush1.msra.mxu0 %v7065_v12  ;;  %2582 = vmatpush1.msra.mxu1 %v7066_v17 }
 0x84b   :  { %2512 = vmatprep.subr.mxu0 %v7067_v11  ;;  %2583 = vmatprep.subr.mxu1 %v7068_v15 }
 0x84c   :  { %2513 = vmatpush1.msra.mxu0 %v7069_v8  ;;  %2584 = vmatpush1.msra.mxu1 %v7070_v23 }
 0x84d   :  { %2514 = vmatprep.subr.mxu0 %v7071_v13  ;;  %2585 = vmatprep.subr.mxu1 %v7072_v16  ;;  %v7080_v13 = vld [vmem:[#allocation43_spill] sm:$0xff]  ;;  %v2049_v16 = vpop.f32.mrf.mxu0 }
 0x84e   :  { %2515 = vmatpush1.msra.mxu0 %v7073_v49  ;;  %2586 = vmatpush1.msra.mxu1 %v7074_v9  ;;  %v2162_v49 = vpop.f32.mrf.mxu1 }
 0x84f   :  { %2516 = vmatprep.subr.mxu0 %v7075_v56  ;;  %2587 = vmatprep.subr.mxu1 %v7076_v47  ;;  %v2051_v23 = vpop.f32.mrf.mxu0 }
 0x850   :  { %2517 = vmatpush1.msra.mxu0 %v7077_v46  ;;  %2550 = vmatprep.mubr.f32.mxu0 %v7024_v33  ;;  %v2164_v9 = vpop.f32.mrf.mxu1 }
 0x851   :  { %2588 = vmatpush1.msra.mxu1 %v7078_v48  ;;  %2621 = vmatprep.mubr.f32.mxu1 %v7024_v33  ;;  %v5911_v8 = vpop.f32.mrf.mxu0 }
 0x852   :  { %2660 = vmatprep.subr.mxu0 %v7079_v10  ;;  %2731 = vmatprep.subr.mxu1 %v7080_v13  ;;  %7081 = vst [vmem:[#allocation22_spill] sm:$0xff] %v5911_v8  ;;  %v5913_v56 = vpop.f32.mrf.mxu1 }
 0x853   :  { %7082 = vst [vmem:[#allocation23_spill] sm:$0xff] %v5913_v56  ;;  %v5915_v47 = vpop.f32.mrf.mxu0 }
 0x854   :  { %7083 = vst [vmem:[#allocation24_spill] sm:$0xff] %v5915_v47  ;;  %v5917_v46 = vpop.f32.mrf.mxu1 }
 0x855   :  { %7084 = vst [vmem:[#allocation25_spill] sm:$0xff] %v5917_v46  ;;  %v5919_v15 = vpop.f32.mrf.mxu0 }
 0x856   :  { %7085 = vst [vmem:[#allocation26_spill] sm:$0xff] %v5919_v15  ;;  %v5921_v48 = vpop.f32.mrf.mxu1 }
 0x857   :  { %7086 = vst [vmem:[#allocation27_spill] sm:$0xff] %v5921_v48  ;;  %v5923_v33 = vpop.f32.mrf.mxu0 }
 0x858   :  { %7087 = vst [vmem:[#allocation28_spill] sm:$0xff] %v5923_v33  ;;  %v5925_v10 = vpop.f32.mrf.mxu1 }
 0x859   :  { %7088 = vst [vmem:[#allocation29_spill] sm:$0xff] %v5925_v10  ;;  %v5927_v13 = vpop.f32.mrf.mxu0 }
 0x85a   :  { %7089 = vst [vmem:[#allocation30_spill] sm:$0xff] %v5927_v13  ;;  %v5929_v11 = vpop.f32.mrf.mxu1 }
 0x85b   :  { %7090 = vst [vmem:[#allocation31_spill] sm:$0xff] %v5929_v11  ;;  %v5931_v17 = vpop.f32.mrf.mxu0 }
 0x85c   :  { %7091 = vst [vmem:[#allocation32_spill] sm:$0xff] %v5931_v17  ;;  %v5933_v8 = vpop.f32.mrf.mxu1 }
 0x85d   :  { %7092 = vst [vmem:[#allocation33_spill] sm:$0xff] %v5933_v8  ;;  %v5935_v56 = vpop.f32.mrf.mxu0 }
 0x85e   :  { %7093 = vst [vmem:[#allocation34_spill] sm:$0xff] %v5935_v56  ;;  %v5937_v47 = vpop.f32.mrf.mxu1 }
 0x85f   :  { %7094 = vst [vmem:[#allocation35_spill] sm:$0xff] %v5937_v47  ;;  %v5939_v46 = vpop.f32.mrf.mxu0  ;;  %v1961_v47 = vld [vmem:[%s6634_s7] sm:$0xf] }
 0x860   :  { %7095 = vst [vmem:[#allocation36_spill] sm:$0xff] %v5939_v46  ;;  %v5941_v15 = vpop.f32.mrf.mxu1  ;;  %v7104_v46 = vld [vmem:[#allocation39_spill] sm:$0xff] }
 0x861   :  { %7096 = vst [vmem:[#allocation59_spill] sm:$0xff] %v5941_v15  ;;  %v5943_v48 = vpop.f32.mrf.mxu0  ;;  %v7105_v15 = vsub.s32 0, %v7104_v46 }
 0x862   :  { %7097 = vst [vmem:[#allocation61_spill] sm:$0xff] %v5943_v48  ;;  %v5945_v33 = vpop.f32.mrf.mxu1 }
 0x863   :  { %7098 = vst [vmem:[#allocation62_spill] sm:$0xff] %v5945_v33  ;;  %v5947_v10 = vpop.f32.mrf.mxu0  ;;  %v5962_v8 = vrot.slane %v1961_v47, %v7105_v15 }
 0x864   :  { %7099 = vst [vmem:[#allocation60_spill] sm:$0xff] %v5947_v10  ;;  %v5949_v13 = vpop.f32.mrf.mxu1 }
 0x865   :  { %7100 = vst [vmem:[#allocation67_spill] sm:$0xff] %v5949_v13  ;;  %v5951_v11 = vpop.f32.mrf.mxu0  ;;  %7106 = vst [vmem:[#allocation37_spill] sm:$0xff] %v5962_v8  ;;  %v7109_v13 = vsub.s32 1, %v7104_v46  ;;  %v2050_v12 = vadd.f32 %v2049_v16, %v5962_v8 }
 0x866   :  { %7101 = vst [vmem:[#allocation18_spill] sm:$0xff] %v5951_v11  ;;  %v5953_v17 = vpop.f32.mrf.mxu1 }
 0x867   :  { %7102 = vst [vmem:[#allocation21_spill] sm:$0xff] %v5953_v17  ;;  %v5958_v56 = vpop.f32.mrf.mxu0  ;;  %v5970_v10 = vrot.slane %v1961_v47, %v7109_v13  ;;  %v7113_v13 = vsub.s32 3, %v7104_v46 }
 0x868   :  { %7103 = vst [vmem:[#allocation41_spill] sm:$0xff] %v5958_v56  ;;  %v5964_v48 = vpop.f32.mrf.mxu1 }
 0x869   :  { %7107 = vst [vmem:[#allocation63_spill] sm:$0xff] %v5964_v48  ;;  %v2052_v56 = vadd.f32 %v2051_v23, %v5970_v10  ;;  %v5982_v42 = vrot.slane %v1961_v47, %v7113_v13 }
 0x86b   :  { %7114 = vst [vmem:[#allocation68_spill] sm:$0xff] %v5982_v42  ;;  %v2165_v16 = vadd.f32 %v2164_v9, %v5982_v42 }
 0x8ed   :  { %v5966_v33 = vpop.f32.mrf.mxu0  ;;  %v5972_v11 = vpop.f32.mrf.mxu1 }
 0x8ee   :  { %7108 = vst [vmem:[#allocation65_spill] sm:$0xff] %v5966_v33  ;;  %7110 = vst [vmem:[#allocation66_spill] sm:$0xff] %v5972_v11 }
 0x8ef   :  { %v5974_v17 = vpop.f32.mrf.mxu0  ;;  %v5978_v44 = vpop.f32.mrf.mxu1 }
 0x8f0   :  { %7111 = vst [vmem:[#allocation64_spill] sm:$0xff] %v5974_v17  ;;  %7112 = vst [vmem:[#allocation39_spill] sm:$0xff] %v5978_v44  ;;  %v7115_v17 = vsub.s32 2, %v7104_v46 }
 0x8f1   :  { %v2378_v45 = vpop.f32.mrf.mxu0  ;;  %v2449_v33 = vpop.f32.mrf.mxu1 }
 0x8f2   :  { %v2379_v15 = vadd.f32 %v2378_v45, %v2050_v12  ;;  %v5987_v23 = vrot.slane %v1961_v47, %v7115_v17 }
 0x8f3   :  { %v2380_v57 = vpop.f32.mrf.mxu0  ;;  %v2451_v11 = vpop.f32.mrf.mxu1 }
 0x8f4   :  { %v3926_v48 = vmul.f32 -1.442695, %v2379_v15  ;;  %v2381_v29 = vadd.f32 %v2380_v57, %v2052_v56  ;;  %v2452_v44 = vadd.f32 %v2451_v11, %v2165_v16  ;;  %v2163_v45 = vadd.f32 %v2162_v49, %v5987_v23  ;;  %v7117_v16 = vld [vmem:[#allocation44_spill] sm:$0xff] }
 0x8f6   :  { %4150 = vpow2.f32 %v3926_v48  ;;  %v3927_v43 = vmul.f32 -1.442695, %v2381_v29  ;;  %v3928_v12 = vmul.f32 -1.442695, %v2452_v44  ;;  %v2450_v56 = vadd.f32 %v2449_v33, %v2163_v45  ;;  %v7118_v45 = vld [vmem:[#allocation47_spill] sm:$0xff] }
 0x8f8   :  { %4152 = vpow2.f32 %v3927_v43 }
 0x8f9   :  { %4154 = vpow2.f32 %v3928_v12  ;;  %v7119_v12 = vld [vmem:[#allocation49_spill] sm:$0xff] }
 0x903   :  { %v4151_v57 = vpop.eup %4150 }
 0x904   :  { %v2457_v48 = vadd.f32 1.0, %v4151_v57  ;;  %v7120_v57 = vld [vmem:[#allocation50_spill] sm:$0xff] }
 0x905   :  { %v4153_v29 = vpop.eup %4152 }
 0x906   :  { %4156 = vrcp.f32 %v2457_v48  ;;  %v2463_v15 = vadd.f32 1.0, %v4153_v29  ;;  %v4155_v43 = vpop.eup %4154  ;;  %v7122_v48 = vld [vmem:[#allocation16_spill] sm:$0xff]  ;;  %v7123_v29 = vld [vmem:[#allocation17_spill] sm:$0xff] }
 0x907   :  { %4158 = vtanh.f32 %v2450_v56  ;;  %v2470_v46 = vadd.f32 1.0, %v4155_v43  ;;  %v7121_v56 = vld [vmem:[#allocation48_spill] sm:$0xff]  ;;  %v7125_v43 = vld [vmem:[#allocation53_spill] sm:$0xff] }
 0x908   :  { %4160 = vrcp.f32 %v2463_v15  ;;  %v7124_v15 = vld [vmem:[#allocation51_spill] sm:$0xff] }
 0x909   :  { %4162 = vrcp.f32 %v2470_v46  ;;  %v7128_v46 = vld [vmem:[#allocation19_spill] sm:$0xff] }
 0x913   :  { %v4157_v13 = vpop.eup %4156 }
 0x914   :  { %v4159_v9 = vpop.eup %4158 }
 0x915   :  { %v4161_v42 = vpop.eup %4160  ;;  %v2475_v47 = vmul.f32 %v4159_v9, %v4157_v13  ;;  %v7126_v13 = vld [vmem:[#allocation54_spill] sm:$0xff]  ;;  %v7127_v9 = vld [vmem:[#allocation52_spill] sm:$0xff] }
 0x916   :  { %v2474_v17 = vmul.f32 0.0, %v4161_v42  ;;  %v4163_v33 = vpop.eup %4162  ;;  %v7116_v42 = vld [vmem:[#allocation46_spill] sm:$0xff] }
 0x918   :  { %v5990_v11 = vadd.f32 %v2475_v47, %v2474_v17  ;;  %v7129_v17 = vld [vmem:[#allocation20_spill] sm:$0xff]  ;;  %v7130_v47 = vld [vmem:[#allocation55_spill] sm:$0xff] }
 0x91a   :  { %4164 = vtanh.f32 %v5990_v11 }
 0x927   :  { %v4165_v44 = vpop.eup %4164 }
 0x928   :  { %v2478_v49 = vmul.f32 %v4165_v44, %v4163_v33  ;;  %v7131_v33 = vld [vmem:[#allocation57_spill] sm:$0xff]  ;;  %v7132_v44 = vld [vmem:[#allocation58_spill] sm:$0xff] }
 0x92a   :  { %2551 = vmatmul.mubr.f32.vlgmr.msra.gmra.mxu0 %v2478_v49  ;;  %2622 = vmatmul.mubr.f32.vlgmr.msra.gmra.mxu1 %v2478_v49  ;;  %v7133_v49 = vld [vmem:[#allocation56_spill] sm:$0xff] }
 0x92b   :  { %2661 = vmatpush1.msra.mxu0 %v5648_v2  ;;  %2732 = vmatpush1.msra.mxu1 %v5650_v28 }
 0x92c   :  { %2662 = vmatprep.subr.mxu0 %v5654_v26  ;;  %2733 = vmatprep.subr.mxu1 %v5656_v52 }
 0x92d   :  { %2663 = vmatpush1.msra.mxu0 %v5660_v53  ;;  %2734 = vmatpush1.msra.mxu1 %v5662_v51 }
 0x92e   :  { %2664 = vmatprep.subr.mxu0 %v5666_v1  ;;  %2735 = vmatprep.subr.mxu1 %v5668_v55 }
 0x92f   :  { %2665 = vmatpush1.msra.mxu0 %v5672_v32  ;;  %2736 = vmatpush1.msra.mxu1 %v5674_v0 }
 0x930   :  { %2666 = vmatprep.subr.mxu0 %v5678_v41  ;;  %2737 = vmatprep.subr.mxu1 %v5680_v62 }
 0x931   :  { %2667 = vmatpush1.msra.mxu0 %v5684_v60  ;;  %2738 = vmatpush1.msra.mxu1 %v5686_v59 }
 0x932   :  { %2668 = vmatprep.subr.mxu0 %v5690_v58  ;;  %2739 = vmatprep.subr.mxu1 %v5692_v6 }
 0x933   :  { %2669 = vmatpush1.msra.mxu0 %v5696_v5  ;;  %2740 = vmatpush1.msra.mxu1 %v5698_v63 }
 0x934   :  { %2670 = vmatprep.subr.mxu0 %v5702_v61  ;;  %2741 = vmatprep.subr.mxu1 %v5704_v14 }
 0x935   :  { %2671 = vmatpush1.msra.mxu0 %v5708_v50  ;;  %2742 = vmatpush1.msra.mxu1 %v5710_v30 }
 0x936   :  { %2672 = vmatprep.subr.mxu0 %v5714_v31  ;;  %2743 = vmatprep.subr.mxu1 %v5716_v34 }
 0x937   :  { %2673 = vmatpush1.msra.mxu0 %v5720_v7  ;;  %2744 = vmatpush1.msra.mxu1 %v5722_v3 }
 0x938   :  { %2674 = vmatprep.subr.mxu0 %v5726_v54  ;;  %2745 = vmatprep.subr.mxu1 %v5728_v18 }
 0x939   :  { %2675 = vmatpush1.msra.mxu0 %v5732_v19  ;;  %2746 = vmatpush1.msra.mxu1 %v5734_v20 }
 0x93a   :  { %2676 = vmatprep.subr.mxu0 %v5738_v21  ;;  %2747 = vmatprep.subr.mxu1 %v5740_v22 }
 0x93b   :  { %2677 = vmatpush1.msra.mxu0 %v5744_v24  ;;  %2748 = vmatpush1.msra.mxu1 %v5746_v25 }
 0x93c   :  { %2678 = vmatprep.subr.mxu0 %v5750_v27  ;;  %2749 = vmatprep.subr.mxu1 %v5752_v4 }
 0x93d   :  { %2679 = vmatpush1.msra.mxu0 %v5756_v35  ;;  %2750 = vmatpush1.msra.mxu1 %v5758_v36 }
 0x93e   :  { %2680 = vmatprep.subr.mxu0 %v5762_v37  ;;  %2751 = vmatprep.subr.mxu1 %v5764_v38 }
 0x93f   :  { %2681 = vmatpush1.msra.mxu0 %v5768_v39  ;;  %2752 = vmatpush1.msra.mxu1 %v5770_v40 }
 0x940   :  { %2682 = vmatprep.subr.mxu0 %v7116_v42  ;;  %2753 = vmatprep.subr.mxu1 %v7117_v16  ;;  %v7143_v16 = vld [vmem:[#allocation23_spill] sm:$0xff] }
 0x941   :  { %2683 = vmatpush1.msra.mxu0 %v7118_v45  ;;  %2754 = vmatpush1.msra.mxu1 %v7119_v12  ;;  %v7141_v12 = vld [vmem:[#allocation68_spill] sm:$0xff] }
 0x942   :  { %2684 = vmatprep.subr.mxu0 %v7120_v57  ;;  %2755 = vmatprep.subr.mxu1 %v7121_v56 }
 0x943   :  { %2685 = vmatpush1.msra.mxu0 %v7122_v48  ;;  %2756 = vmatpush1.msra.mxu1 %v7123_v29  ;;  %v7134_v29 = vld [vmem:[#allocation42_spill] sm:$0xff] }
 0x944   :  { %2686 = vmatprep.subr.mxu0 %v7124_v15  ;;  %2757 = vmatprep.subr.mxu1 %v7125_v43  ;;  %v7135_v15 = vmov 0.0   ;;  %v7136_v43 = vld [vmem:[#allocation40_spill] sm:$0xff] }
 0x945   :  { %2687 = vmatpush1.msra.mxu0 %v7126_v13  ;;  %2758 = vmatpush1.msra.mxu1 %v7127_v9  ;;  %v7137_v9 = vld [vmem:[#allocation38_spill] sm:$0xff] }
 0x946   :  { %2688 = vmatprep.subr.mxu0 %v7128_v46  ;;  %2759 = vmatprep.subr.mxu1 %v7129_v17  ;;  %v7138_v46 = vld [vmem:[#allocation43_spill] sm:$0xff] }
 0x947   :  { %2689 = vmatpush1.msra.mxu0 %v7130_v47  ;;  %2760 = vmatpush1.msra.mxu1 %v7131_v33  ;;  %v7139_v47 = vld [vmem:[#allocation22_spill] sm:$0xff] }
 0x948   :  { %2690 = vmatprep.subr.mxu0 %v7132_v44  ;;  %2761 = vmatprep.subr.mxu1 %v7133_v49  ;;  %v2056_v17 = vadd.f32 %v7139_v47, %v5962_v8  ;;  %v7140_v44 = vld [vmem:[#allocation24_spill] sm:$0xff]  ;;  %v2169_v47 = vadd.f32 %v7143_v16, %v5987_v23 }
 0x949   :  { %2691 = vmatpush1.msra.mxu0 %v7134_v29  ;;  %2724 = vmatprep.mubr.f32.mxu0 %v7135_v15  ;;  %v2058_v13 = vadd.f32 %v7140_v44, %v5970_v10 }
 0x94a   :  { %2762 = vmatpush1.msra.mxu1 %v7136_v43  ;;  %2795 = vmatprep.mubr.f32.mxu1 %v7135_v15 }
 0x94b   :  { %2834 = vmatprep.subr.mxu0 %v7137_v9  ;;  %2905 = vmatprep.subr.mxu1 %v7138_v46  ;;  %v7142_v9 = vld [vmem:[#allocation25_spill] sm:$0xff] }
 0x94c   :  { %v2171_v45 = vadd.f32 %v7142_v9, %v7141_v12 }
 0x9ea   :  { %v2552_v33 = vpop.f32.mrf.mxu0  ;;  %v2623_v57 = vpop.f32.mrf.mxu1 }
 0x9eb   :  { %v2553_v49 = vadd.f32 %v2552_v33, %v2056_v17  ;;  %v2624_v8 = vadd.f32 %v2623_v57, %v2169_v47  ;;  %v7156_v57 = vld [vmem:[#allocation52_spill] sm:$0xff]  ;;  %v7159_v47 = vld [vmem:[#allocation55_spill] sm:$0xff] }
 0x9ec   :  { %v2554_v48 = vpop.f32.mrf.mxu0  ;;  %v2625_v15 = vpop.f32.mrf.mxu1 }
 0x9ed   :  { %v3929_v29 = vmul.f32 -1.442695, %v2553_v49  ;;  %v2555_v56 = vadd.f32 %v2554_v48, %v2058_v13  ;;  %v2626_v46 = vadd.f32 %v2625_v15, %v2171_v45  ;;  %v7158_v49 = vld [vmem:[#allocation20_spill] sm:$0xff] }
 0x9ef   :  { %4166 = vpow2.f32 %v3929_v29  ;;  %v3930_v43 = vmul.f32 -1.442695, %v2555_v56  ;;  %v3931_v42 = vmul.f32 -1.442695, %v2626_v46  ;;  %v7157_v46 = vld [vmem:[#allocation19_spill] sm:$0xff] }
 0x9f1   :  { %4168 = vpow2.f32 %v3930_v43 }
 0x9f2   :  { %4170 = vtanh.f32 %v2624_v8 }
 0x9f3   :  { %4172 = vpow2.f32 %v3931_v42  ;;  %v7155_v42 = vld [vmem:[#allocation54_spill] sm:$0xff] }
 0x9fc   :  { %v4167_v40 = vpop.eup %4166 }
 0x9fd   :  { %v2631_v44 = vadd.f32 1.0, %v4167_v40 }
 0x9fe   :  { %v4169_v17 = vpop.eup %4168 }
 0x9ff   :  { %4174 = vrcp.f32 %v2631_v44  ;;  %v2637_v48 = vadd.f32 1.0, %v4169_v17  ;;  %v4171_v56 = vpop.eup %4170  ;;  %v7160_v44 = vld [vmem:[#allocation57_spill] sm:$0xff]  ;;  %v7161_v17 = vld [vmem:[#allocation58_spill] sm:$0xff] }
 0xa00   :  { %v4173_v29 = vpop.eup %4172 }
 0xa01   :  { %4176 = vrcp.f32 %v2637_v48  ;;  %v2644_v9 = vadd.f32 1.0, %v4173_v29  ;;  %v7162_v48 = vld [vmem:[#allocation56_spill] sm:$0xff]  ;;  %v7164_v29 = vmov 0.0  }
 0xa03   :  { %4178 = vrcp.f32 %v2644_v9  ;;  %v7168_v9 = vld [vmem:[#allocation37_spill] sm:$0xff] }
 0xa0c   :  { %v4175_v43 = vpop.eup %4174 }
 0xa0d   :  { %v2649_v13 = vmul.f32 %v4175_v43, %v4171_v56  ;;  %v7163_v56 = vld [vmem:[#allocation42_spill] sm:$0xff]  ;;  %v7165_v43 = vld [vmem:[#allocation40_spill] sm:$0xff] }
 0xa0e   :  { %v4177_v33 = vpop.eup %4176 }
 0xa0f   :  { %v2648_v45 = vmul.f32 %v4177_v33, %v5990_v11  ;;  %v7154_v11 = vld [vmem:[#allocation53_spill] sm:$0xff]  ;;  %v7167_v33 = vld [vmem:[#allocation43_spill] sm:$0xff] }
 0xa10   :  { %v4179_v40 = vpop.eup %4178 }
 0xa11   :  { %v6068_v15 = vadd.f32 %v2649_v13, %v2648_v45  ;;  %v7166_v13 = vld [vmem:[#allocation38_spill] sm:$0xff] }
 0xa12   :  { %v7169_v45 = vld [vmem:[#allocation26_spill] sm:$0xff] }
 0xa13   :  { %4180 = vtanh.f32 %v6068_v15 }
 0xa20   :  { %v4181_v8 = vpop.eup %4180 }
 0xa21   :  { %v2652_v16 = vmul.f32 %v4181_v8, %v4179_v40  ;;  %v2062_v40 = vadd.f32 %v7169_v45, %v7168_v9 }
 0xa23   :  { %2725 = vmatmul.mubr.f32.vlgmr.msra.gmra.mxu0 %v2652_v16  ;;  %2796 = vmatmul.mubr.f32.vlgmr.msra.gmra.mxu1 %v2652_v16  ;;  %v7170_v16 = vld [vmem:[#allocation28_spill] sm:$0xff] }
 0xa24   :  { %2835 = vmatpush1.msra.mxu0 %v5648_v2  ;;  %2906 = vmatpush1.msra.mxu1 %v5650_v28  ;;  %v7144_v2 = vld [vmem:[#allocation45_spill] sm:$0xff]  ;;  %v7145_v28 = vld [vmem:[#allocation46_spill] sm:$0xff] }
 0xa25   :  { %2836 = vmatprep.subr.mxu0 %v5654_v26  ;;  %2907 = vmatprep.subr.mxu1 %v5656_v52  ;;  %v7146_v26 = vld [vmem:[#allocation44_spill] sm:$0xff]  ;;  %v7147_v52 = vld [vmem:[#allocation47_spill] sm:$0xff] }
 0xa26   :  { %2837 = vmatpush1.msra.mxu0 %v5660_v53  ;;  %2908 = vmatpush1.msra.mxu1 %v5662_v51  ;;  %v7148_v53 = vld [vmem:[#allocation49_spill] sm:$0xff]  ;;  %v7149_v51 = vld [vmem:[#allocation50_spill] sm:$0xff] }
 0xa27   :  { %2838 = vmatprep.subr.mxu0 %v5666_v1  ;;  %2909 = vmatprep.subr.mxu1 %v5668_v55  ;;  %v7150_v1 = vld [vmem:[#allocation48_spill] sm:$0xff] }
 0xa28   :  { %2839 = vmatpush1.msra.mxu0 %v5672_v32  ;;  %2910 = vmatpush1.msra.mxu1 %v5674_v0  ;;  %v7151_v55 = vld [vmem:[#allocation16_spill] sm:$0xff]  ;;  %v7152_v32 = vld [vmem:[#allocation17_spill] sm:$0xff]  ;;  %v7153_v0 = vld [vmem:[#allocation51_spill] sm:$0xff] }
 0xa29   :  { %2840 = vmatprep.subr.mxu0 %v5678_v41  ;;  %2911 = vmatprep.subr.mxu1 %v5680_v62 }
 0xa2a   :  { %2841 = vmatpush1.msra.mxu0 %v5684_v60  ;;  %2912 = vmatpush1.msra.mxu1 %v5686_v59 }
 0xa2b   :  { %2842 = vmatprep.subr.mxu0 %v5690_v58  ;;  %2913 = vmatprep.subr.mxu1 %v5692_v6 }
 0xa2c   :  { %2843 = vmatpush1.msra.mxu0 %v5696_v5  ;;  %2914 = vmatpush1.msra.mxu1 %v5698_v63 }
 0xa2d   :  { %2844 = vmatprep.subr.mxu0 %v5702_v61  ;;  %2915 = vmatprep.subr.mxu1 %v5704_v14 }
 0xa2e   :  { %2845 = vmatpush1.msra.mxu0 %v5708_v50  ;;  %2916 = vmatpush1.msra.mxu1 %v5710_v30 }
 0xa2f   :  { %2846 = vmatprep.subr.mxu0 %v5714_v31  ;;  %2917 = vmatprep.subr.mxu1 %v5716_v34 }
 0xa30   :  { %2847 = vmatpush1.msra.mxu0 %v5720_v7  ;;  %2918 = vmatpush1.msra.mxu1 %v5722_v3 }
 0xa31   :  { %2848 = vmatprep.subr.mxu0 %v5726_v54  ;;  %2919 = vmatprep.subr.mxu1 %v5728_v18 }
 0xa32   :  { %2849 = vmatpush1.msra.mxu0 %v5732_v19  ;;  %2920 = vmatpush1.msra.mxu1 %v5734_v20 }
 0xa33   :  { %2850 = vmatprep.subr.mxu0 %v5738_v21  ;;  %2921 = vmatprep.subr.mxu1 %v5740_v22 }
 0xa34   :  { %2851 = vmatpush1.msra.mxu0 %v5744_v24  ;;  %2922 = vmatpush1.msra.mxu1 %v5746_v25 }
 0xa35   :  { %2852 = vmatprep.subr.mxu0 %v5750_v27  ;;  %2923 = vmatprep.subr.mxu1 %v5752_v4 }
 0xa36   :  { %2853 = vmatpush1.msra.mxu0 %v5756_v35  ;;  %2924 = vmatpush1.msra.mxu1 %v5758_v36 }
 0xa37   :  { %2854 = vmatprep.subr.mxu0 %v5762_v37  ;;  %2925 = vmatprep.subr.mxu1 %v5764_v38 }
 0xa38   :  { %2855 = vmatpush1.msra.mxu0 %v5768_v39  ;;  %2926 = vmatpush1.msra.mxu1 %v7144_v2 }
 0xa39   :  { %2856 = vmatprep.subr.mxu0 %v7145_v28  ;;  %2927 = vmatprep.subr.mxu1 %v7146_v26 }
 0xa3a   :  { %2857 = vmatpush1.msra.mxu0 %v7147_v52  ;;  %2928 = vmatpush1.msra.mxu1 %v7148_v53 }
 0xa3b   :  { %2858 = vmatprep.subr.mxu0 %v7149_v51  ;;  %2929 = vmatprep.subr.mxu1 %v7150_v1 }
 0xa3c   :  { %2859 = vmatpush1.msra.mxu0 %v7151_v55  ;;  %2930 = vmatpush1.msra.mxu1 %v7152_v32 }
 0xa3d   :  { %2860 = vmatprep.subr.mxu0 %v7153_v0  ;;  %2931 = vmatprep.subr.mxu1 %v7154_v11 }
 0xa3e   :  { %2861 = vmatpush1.msra.mxu0 %v7155_v42  ;;  %2932 = vmatpush1.msra.mxu1 %v7156_v57  ;;  %v7172_v57 = vld [vmem:[#allocation27_spill] sm:$0xff] }
 0xa3f   :  { %2862 = vmatprep.subr.mxu0 %v7157_v46  ;;  %2933 = vmatprep.subr.mxu1 %v7158_v49  ;;  %v2175_v45 = vadd.f32 %v7172_v57, %v5987_v23 }
 0xa40   :  { %2863 = vmatpush1.msra.mxu0 %v7159_v47  ;;  %2934 = vmatpush1.msra.mxu1 %v7160_v44 }
 0xa41   :  { %2864 = vmatprep.subr.mxu0 %v7161_v17  ;;  %2935 = vmatprep.subr.mxu1 %v7162_v48  ;;  %v2064_v17 = vadd.f32 %v7170_v16, %v5970_v10 }
 0xa42   :  { %2865 = vmatpush1.msra.mxu0 %v7163_v56  ;;  %2898 = vmatprep.mubr.f32.mxu0 %v7164_v29 }
 0xa43   :  { %2936 = vmatpush1.msra.mxu1 %v7165_v43  ;;  %2969 = vmatprep.mubr.f32.mxu1 %v7164_v29 }
 0xa44   :  { %3008 = vmatprep.subr.mxu0 %v7166_v13  ;;  %3079 = vmatprep.subr.mxu1 %v7167_v33  ;;  %v7171_v13 = vld [vmem:[#allocation29_spill] sm:$0xff] }
 0xa45   :  { %v2177_v46 = vadd.f32 %v7171_v13, %v7141_v12  ;;  %v6155_v13 = vld [vmem:[#allocation10 + $0x1c8] sm:$0xff] }
 0xae3   :  { %v2726_v8 = vpop.f32.mrf.mxu0  ;;  %v2797_v49 = vpop.f32.mrf.mxu1 }
 0xae4   :  { %v2727_v48 = vadd.f32 %v2726_v8, %v2062_v40  ;;  %v2798_v9 = vadd.f32 %v2797_v49, %v2175_v45  ;;  %v6164_v45 = vld [vmem:[#allocation10 + $0x1d0] sm:$0xff] }
 0xae5   :  { %v2728_v44 = vpop.f32.mrf.mxu0  ;;  %v2799_v29 = vpop.f32.mrf.mxu1 }
 0xae6   :  { %v3932_v56 = vmul.f32 -1.442695, %v2727_v48  ;;  %v2729_v47 = vadd.f32 %v2728_v44, %v2064_v17  ;;  %v2800_v33 = vadd.f32 %v2799_v29, %v2177_v46 }
 0xae8   :  { %4182 = vpow2.f32 %v3932_v56  ;;  %v3933_v43 = vmul.f32 -1.442695, %v2729_v47  ;;  %v3934_v42 = vmul.f32 -1.442695, %v2800_v33  ;;  %v6161_v33 = vld [vmem:[#allocation10 + $0x1c0] sm:$0xff] }
 0xaea   :  { %4184 = vpow2.f32 %v3933_v43 }
 0xaeb   :  { %4186 = vtanh.f32 %v2798_v9  ;;  %v6152_v9 = vld [vmem:[#allocation10 + $0x1f0] sm:$0xff] }
 0xaec   :  { %4188 = vpow2.f32 %v3934_v42  ;;  %v6149_v42 = vld [vmem:[#allocation10 + $0x1e0] sm:$0xff] }
 0xaf5   :  { %v4183_v11 = vpop.eup %4182 }
 0xaf6   :  { %v2805_v16 = vadd.f32 1.0, %v4183_v11 }
 0xaf7   :  { %v4185_v40 = vpop.eup %4184 }
 0xaf8   :  { %4190 = vrcp.f32 %v2805_v16  ;;  %v2811_v44 = vadd.f32 1.0, %v4185_v40  ;;  %v4187_v47 = vpop.eup %4186  ;;  %v6167_v16 = vld [vmem:[#allocation10 + $0x1a8] sm:$0xff]  ;;  %v6170_v40 = vld [vmem:[#allocation10 + $0x1b8] sm:$0xff] }
 0xaf9   :  { %v4189_v17 = vpop.eup %4188 }
 0xafa   :  { %4192 = vrcp.f32 %v2811_v44  ;;  %v2818_v8 = vadd.f32 1.0, %v4189_v17  ;;  %v6173_v44 = vld [vmem:[#allocation10 + $0x1a0] sm:$0xff] }
 0xafc   :  { %4194 = vrcp.f32 %v2818_v8 }
 0xb05   :  { %v4191_v48 = vpop.eup %4190 }
 0xb06   :  { %v2823_v56 = vmul.f32 %v4191_v48, %v4187_v47  ;;  %v6176_v47 = vld [vmem:[#allocation10 + $0x1b0] sm:$0xff] }
 0xb07   :  { %v4193_v43 = vpop.eup %4192 }
 0xb08   :  { %v2822_v46 = vmul.f32 %v4193_v43, %v6068_v15  ;;  %v6158_v15 = vld [vmem:[#allocation10 + $0x1d8] sm:$0xff] }
 0xb09   :  { %v4195_v11 = vpop.eup %4194 }
 0xb0a   :  { %v6146_v29 = vadd.f32 %v2823_v56, %v2822_v46 }
 0xb0c   :  { %4196 = vtanh.f32 %v6146_v29 }
 0xb19   :  { %v4197_v57 = vpop.eup %4196 }
 0xb1a   :  { %v2826_v49 = vmul.f32 %v4197_v57, %v4195_v11 }
 0xb1c   :  { %2899 = vmatmul.mubr.f32.vlgmr.msra.gmra.mxu0 %v2826_v49  ;;  %2970 = vmatmul.mubr.f32.vlgmr.msra.gmra.mxu1 %v2826_v49  ;;  %v6264_v49 = vld [vmem:[#allocation10 + $0x198] sm:$0xff] }
 0xb1d   :  { %3009 = vmatpush1.msra.mxu0 %v6149_v42  ;;  %3080 = vmatpush1.msra.mxu1 %v6152_v9 }
 0xb1e   :  { %3010 = vmatprep.subr.mxu0 %v6155_v13  ;;  %3081 = vmatprep.subr.mxu1 %v6158_v15 }
 0xb1f   :  { %3011 = vmatpush1.msra.mxu0 %v6161_v33  ;;  %3082 = vmatpush1.msra.mxu1 %v6164_v45 }
 0xb20   :  { %3012 = vmatprep.subr.mxu0 %v6167_v16  ;;  %3083 = vmatprep.subr.mxu1 %v6170_v40 }
 0xb21   :  { %3013 = vmatpush1.msra.mxu0 %v6173_v44  ;;  %3084 = vmatpush1.msra.mxu1 %v6176_v47 }
 0xb22   :  { %3014 = vmatprep.subr.mxu0 %v5678_v41  ;;  %3085 = vmatprep.subr.mxu1 %v5680_v62  ;;  %v7173_v41 = vld [vmem:[#allocation53_spill] sm:$0xff]  ;;  %v7174_v62 = vld [vmem:[#allocation54_spill] sm:$0xff] }
 0xb23   :  { %3015 = vmatpush1.msra.mxu0 %v5684_v60  ;;  %3086 = vmatpush1.msra.mxu1 %v5686_v59  ;;  %v7175_v60 = vld [vmem:[#allocation52_spill] sm:$0xff]  ;;  %v7176_v59 = vld [vmem:[#allocation19_spill] sm:$0xff] }
 0xb24   :  { %3016 = vmatprep.subr.mxu0 %v5690_v58  ;;  %3087 = vmatprep.subr.mxu1 %v5692_v6  ;;  %v7177_v58 = vld [vmem:[#allocation20_spill] sm:$0xff]  ;;  %v7178_v6 = vld [vmem:[#allocation55_spill] sm:$0xff] }
 0xb25   :  { %3017 = vmatpush1.msra.mxu0 %v5696_v5  ;;  %3088 = vmatpush1.msra.mxu1 %v5698_v63  ;;  %v7179_v5 = vld [vmem:[#allocation57_spill] sm:$0xff]  ;;  %v7180_v63 = vld [vmem:[#allocation58_spill] sm:$0xff] }
 0xb26   :  { %3018 = vmatprep.subr.mxu0 %v5702_v61  ;;  %3089 = vmatprep.subr.mxu1 %v5704_v14  ;;  %v7181_v61 = vld [vmem:[#allocation56_spill] sm:$0xff]  ;;  %v7182_v14 = vld [vmem:[#allocation42_spill] sm:$0xff] }
 0xb27   :  { %3019 = vmatpush1.msra.mxu0 %v5708_v50  ;;  %3090 = vmatpush1.msra.mxu1 %v5710_v30  ;;  %v7183_v50 = vmov 0.0   ;;  %v7184_v30 = vld [vmem:[#allocation40_spill] sm:$0xff] }
 0xb28   :  { %3020 = vmatprep.subr.mxu0 %v5714_v31  ;;  %3091 = vmatprep.subr.mxu1 %v5716_v34  ;;  %v6233_v31 = vld [vmem:[#allocation10 + $0x1e8] sm:$0xff]  ;;  %v6236_v34 = vld [vmem:[#allocation10 + $0x1f8] sm:$0xff] }
 0xb29   :  { %3021 = vmatpush1.msra.mxu0 %v5720_v7  ;;  %3092 = vmatpush1.msra.mxu1 %v5722_v3  ;;  %7185 = vst [vmem:[#allocation22_spill] sm:$0xff] %v6233_v31  ;;  %7186 = vst [vmem:[#allocation24_spill] sm:$0xff] %v6236_v34  ;;  %v7187_v7 = vld [vmem:[#allocation37_spill] sm:$0xff]  ;;  %v7188_v3 = vld [vmem:[#allocation30_spill] sm:$0xff] }
 0xb2a   :  { %3022 = vmatprep.subr.mxu0 %v5726_v54  ;;  %3093 = vmatprep.subr.mxu1 %v5728_v18  ;;  %v2068_v54 = vadd.f32 %v7188_v3, %v7187_v7  ;;  %v6300_v3 = vld [vmem:[#allocation10 + $0x138] sm:$0xff] }
 0xb2b   :  { %3023 = vmatpush1.msra.mxu0 %v5732_v19  ;;  %3094 = vmatpush1.msra.mxu1 %v5734_v20  ;;  %v7189_v19 = vld [vmem:[#allocation32_spill] sm:$0xff] }
 0xb2c   :  { %3024 = vmatprep.subr.mxu0 %v5738_v21  ;;  %3095 = vmatprep.subr.mxu1 %v5740_v22  ;;  %v2070_v20 = vadd.f32 %v7189_v19, %v5970_v10  ;;  %v6309_v19 = vld [vmem:[#allocation10 + $0x108] sm:$0xff] }
 0xb2d   :  { %3025 = vmatpush1.msra.mxu0 %v5744_v24  ;;  %3096 = vmatpush1.msra.mxu1 %v5746_v25 }
 0xb2e   :  { %3026 = vmatprep.subr.mxu0 %v5750_v27  ;;  %3097 = vmatprep.subr.mxu1 %v5752_v4 }
 0xb2f   :  { %3027 = vmatpush1.msra.mxu0 %v5756_v35  ;;  %3098 = vmatpush1.msra.mxu1 %v5758_v36  ;;  %v7190_v36 = vld [vmem:[#allocation33_spill] sm:$0xff] }
 0xb30   :  { %3028 = vmatprep.subr.mxu0 %v5762_v37  ;;  %3099 = vmatprep.subr.mxu1 %v5764_v38  ;;  %v2183_v37 = vadd.f32 %v7190_v36, %v7141_v12  ;;  %v6336_v36 = vld [vmem:[#allocation10 + $0xd8] sm:$0xff] }
 0xb31   :  { %3029 = vmatpush1.msra.mxu0 %v5768_v39  ;;  %3100 = vmatpush1.msra.mxu1 %v7144_v2  ;;  %v7191_v39 = vld [vmem:[#allocation31_spill] sm:$0xff] }
 0xb32   :  { %3030 = vmatprep.subr.mxu0 %v7145_v28  ;;  %3101 = vmatprep.subr.mxu1 %v7146_v26  ;;  %v2181_v2 = vadd.f32 %v7191_v39, %v5987_v23  ;;  %v6345_v39 = vld [vmem:[#allocation10 + $0xa8] sm:$0xff] }
 0xb33   :  { %3031 = vmatpush1.msra.mxu0 %v7147_v52  ;;  %3102 = vmatpush1.msra.mxu1 %v7148_v53 }
 0xb34   :  { %3032 = vmatprep.subr.mxu0 %v7149_v51  ;;  %3103 = vmatprep.subr.mxu1 %v7150_v1 }
 0xb35   :  { %3033 = vmatpush1.msra.mxu0 %v7151_v55  ;;  %3104 = vmatpush1.msra.mxu1 %v7152_v32 }
 0xb36   :  { %3034 = vmatprep.subr.mxu0 %v7153_v0  ;;  %3105 = vmatprep.subr.mxu1 %v7173_v41  ;;  %v6267_v41 = vld [vmem:[#allocation10 + $0x180] sm:$0xff] }
 0xb37   :  { %3035 = vmatpush1.msra.mxu0 %v7174_v62  ;;  %3106 = vmatpush1.msra.mxu1 %v7175_v60  ;;  %v6270_v62 = vld [vmem:[#allocation10 + $0x190] sm:$0xff]  ;;  %v6273_v60 = vld [vmem:[#allocation10 + $0x168] sm:$0xff] }
 0xb38   :  { %3036 = vmatprep.subr.mxu0 %v7176_v59  ;;  %3107 = vmatprep.subr.mxu1 %v7177_v58  ;;  %v6276_v59 = vld [vmem:[#allocation10 + $0x178] sm:$0xff]  ;;  %v6279_v58 = vld [vmem:[#allocation10 + $0x160] sm:$0xff] }
 0xb39   :  { %3037 = vmatpush1.msra.mxu0 %v7178_v6  ;;  %3108 = vmatpush1.msra.mxu1 %v7179_v5  ;;  %v6282_v6 = vld [vmem:[#allocation10 + $0x170] sm:$0xff]  ;;  %v6285_v5 = vld [vmem:[#allocation10 + $0x148] sm:$0xff] }
 0xb3a   :  { %3038 = vmatprep.subr.mxu0 %v7180_v63  ;;  %3109 = vmatprep.subr.mxu1 %v7181_v61  ;;  %v6288_v63 = vld [vmem:[#allocation10 + $0x158] sm:$0xff]  ;;  %v6291_v61 = vld [vmem:[#allocation10 + $0x140] sm:$0xff] }
 0xb3b   :  { %3039 = vmatpush1.msra.mxu0 %v7182_v14  ;;  %3072 = vmatprep.mubr.f32.mxu0 %v7183_v50  ;;  %v6294_v14 = vld [vmem:[#allocation10 + $0x150] sm:$0xff] }
 0xb3c   :  { %3110 = vmatpush1.msra.mxu1 %v7184_v30  ;;  %3143 = vmatprep.mubr.f32.mxu1 %v7183_v50  ;;  %v6297_v30 = vld [vmem:[#allocation10 + $0x128] sm:$0xff] }
 0xb3d   :  { %3182 = vmatprep.subr.mxu0 %v6233_v31  ;;  %3253 = vmatprep.subr.mxu1 %v6236_v34 }
 0xbdc   :  { %v2900_v18 = vpop.f32.mrf.mxu0  ;;  %v2971_v27 = vpop.f32.mrf.mxu1 }
 0xbdd   :  { %v2901_v21 = vadd.f32 %v2900_v18, %v2068_v54  ;;  %v2972_v28 = vadd.f32 %v2971_v27, %v2181_v2  ;;  %v6303_v54 = vld [vmem:[#allocation10 + $0x120] sm:$0xff]  ;;  %v6306_v18 = vld [vmem:[#allocation10 + $0x130] sm:$0xff]  ;;  %v6348_v2 = vld [vmem:[#allocation10 + $0xb8] sm:$0xff] }
 0xbde   :  { %v2902_v22 = vpop.f32.mrf.mxu0  ;;  %v2973_v35 = vpop.f32.mrf.mxu1  ;;  %v6327_v27 = vld [vmem:[#allocation10 + $0xe0] sm:$0xff] }
 0xbdf   :  { %v3935_v24 = vmul.f32 -1.442695, %v2901_v21  ;;  %v2903_v25 = vadd.f32 %v2902_v22, %v2070_v20  ;;  %v2974_v38 = vadd.f32 %v2973_v35, %v2183_v37  ;;  %v6312_v20 = vld [vmem:[#allocation10 + $0x118] sm:$0xff]  ;;  %v6315_v21 = vld [vmem:[#allocation10 + $0x100] sm:$0xff]  ;;  %v6318_v22 = vld [vmem:[#allocation10 + $0x110] sm:$0xff] }
 0xbe0   :  { %v6333_v35 = vld [vmem:[#allocation10 + $0xc8] sm:$0xff]  ;;  %v6339_v37 = vld [vmem:[#allocation10 + $0xc0] sm:$0xff] }
 0xbe1   :  { %4198 = vpow2.f32 %v3935_v24  ;;  %v3936_v4 = vmul.f32 -1.442695, %v2903_v25  ;;  %v3937_v26 = vmul.f32 -1.442695, %v2974_v38  ;;  %v6321_v24 = vld [vmem:[#allocation10 + $0xe8] sm:$0xff]  ;;  %v6324_v25 = vld [vmem:[#allocation10 + $0xf8] sm:$0xff] }
 0xbe2   :  { %v6342_v38 = vld [vmem:[#allocation10 + $0xd0] sm:$0xff] }
 0xbe3   :  { %4200 = vpow2.f32 %v3936_v4  ;;  %v6330_v4 = vld [vmem:[#allocation10 + $0xf0] sm:$0xff] }
 0xbe4   :  { %4202 = vtanh.f32 %v2972_v28  ;;  %v6351_v28 = vld [vmem:[#allocation10 + $0xa0] sm:$0xff] }
 0xbe5   :  { %4204 = vpow2.f32 %v3937_v26  ;;  %v6354_v26 = vld [vmem:[#allocation10 + $0xb0] sm:$0xff] }
 0xbe6   :  { %7192 = vst [vmem:[#allocation68_spill] sm:$0xff] %v6354_v26 }
 0xbee   :  { %v4199_v52 = vpop.eup %4198 }
 0xbef   :  { %v2979_v53 = vadd.f32 1.0, %v4199_v52  ;;  %v6357_v52 = vld [vmem:[#allocation10 + $0x88] sm:$0xff] }
 0xbf0   :  { %v4201_v51 = vpop.eup %4200  ;;  %7193 = vst [vmem:[#allocation25_spill] sm:$0xff] %v6357_v52 }
 0xbf1   :  { %4206 = vrcp.f32 %v2979_v53  ;;  %v2985_v1 = vadd.f32 1.0, %v4201_v51  ;;  %v4203_v55 = vpop.eup %4202  ;;  %v6360_v53 = vld [vmem:[#allocation10 + $0x98] sm:$0xff]  ;;  %v6363_v51 = vld [vmem:[#allocation10 + $0x80] sm:$0xff] }
 0xbf2   :  { %v4205_v32 = vpop.eup %4204  ;;  %7194 = vst [vmem:[#allocation23_spill] sm:$0xff] %v6360_v53  ;;  %7195 = vst [vmem:[#allocation45_spill] sm:$0xff] %v6363_v51 }
 0xbf3   :  { %4208 = vrcp.f32 %v2985_v1  ;;  %v2992_v56 = vadd.f32 1.0, %v4205_v32  ;;  %v6366_v1 = vld [vmem:[#allocation10 + $0x90] sm:$0xff]  ;;  %v6372_v32 = vld [vmem:[#allocation10 + $0x78] sm:$0xff] }
 0xbf4   :  { %7196 = vst [vmem:[#allocation46_spill] sm:$0xff] %v6366_v1  ;;  %7198 = vst [vmem:[#allocation47_spill] sm:$0xff] %v6372_v32 }
 0xbf5   :  { %4210 = vrcp.f32 %v2992_v56  ;;  %v6384_v56 = vld [vmem:[#allocation10 + $0x58] sm:$0xff] }
 0xbf6   :  { %7202 = vst [vmem:[#allocation16_spill] sm:$0xff] %v6384_v56 }
 0xbfe   :  { %v4207_v0 = vpop.eup %4206 }
 0xbff   :  { %v2997_v17 = vmul.f32 %v4207_v0, %v4203_v55  ;;  %v6369_v55 = vld [vmem:[#allocation10 + $0x68] sm:$0xff]  ;;  %v6375_v0 = vld [vmem:[#allocation10 + $0x60] sm:$0xff] }
 0xc00   :  { %v4209_v48 = vpop.eup %4208  ;;  %7197 = vst [vmem:[#allocation44_spill] sm:$0xff] %v6369_v55  ;;  %7199 = vst [vmem:[#allocation49_spill] sm:$0xff] %v6375_v0 }
 0xc01   :  { %v2996_v43 = vmul.f32 %v4209_v48, %v6146_v29  ;;  %v6261_v29 = vld [vmem:[#allocation10 + $0x188] sm:$0xff] }
 0xc02   :  { %v4211_v46 = vpop.eup %4210  ;;  %v6381_v48 = vld [vmem:[#allocation10 + $0x48] sm:$0xff] }
 0xc03   :  { %v6248_v8 = vadd.f32 %v2997_v17, %v2996_v43  ;;  %v6378_v17 = vld [vmem:[#allocation10 + $0x70] sm:$0xff]  ;;  %7201 = vst [vmem:[#allocation48_spill] sm:$0xff] %v6381_v48  ;;  %v6387_v43 = vld [vmem:[#allocation10 + $0x40] sm:$0xff] }
 0xc04   :  { %7200 = vst [vmem:[#allocation50_spill] sm:$0xff] %v6378_v17  ;;  %7203 = vst [vmem:[#allocation17_spill] sm:$0xff] %v6387_v43 }
 0xc05   :  { %4212 = vtanh.f32 %v6248_v8 }
 0xc12   :  { %v4213_v11 = vpop.eup %4212 }
 0xc13   :  { %v3000_v57 = vmul.f32 %v4213_v11, %v4211_v46  ;;  %v6390_v46 = vld [vmem:[#allocation10 + $0x50] sm:$0xff]  ;;  %v6393_v11 = vld [vmem:[#allocation10 + $0x28] sm:$0xff] }
 0xc14   :  { %7204 = vst [vmem:[#allocation51_spill] sm:$0xff] %v6390_v46  ;;  %7205 = vst [vmem:[#allocation38_spill] sm:$0xff] %v6393_v11 }
 0xc15   :  { %3073 = vmatmul.mubr.f32.vlgmr.msra.gmra.mxu0 %v3000_v57  ;;  %3144 = vmatmul.mubr.f32.vlgmr.msra.gmra.mxu1 %v3000_v57  ;;  %v6396_v57 = vld [vmem:[#allocation10 + $0x38] sm:$0xff] }
 0xc16   :  { %3183 = vmatpush1.msra.mxu0 %v6149_v42  ;;  %3254 = vmatpush1.msra.mxu1 %v6152_v9  ;;  %7206 = vst [vmem:[#allocation43_spill] sm:$0xff] %v6396_v57 }
 0xc17   :  { %3184 = vmatprep.subr.mxu0 %v6155_v13  ;;  %3255 = vmatprep.subr.mxu1 %v6158_v15 }
 0xc18   :  { %3185 = vmatpush1.msra.mxu0 %v6161_v33  ;;  %3256 = vmatpush1.msra.mxu1 %v6164_v45 }
 0xc19   :  { %3186 = vmatprep.subr.mxu0 %v6167_v16  ;;  %3257 = vmatprep.subr.mxu1 %v6170_v40 }
 0xc1a   :  { %3187 = vmatpush1.msra.mxu0 %v6173_v44  ;;  %3258 = vmatpush1.msra.mxu1 %v6176_v47 }
 0xc1b   :  { %3188 = vmatprep.subr.mxu0 %v6261_v29  ;;  %3259 = vmatprep.subr.mxu1 %v6264_v49 }
 0xc1c   :  { %3189 = vmatpush1.msra.mxu0 %v6267_v41  ;;  %3260 = vmatpush1.msra.mxu1 %v6270_v62 }
 0xc1d   :  { %3190 = vmatprep.subr.mxu0 %v6273_v60  ;;  %3261 = vmatprep.subr.mxu1 %v6276_v59 }
 0xc1e   :  { %3191 = vmatpush1.msra.mxu0 %v6279_v58  ;;  %3262 = vmatpush1.msra.mxu1 %v6282_v6 }
 0xc1f   :  { %3192 = vmatprep.subr.mxu0 %v6285_v5  ;;  %3263 = vmatprep.subr.mxu1 %v6288_v63 }
 0xc20   :  { %3193 = vmatpush1.msra.mxu0 %v6291_v61  ;;  %3264 = vmatpush1.msra.mxu1 %v6294_v14 }
 0xc21   :  { %3194 = vmatprep.subr.mxu0 %v6297_v30  ;;  %3265 = vmatprep.subr.mxu1 %v6300_v3 }
 0xc22   :  { %3195 = vmatpush1.msra.mxu0 %v6303_v54  ;;  %3266 = vmatpush1.msra.mxu1 %v6306_v18 }
 0xc23   :  { %3196 = vmatprep.subr.mxu0 %v6309_v19  ;;  %3267 = vmatprep.subr.mxu1 %v6312_v20 }
 0xc24   :  { %3197 = vmatpush1.msra.mxu0 %v6315_v21  ;;  %3268 = vmatpush1.msra.mxu1 %v6318_v22 }
 0xc25   :  { %3198 = vmatprep.subr.mxu0 %v6321_v24  ;;  %3269 = vmatprep.subr.mxu1 %v6324_v25 }
 0xc26   :  { %3199 = vmatpush1.msra.mxu0 %v6327_v27  ;;  %3270 = vmatpush1.msra.mxu1 %v6330_v4 }
 0xc27   :  { %3200 = vmatprep.subr.mxu0 %v6333_v35  ;;  %3271 = vmatprep.subr.mxu1 %v6336_v36 }
 0xc28   :  { %3201 = vmatpush1.msra.mxu0 %v6339_v37  ;;  %3272 = vmatpush1.msra.mxu1 %v6342_v38 }
 0xc29   :  { %3202 = vmatprep.subr.mxu0 %v6345_v39  ;;  %3273 = vmatprep.subr.mxu1 %v6348_v2 }
 0xc2a   :  { %3203 = vmatpush1.msra.mxu0 %v6351_v28  ;;  %3274 = vmatpush1.msra.mxu1 %v6354_v26 }
 0xc2b   :  { %3204 = vmatprep.subr.mxu0 %v6357_v52  ;;  %3275 = vmatprep.subr.mxu1 %v6360_v53  ;;  %v7216_v53 = vld [vmem:[#allocation35_spill] sm:$0xff] }
 0xc2c   :  { %3205 = vmatpush1.msra.mxu0 %v6363_v51  ;;  %3276 = vmatpush1.msra.mxu1 %v6366_v1 }
 0xc2d   :  { %3206 = vmatprep.subr.mxu0 %v6369_v55  ;;  %3277 = vmatprep.subr.mxu1 %v6372_v32 }
 0xc2e   :  { %3207 = vmatpush1.msra.mxu0 %v6375_v0  ;;  %3278 = vmatpush1.msra.mxu1 %v6378_v17 }
 0xc2f   :  { %3208 = vmatprep.subr.mxu0 %v6381_v48  ;;  %3279 = vmatprep.subr.mxu1 %v6384_v56  ;;  %v6399_v48 = vld [vmem:[#allocation10 + $0x20] sm:$0xff]  ;;  %v6402_v56 = vld [vmem:[#allocation10 + $0x30] sm:$0xff] }
 0xc30   :  { %3209 = vmatpush1.msra.mxu0 %v6387_v43  ;;  %3280 = vmatpush1.msra.mxu1 %v6390_v46  ;;  %7207 = vst [vmem:[#allocation26_spill] sm:$0xff] %v6399_v48  ;;  %7208 = vst [vmem:[#allocation28_spill] sm:$0xff] %v6402_v56  ;;  %v6405_v43 = vld [vmem:[#allocation10 + $0x8] sm:$0xff]  ;;  %v6408_v46 = vld [vmem:[#allocation10 + $0x18] sm:$0xff] }
 0xc31   :  { %3210 = vmatprep.subr.mxu0 %v6393_v11  ;;  %3281 = vmatprep.subr.mxu1 %v6396_v57  ;;  %7209 = vst [vmem:[#allocation29_spill] sm:$0xff] %v6405_v43  ;;  %7210 = vst [vmem:[#allocation27_spill] sm:$0xff] %v6408_v46  ;;  %v6411_v11 = vld [vmem:[#allocation10] sm:$0xff]  ;;  %v6415_v57 = vld [vmem:[#allocation10 + $0x10] sm:$0xff] }
 0xc32   :  { %3211 = vmatpush1.msra.mxu0 %v6399_v48  ;;  %3282 = vmatpush1.msra.mxu1 %v6402_v56  ;;  %7211 = vst [vmem:[#allocation53_spill] sm:$0xff] %v6411_v11  ;;  %7212 = vst [vmem:[#allocation54_spill] sm:$0xff] %v6415_v57  ;;  %v7214_v48 = vld [vmem:[#allocation36_spill] sm:$0xff] }
 0xc33   :  { %3212 = vmatprep.subr.mxu0 %v6405_v43  ;;  %3283 = vmatprep.subr.mxu1 %v6408_v46  ;;  %v7213_v43 = vld [vmem:[#allocation34_spill] sm:$0xff]  ;;  %v2076_v17 = vadd.f32 %v7214_v48, %v5970_v10 }
 0xc34   :  { %3213 = vmatpush1.msra.mxu0 %v6411_v11  ;;  %3246 = vmatprep.mubr.f32.mxu0 %v7183_v50  ;;  %v2074_v56 = vadd.f32 %v7213_v43, %v7187_v7  ;;  %v2187_v43 = vadd.f32 %v7216_v53, %v5987_v23  ;;  %v7219_v53 = vld [vmem:[#allocation23_spill] sm:$0xff] }
 0xc35   :  { %3284 = vmatpush1.msra.mxu1 %v6415_v57  ;;  %3317 = vmatprep.mubr.f32.mxu1 %v7183_v50 }
 0xc36   :  { %3356 = vmatprep.subr.mxu0 %v6233_v31  ;;  %3427 = vmatprep.subr.mxu1 %v6236_v34  ;;  %v7215_v31 = vld [vmem:[#allocation59_spill] sm:$0xff] }
 0xc37   :  { %v2189_v51 = vadd.f32 %v7215_v31, %v7141_v12 }
 0xcd5   :  { %v3074_v46 = vpop.f32.mrf.mxu0  ;;  %v3145_v1 = vpop.f32.mrf.mxu1 }
 0xcd6   :  { %v3075_v11 = vadd.f32 %v3074_v46, %v2074_v56  ;;  %v3146_v7 = vadd.f32 %v3145_v1, %v2187_v43  ;;  %v7220_v1 = vld [vmem:[#allocation45_spill] sm:$0xff]  ;;  %v7222_v43 = vld [vmem:[#allocation44_spill] sm:$0xff] }
 0xcd7   :  { %v3076_v0 = vpop.f32.mrf.mxu0  ;;  %v3147_v50 = vpop.f32.mrf.mxu1 }
 0xcd8   :  { %v3938_v32 = vmul.f32 -1.442695, %v3075_v11  ;;  %v3077_v55 = vadd.f32 %v3076_v0, %v2076_v17  ;;  %v3148_v34 = vadd.f32 %v3147_v50, %v2189_v51 }
 0xcda   :  { %4214 = vpow2.f32 %v3938_v32  ;;  %v3939_v57 = vmul.f32 -1.442695, %v3077_v55  ;;  %v3940_v52 = vmul.f32 -1.442695, %v3148_v34 }
 0xcdc   :  { %4216 = vpow2.f32 %v3939_v57  ;;  %v7221_v57 = vld [vmem:[#allocation46_spill] sm:$0xff] }
 0xcdd   :  { %4218 = vtanh.f32 %v3146_v7 }
 0xcde   :  { %4220 = vpow2.f32 %v3940_v52  ;;  %v7218_v52 = vld [vmem:[#allocation25_spill] sm:$0xff] }
 0xce7   :  { %v4215_v26 = vpop.eup %4214 }
 0xce8   :  { %v3153_v48 = vadd.f32 1.0, %v4215_v26 }
 0xce9   :  { %v4217_v56 = vpop.eup %4216 }
 0xcea   :  { %4222 = vrcp.f32 %v3153_v48  ;;  %v3159_v32 = vadd.f32 1.0, %v4217_v56  ;;  %v4219_v55 = vpop.eup %4218  ;;  %v7223_v48 = vld [vmem:[#allocation47_spill] sm:$0xff]  ;;  %v7224_v56 = vld [vmem:[#allocation49_spill] sm:$0xff] }
 0xceb   :  { %v4221_v0 = vpop.eup %4220 }
 0xcec   :  { %4224 = vrcp.f32 %v3159_v32  ;;  %v3166_v31 = vadd.f32 1.0, %v4221_v0  ;;  %v7225_v32 = vld [vmem:[#allocation50_spill] sm:$0xff]  ;;  %v7227_v0 = vld [vmem:[#allocation16_spill] sm:$0xff] }
 0xcee   :  { %4226 = vrcp.f32 %v3166_v31  ;;  %v7231_v31 = vld [vmem:[#allocation43_spill] sm:$0xff] }
 0xcf7   :  { %v4223_v17 = vpop.eup %4222 }
 0xcf8   :  { %v3171_v46 = vmul.f32 %v4223_v17, %v4219_v55  ;;  %v7226_v55 = vld [vmem:[#allocation48_spill] sm:$0xff]  ;;  %v7228_v17 = vld [vmem:[#allocation17_spill] sm:$0xff] }
 0xcf9   :  { %v4225_v11 = vpop.eup %4224 }
 0xcfa   :  { %v3170_v50 = vmul.f32 %v4225_v11, %v6248_v8  ;;  %v7217_v8 = vld [vmem:[#allocation68_spill] sm:$0xff]  ;;  %v7230_v11 = vld [vmem:[#allocation38_spill] sm:$0xff] }
 0xcfb   :  { %v4227_v34 = vpop.eup %4226 }
 0xcfc   :  { %v6430_v51 = vadd.f32 %v3171_v46, %v3170_v50  ;;  %v7229_v46 = vld [vmem:[#allocation51_spill] sm:$0xff]  ;;  %v7232_v50 = vld [vmem:[#allocation26_spill] sm:$0xff] }
 0xcfe   :  { %4228 = vtanh.f32 %v6430_v51 }
 0xd0b   :  { %v4229_v7 = vpop.eup %4228 }
 0xd0c   :  { %v3174_v26 = vmul.f32 %v4229_v7, %v4227_v34  ;;  %v7233_v34 = vld [vmem:[#allocation28_spill] sm:$0xff]  ;;  %v7234_v7 = vld [vmem:[#allocation29_spill] sm:$0xff] }
 0xd0e   :  { %3247 = vmatmul.mubr.f32.vlgmr.msra.gmra.mxu0 %v3174_v26  ;;  %3318 = vmatmul.mubr.f32.vlgmr.msra.gmra.mxu1 %v3174_v26  ;;  %v7235_v26 = vld [vmem:[#allocation27_spill] sm:$0xff] }
 0xd0f   :  { %3357 = vmatpush1.msra.mxu0 %v6149_v42  ;;  %3428 = vmatpush1.msra.mxu1 %v6152_v9 }
 0xd10   :  { %3358 = vmatprep.subr.mxu0 %v6155_v13  ;;  %3429 = vmatprep.subr.mxu1 %v6158_v15 }
 0xd11   :  { %3359 = vmatpush1.msra.mxu0 %v6161_v33  ;;  %3430 = vmatpush1.msra.mxu1 %v6164_v45 }
 0xd12   :  { %3360 = vmatprep.subr.mxu0 %v6167_v16  ;;  %3431 = vmatprep.subr.mxu1 %v6170_v40 }
 0xd13   :  { %3361 = vmatpush1.msra.mxu0 %v6173_v44  ;;  %3432 = vmatpush1.msra.mxu1 %v6176_v47 }
 0xd14   :  { %3362 = vmatprep.subr.mxu0 %v6261_v29  ;;  %3433 = vmatprep.subr.mxu1 %v6264_v49 }
 0xd15   :  { %3363 = vmatpush1.msra.mxu0 %v6267_v41  ;;  %3434 = vmatpush1.msra.mxu1 %v6270_v62 }
 0xd16   :  { %3364 = vmatprep.subr.mxu0 %v6273_v60  ;;  %3435 = vmatprep.subr.mxu1 %v6276_v59 }
 0xd17   :  { %3365 = vmatpush1.msra.mxu0 %v6279_v58  ;;  %3436 = vmatpush1.msra.mxu1 %v6282_v6 }
 0xd18   :  { %3366 = vmatprep.subr.mxu0 %v6285_v5  ;;  %3437 = vmatprep.subr.mxu1 %v6288_v63 }
 0xd19   :  { %3367 = vmatpush1.msra.mxu0 %v6291_v61  ;;  %3438 = vmatpush1.msra.mxu1 %v6294_v14 }
 0xd1a   :  { %3368 = vmatprep.subr.mxu0 %v6297_v30  ;;  %3439 = vmatprep.subr.mxu1 %v6300_v3 }
 0xd1b   :  { %3369 = vmatpush1.msra.mxu0 %v6303_v54  ;;  %3440 = vmatpush1.msra.mxu1 %v6306_v18 }
 0xd1c   :  { %3370 = vmatprep.subr.mxu0 %v6309_v19  ;;  %3441 = vmatprep.subr.mxu1 %v6312_v20 }
 0xd1d   :  { %3371 = vmatpush1.msra.mxu0 %v6315_v21  ;;  %3442 = vmatpush1.msra.mxu1 %v6318_v22 }
 0xd1e   :  { %3372 = vmatprep.subr.mxu0 %v6321_v24  ;;  %3443 = vmatprep.subr.mxu1 %v6324_v25 }
 0xd1f   :  { %3373 = vmatpush1.msra.mxu0 %v6327_v27  ;;  %3444 = vmatpush1.msra.mxu1 %v6330_v4 }
 0xd20   :  { %3374 = vmatprep.subr.mxu0 %v6333_v35  ;;  %3445 = vmatprep.subr.mxu1 %v6336_v36 }
 0xd21   :  { %3375 = vmatpush1.msra.mxu0 %v6339_v37  ;;  %3446 = vmatpush1.msra.mxu1 %v6342_v38 }
 0xd22   :  { %3376 = vmatprep.subr.mxu0 %v6345_v39  ;;  %3447 = vmatprep.subr.mxu1 %v6348_v2 }
 0xd23   :  { %3377 = vmatpush1.msra.mxu0 %v6351_v28  ;;  %3448 = vmatpush1.msra.mxu1 %v7217_v8 }
 0xd24   :  { %3378 = vmatprep.subr.mxu0 %v7218_v52  ;;  %3449 = vmatprep.subr.mxu1 %v7219_v53  ;;  %v7245_v53 = vld [vmem:[#allocation62_spill] sm:$0xff] }
 0xd25   :  { %3379 = vmatpush1.msra.mxu0 %v7220_v1  ;;  %3450 = vmatpush1.msra.mxu1 %v7221_v57 }
 0xd26   :  { %3380 = vmatprep.subr.mxu0 %v7222_v43  ;;  %3451 = vmatprep.subr.mxu1 %v7223_v48 }
 0xd27   :  { %3381 = vmatpush1.msra.mxu0 %v7224_v56  ;;  %3452 = vmatpush1.msra.mxu1 %v7225_v32  ;;  %v7236_v32 = vld [vmem:[#allocation53_spill] sm:$0xff] }
 0xd28   :  { %3382 = vmatprep.subr.mxu0 %v7226_v55  ;;  %3453 = vmatprep.subr.mxu1 %v7227_v0  ;;  %v7237_v55 = vmov 0.0   ;;  %v7238_v0 = vld [vmem:[#allocation54_spill] sm:$0xff] }
 0xd29   :  { %3383 = vmatpush1.msra.mxu0 %v7228_v17  ;;  %3454 = vmatpush1.msra.mxu1 %v7229_v46  ;;  %v7239_v46 = vld [vmem:[#allocation22_spill] sm:$0xff] }
 0xd2a   :  { %3384 = vmatprep.subr.mxu0 %v7230_v11  ;;  %3455 = vmatprep.subr.mxu1 %v7231_v31  ;;  %v7240_v11 = vld [vmem:[#allocation24_spill] sm:$0xff]  ;;  %v7241_v31 = vld [vmem:[#allocation37_spill] sm:$0xff] }
 0xd2b   :  { %3385 = vmatpush1.msra.mxu0 %v7232_v50  ;;  %3456 = vmatpush1.msra.mxu1 %v7233_v34  ;;  %v7242_v50 = vld [vmem:[#allocation61_spill] sm:$0xff] }
 0xd2c   :  { %3386 = vmatprep.subr.mxu0 %v7234_v7  ;;  %3457 = vmatprep.subr.mxu1 %v7235_v26  ;;  %v2080_v17 = vadd.f32 %v7242_v50, %v7241_v31  ;;  %v7243_v7 = vld [vmem:[#allocation60_spill] sm:$0xff]  ;;  %v2193_v50 = vadd.f32 %v7245_v53, %v5987_v23 }
 0xd2d   :  { %3387 = vmatpush1.msra.mxu0 %v7236_v32  ;;  %3420 = vmatprep.mubr.f32.mxu0 %v7237_v55  ;;  %v2082_v56 = vadd.f32 %v7243_v7, %v5970_v10 }
 0xd2e   :  { %3458 = vmatpush1.msra.mxu1 %v7238_v0  ;;  %3491 = vmatprep.mubr.f32.mxu1 %v7237_v55 }
 0xd2f   :  { %3530 = vmatprep.subr.mxu0 %v7239_v46  ;;  %3601 = vmatprep.subr.mxu1 %v7240_v11  ;;  %v7244_v46 = vld [vmem:[#allocation67_spill] sm:$0xff] }
 0xd30   :  { %v2195_v1 = vadd.f32 %v7244_v46, %v7141_v12 }
 0xdce   :  { %v3248_v34 = vpop.f32.mrf.mxu0  ;;  %v3319_v57 = vpop.f32.mrf.mxu1 }
 0xdcf   :  { %v3249_v26 = vadd.f32 %v3248_v34, %v2080_v17  ;;  %v3320_v31 = vadd.f32 %v3319_v57, %v2193_v50 }
 0xdd0   :  { %v3250_v48 = vpop.f32.mrf.mxu0  ;;  %v3321_v55 = vpop.f32.mrf.mxu1 }
 0xdd1   :  { %v3941_v32 = vmul.f32 -1.442695, %v3249_v26  ;;  %v3251_v43 = vadd.f32 %v3250_v48, %v2082_v56  ;;  %v3322_v11 = vadd.f32 %v3321_v55, %v2195_v1 }
 0xdd3   :  { %4230 = vpow2.f32 %v3941_v32  ;;  %v3942_v0 = vmul.f32 -1.442695, %v3251_v43  ;;  %v3943_v52 = vmul.f32 -1.442695, %v3322_v11 }
 0xdd5   :  { %4232 = vpow2.f32 %v3942_v0 }
 0xdd6   :  { %4234 = vtanh.f32 %v3320_v31 }
 0xdd7   :  { %4236 = vpow2.f32 %v3943_v52 }
 0xde0   :  { %v4231_v8 = vpop.eup %4230 }
 0xde1   :  { %v3327_v7 = vadd.f32 1.0, %v4231_v8 }
 0xde2   :  { %v4233_v17 = vpop.eup %4232 }
 0xde3   :  { %4238 = vrcp.f32 %v3327_v7  ;;  %v3333_v48 = vadd.f32 1.0, %v4233_v17  ;;  %v4235_v43 = vpop.eup %4234 }
 0xde4   :  { %v4237_v56 = vpop.eup %4236 }
 0xde5   :  { %4240 = vrcp.f32 %v3333_v48  ;;  %v3340_v26 = vadd.f32 1.0, %v4237_v56 }
 0xde7   :  { %4242 = vrcp.f32 %v3340_v26 }
 0xdf0   :  { %v4239_v32 = vpop.eup %4238 }
 0xdf1   :  { %v3345_v0 = vmul.f32 %v4239_v32, %v4235_v43 }
 0xdf2   :  { %v4241_v34 = vpop.eup %4240 }
 0xdf3   :  { %v3344_v1 = vmul.f32 %v4241_v34, %v6430_v51 }
 0xdf4   :  { %v4243_v8 = vpop.eup %4242 }
 0xdf5   :  { %v6508_v55 = vadd.f32 %v3345_v0, %v3344_v1 }
 0xdf7   :  { %4244 = vtanh.f32 %v6508_v55 }
 0xe04   :  { %v4245_v53 = vpop.eup %4244 }
 0xe05   :  { %v3348_v57 = vmul.f32 %v4245_v53, %v4243_v8  ;;  %v3715_v8 = vld [vmem:[#allocation11 + $0x78] sm:$0xff]  ;;  %v3714_v53 = vld [vmem:[#allocation11 + $0x70] sm:$0xff] }
 0xe07   :  { %3421 = vmatmul.mubr.f32.vlgmr.msra.gmra.mxu0 %v3348_v57  ;;  %3492 = vmatmul.mubr.f32.vlgmr.msra.gmra.mxu1 %v3348_v57  ;;  %v3713_v57 = vld [vmem:[#allocation11 + $0x68] sm:$0xff] }
 0xe08   :  { %3531 = vmatpush1.msra.mxu0 %v6149_v42  ;;  %3602 = vmatpush1.msra.mxu1 %v6152_v9  ;;  %v7246_v42 = vld [vmem:[#allocation68_spill] sm:$0xff]  ;;  %v7247_v9 = vld [vmem:[#allocation25_spill] sm:$0xff] }
 0xe09   :  { %3532 = vmatprep.subr.mxu0 %v6155_v13  ;;  %3603 = vmatprep.subr.mxu1 %v6158_v15  ;;  %v7248_v13 = vld [vmem:[#allocation23_spill] sm:$0xff]  ;;  %v7249_v15 = vld [vmem:[#allocation45_spill] sm:$0xff] }
 0xe0a   :  { %3533 = vmatpush1.msra.mxu0 %v6161_v33  ;;  %3604 = vmatpush1.msra.mxu1 %v6164_v45  ;;  %v7250_v33 = vld [vmem:[#allocation46_spill] sm:$0xff]  ;;  %v7251_v45 = vld [vmem:[#allocation44_spill] sm:$0xff] }
 0xe0b   :  { %3534 = vmatprep.subr.mxu0 %v6167_v16  ;;  %3605 = vmatprep.subr.mxu1 %v6170_v40  ;;  %v7252_v16 = vld [vmem:[#allocation47_spill] sm:$0xff]  ;;  %v7253_v40 = vld [vmem:[#allocation49_spill] sm:$0xff] }
 0xe0c   :  { %3535 = vmatpush1.msra.mxu0 %v6173_v44  ;;  %3606 = vmatpush1.msra.mxu1 %v6176_v47  ;;  %v7254_v44 = vld [vmem:[#allocation50_spill] sm:$0xff]  ;;  %v7255_v47 = vld [vmem:[#allocation48_spill] sm:$0xff] }
 0xe0d   :  { %3536 = vmatprep.subr.mxu0 %v6261_v29  ;;  %3607 = vmatprep.subr.mxu1 %v6264_v49  ;;  %v7256_v29 = vld [vmem:[#allocation16_spill] sm:$0xff]  ;;  %v7257_v49 = vld [vmem:[#allocation17_spill] sm:$0xff] }
 0xe0e   :  { %3537 = vmatpush1.msra.mxu0 %v6267_v41  ;;  %3608 = vmatpush1.msra.mxu1 %v6270_v62  ;;  %v7258_v41 = vld [vmem:[#allocation51_spill] sm:$0xff]  ;;  %v7259_v62 = vld [vmem:[#allocation38_spill] sm:$0xff] }
 0xe0f   :  { %3538 = vmatprep.subr.mxu0 %v6273_v60  ;;  %3609 = vmatprep.subr.mxu1 %v6276_v59  ;;  %v7260_v60 = vld [vmem:[#allocation43_spill] sm:$0xff]  ;;  %v7261_v59 = vld [vmem:[#allocation26_spill] sm:$0xff] }
 0xe10   :  { %3539 = vmatpush1.msra.mxu0 %v6279_v58  ;;  %3610 = vmatpush1.msra.mxu1 %v6282_v6  ;;  %v7262_v58 = vld [vmem:[#allocation28_spill] sm:$0xff]  ;;  %v7263_v6 = vld [vmem:[#allocation29_spill] sm:$0xff] }
 0xe11   :  { %3540 = vmatprep.subr.mxu0 %v6285_v5  ;;  %3611 = vmatprep.subr.mxu1 %v6288_v63  ;;  %v7264_v5 = vld [vmem:[#allocation27_spill] sm:$0xff]  ;;  %v7265_v63 = vld [vmem:[#allocation53_spill] sm:$0xff] }
 0xe12   :  { %3541 = vmatpush1.msra.mxu0 %v6291_v61  ;;  %3612 = vmatpush1.msra.mxu1 %v6294_v14  ;;  %v7266_v61 = vmov 0.0   ;;  %v7267_v14 = vld [vmem:[#allocation54_spill] sm:$0xff] }
 0xe13   :  { %3542 = vmatprep.subr.mxu0 %v6297_v30  ;;  %3613 = vmatprep.subr.mxu1 %v6300_v3  ;;  %v7268_v30 = vld [vmem:[#allocation37_spill] sm:$0xff]  ;;  %v7269_v3 = vld [vmem:[#allocation18_spill] sm:$0xff] }
 0xe14   :  { %3543 = vmatpush1.msra.mxu0 %v6303_v54  ;;  %3614 = vmatpush1.msra.mxu1 %v6306_v18  ;;  %v2086_v54 = vadd.f32 %v7269_v3, %v7268_v30 }
 0xe15   :  { %3544 = vmatprep.subr.mxu0 %v6309_v19  ;;  %3615 = vmatprep.subr.mxu1 %v6312_v20  ;;  %v7270_v19 = vld [vmem:[#allocation41_spill] sm:$0xff] }
 0xe16   :  { %3545 = vmatpush1.msra.mxu0 %v6315_v21  ;;  %3616 = vmatpush1.msra.mxu1 %v6318_v22  ;;  %v2088_v20 = vadd.f32 %v7270_v19, %v5970_v10 }
 0xe17   :  { %3546 = vmatprep.subr.mxu0 %v6321_v24  ;;  %3617 = vmatprep.subr.mxu1 %v6324_v25 }
 0xe18   :  { %3547 = vmatpush1.msra.mxu0 %v6327_v27  ;;  %3618 = vmatpush1.msra.mxu1 %v6330_v4 }
 0xe19   :  { %3548 = vmatprep.subr.mxu0 %v6333_v35  ;;  %3619 = vmatprep.subr.mxu1 %v6336_v36  ;;  %v7271_v36 = vld [vmem:[#allocation63_spill] sm:$0xff] }
 0xe1a   :  { %3549 = vmatpush1.msra.mxu0 %v6339_v37  ;;  %3620 = vmatpush1.msra.mxu1 %v6342_v38  ;;  %v2201_v37 = vadd.f32 %v7271_v36, %v7141_v12 }
 0xe1b   :  { %3550 = vmatprep.subr.mxu0 %v6345_v39  ;;  %3621 = vmatprep.subr.mxu1 %v6348_v2  ;;  %v7272_v39 = vld [vmem:[#allocation21_spill] sm:$0xff] }
 0xe1c   :  { %3551 = vmatpush1.msra.mxu0 %v6351_v28  ;;  %3622 = vmatpush1.msra.mxu1 %v7246_v42  ;;  %v2199_v2 = vadd.f32 %v7272_v39, %v5987_v23  ;;  %v3711_v42 = vld [vmem:[#allocation11 + $0x58] sm:$0xff] }
 0xe1d   :  { %3552 = vmatprep.subr.mxu0 %v7247_v9  ;;  %3623 = vmatprep.subr.mxu1 %v7248_v13  ;;  %v3710_v9 = vld [vmem:[#allocation11 + $0x50] sm:$0xff]  ;;  %v3709_v13 = vld [vmem:[#allocation11 + $0x48] sm:$0xff] }
 0xe1e   :  { %3553 = vmatpush1.msra.mxu0 %v7249_v15  ;;  %3624 = vmatpush1.msra.mxu1 %v7250_v33  ;;  %v3708_v15 = vld [vmem:[#allocation11 + $0x40] sm:$0xff]  ;;  %v3707_v33 = vld [vmem:[#allocation11 + $0x38] sm:$0xff] }
 0xe1f   :  { %3554 = vmatprep.subr.mxu0 %v7251_v45  ;;  %3625 = vmatprep.subr.mxu1 %v7252_v16  ;;  %v3717_v45 = vld [vmem:[%s6636_s9] sm:$0xf] }
 0xe20   :  { %3555 = vmatpush1.msra.mxu0 %v7253_v40  ;;  %3626 = vmatpush1.msra.mxu1 %v7254_v44  ;;  %v3716_v16 = vld [vmem:[%s6628_s1] sm:$0xff]  ;;  %v3706_v40 = vld [vmem:[#allocation11 + $0x30] sm:$0xff]  ;;  %v3705_v44 = vld [vmem:[#allocation11 + $0x28] sm:$0xff] }
 0xe21   :  { %3556 = vmatprep.subr.mxu0 %v7255_v47  ;;  %3627 = vmatprep.subr.mxu1 %v7256_v29  ;;  %v3704_v47 = vld [vmem:[#allocation11 + $0x20] sm:$0xff]  ;;  %v3703_v29 = vld [vmem:[#allocation11 + $0x18] sm:$0xff] }
 0xe22   :  { %3557 = vmatpush1.msra.mxu0 %v7257_v49  ;;  %3628 = vmatpush1.msra.mxu1 %v7258_v41  ;;  %v3702_v49 = vld [vmem:[#allocation11 + $0x10] sm:$0xff]  ;;  %v3701_v41 = vld [vmem:[#allocation11 + $0x8] sm:$0xff] }
 0xe23   :  { %3558 = vmatprep.subr.mxu0 %v7259_v62  ;;  %3629 = vmatprep.subr.mxu1 %v7260_v60  ;;  %v3700_v62 = vld [vmem:[#allocation11] sm:$0xff]  ;;  %v7273_v60 = vld [vmem:[#allocation65_spill] sm:$0xff] }
 0xe24   :  { %3559 = vmatpush1.msra.mxu0 %v7261_v59  ;;  %3630 = vmatpush1.msra.mxu1 %v7262_v58  ;;  %v2092_v59 = vadd.f32 %v7273_v60, %v7268_v30 }
 0xe25   :  { %3560 = vmatprep.subr.mxu0 %v7263_v6  ;;  %3631 = vmatprep.subr.mxu1 %v7264_v5  ;;  %v7274_v6 = vld [vmem:[#allocation64_spill] sm:$0xff] }
 0xe26   :  { %3561 = vmatpush1.msra.mxu0 %v7265_v63  ;;  %3594 = vmatprep.mubr.f32.mxu0 %v7266_v61  ;;  %v2094_v5 = vadd.f32 %v7274_v6, %v5970_v10 }
 0xe27   :  { %3632 = vmatpush1.msra.mxu1 %v7267_v14  ;;  %3665 = vmatprep.mubr.f32.mxu1 %v7266_v61 }
 0xe28   :  { %3977 = vmatprep.subr.mxu1 %v7266_v61  ;;  %3972 = vmatprep.subr.mxu0 %v7266_v61 }
 0xec7   :  { %v3422_v18 = vpop.f32.mrf.mxu0  ;;  %v3493_v27 = vpop.f32.mrf.mxu1 }
 0xec8   :  { %v3423_v21 = vadd.f32 %v3422_v18, %v2086_v54  ;;  %v3494_v28 = vadd.f32 %v3493_v27, %v2199_v2 }
 0xec9   :  { %v3424_v22 = vpop.f32.mrf.mxu0  ;;  %v3495_v35 = vpop.f32.mrf.mxu1 }
 0xeca   :  { %v3944_v24 = vmul.f32 -1.442695, %v3423_v21  ;;  %v3425_v25 = vadd.f32 %v3424_v22, %v2088_v20  ;;  %v3496_v38 = vadd.f32 %v3495_v35, %v2201_v37  ;;  %v7275_v21 = vld [vmem:[#allocation39_spill] sm:$0xff] }
 0xecc   :  { %4246 = vpow2.f32 %v3944_v24  ;;  %v3945_v4 = vmul.f32 -1.442695, %v3425_v25  ;;  %v3946_v51 = vmul.f32 -1.442695, %v3496_v38  ;;  %v7276_v24 = vld [vmem:[#allocation66_spill] sm:$0xff] }
 0xecd   :  { %v2205_v30 = vadd.f32 %v7276_v24, %v5987_v23 }
 0xece   :  { %4248 = vpow2.f32 %v3945_v4 }
 0xecf   :  { %4250 = vtanh.f32 %v3494_v28 }
 0xed0   :  { %4252 = vpow2.f32 %v3946_v51 }
 0xed9   :  { %v4247_v52 = vpop.eup %4246 }
 0xeda   :  { %v3501_v31 = vadd.f32 1.0, %v4247_v52 }
 0xedb   :  { %v4249_v46 = vpop.eup %4248 }
 0xedc   :  { %4254 = vrcp.f32 %v3501_v31  ;;  %v3507_v11 = vadd.f32 1.0, %v4249_v46  ;;  %v4251_v50 = vpop.eup %4250 }
 0xedd   :  { %v4253_v7 = vpop.eup %4252 }
 0xede   :  { %4256 = vrcp.f32 %v3507_v11  ;;  %v3514_v56 = vadd.f32 1.0, %v4253_v7 }
 0xee0   :  { %4258 = vrcp.f32 %v3514_v56 }
 0xee9   :  { %v4255_v17 = vpop.eup %4254 }
 0xeea   :  { %v3519_v48 = vmul.f32 %v4255_v17, %v4251_v50  ;;  %v3952_v17 = vld [vmem:[%s6637_s10] ss:$0 sm:$0xff] }
 0xeeb   :  { %v4257_v43 = vpop.eup %4256 }
 0xeec   :  { %v3518_v32 = vmul.f32 %v4257_v43, %v6508_v55  ;;  %v3712_v55 = vld [vmem:[#allocation11 + $0x60] sm:$0xff] }
 0xeed   :  { %v4259_v34 = vpop.eup %4258 }
 0xeee   :  { %v6586_v0 = vadd.f32 %v3519_v48, %v3518_v32 }
 0xef0   :  { %4260 = vtanh.f32 %v6586_v0 }
 0xefd   :  { %v4261_v26 = vpop.eup %4260 }
 0xefe   :  { %v3522_v1 = vmul.f32 %v4261_v26, %v4259_v34 }
 0xf00   :  { %3595 = vmatmul.mubr.f32.vlgmr.msra.gmra.mxu0 %v3522_v1  ;;  %3666 = vmatmul.mubr.f32.vlgmr.msra.gmra.mxu1 %v3522_v1 }
 0xf01   :  { %3978 = vmatpush3.msra.mxu1 %v3715_v8  ;;  %3974 = vmatprep.mubr.msk.f32.mxu0 %vm4501_vm3, %v7266_v61 }
 0xf02   :  { %3979 = vmatprep.subr.mxu1 %v7266_v61  ;;  %4009 = vmatprep.mubr.msk.f32.mxu1 %vm4501_vm3, %v7266_v61 }
 0xf03   :  { %3980 = vmatpush3.msra.mxu1 %v3714_v53  ;;  %3973 = vmatpush3.msk.msra.mxu0 %vm3722_vm2, %v3717_v45 }
 0xf04   :  { %3981 = vmatprep.subr.mxu1 %v7266_v61  ;;  %3975 = vmatmul.mubr.msk.f32.vlgmr.msra.gmra.mxu0 %vm3718_vm4, %v3716_v16 }
 0xf05   :  { %3982 = vmatpush3.msra.mxu1 %v3713_v57 }
 0xf06   :  { %3983 = vmatprep.subr.mxu1 %v7266_v61 }
 0xf07   :  { %3984 = vmatpush3.msra.mxu1 %v3712_v55 }
 0xf08   :  { %3985 = vmatprep.subr.mxu1 %v7266_v61 }
 0xf09   :  { %3986 = vmatpush3.msra.mxu1 %v3711_v42 }
 0xf0a   :  { %3987 = vmatprep.subr.mxu1 %v7266_v61 }
 0xf0b   :  { %3988 = vmatpush3.msra.mxu1 %v3710_v9 }
 0xf0c   :  { %3989 = vmatprep.subr.mxu1 %v7266_v61 }
 0xf0d   :  { %3990 = vmatpush3.msra.mxu1 %v3709_v13 }
 0xf0e   :  { %3991 = vmatprep.subr.mxu1 %v7266_v61 }
 0xf0f   :  { %3992 = vmatpush3.msra.mxu1 %v3708_v15 }
 0xf10   :  { %3993 = vmatprep.subr.mxu1 %v7266_v61 }
 0xf11   :  { %3994 = vmatpush3.msra.mxu1 %v3707_v33 }
 0xf12   :  { %3995 = vmatprep.subr.mxu1 %v7266_v61 }
 0xf13   :  { %3996 = vmatpush3.msra.mxu1 %v3706_v40 }
 0xf14   :  { %3997 = vmatprep.subr.mxu1 %v7266_v61 }
 0xf15   :  { %3998 = vmatpush3.msra.mxu1 %v3705_v44 }
 0xf16   :  { %3999 = vmatprep.subr.mxu1 %v7266_v61 }
 0xf17   :  { %4000 = vmatpush3.msra.mxu1 %v3704_v47 }
 0xf18   :  { %4001 = vmatprep.subr.mxu1 %v7266_v61 }
 0xf19   :  { %4002 = vmatpush3.msra.mxu1 %v3703_v29 }
 0xf1a   :  { %4003 = vmatprep.subr.mxu1 %v7266_v61 }
 0xf1b   :  { %4004 = vmatpush3.msra.mxu1 %v3702_v49 }
 0xf1c   :  { %4005 = vmatprep.subr.mxu1 %v7266_v61 }
 0xf1d   :  { %4006 = vmatpush3.msra.mxu1 %v3701_v41 }
 0xf1e   :  { %4007 = vmatprep.subr.mxu1 %v7266_v61  ;;  %v2207_v61 = vadd.f32 %v7275_v21, %v7141_v12 }
 0xf1f   :  { %4008 = vmatpush3.msra.mxu1 %v3700_v62 }
 0xfc0   :  { %v3596_v58 = vpop.f32.mrf.mxu0  ;;  %v3667_v18 = vpop.f32.mrf.mxu1 }
 0xfc1   :  { %v3597_v63 = vadd.f32 %v3596_v58, %v2092_v59  ;;  %v3668_v25 = vadd.f32 %v3667_v18, %v2205_v30 }
 0xfc2   :  { %v3598_v14 = vpop.f32.mrf.mxu0  ;;  %v3669_v20 = vpop.f32.mrf.mxu1 }
 0xfc3   :  { %v3947_v3 = vmul.f32 -1.442695, %v3597_v63  ;;  %v3599_v54 = vadd.f32 %v3598_v14, %v2094_v5  ;;  %v3670_v22 = vadd.f32 %v3669_v20, %v2207_v61 }
 0xfc4   :  { %v3792_v11 = vpop.f32.mrf.mxu0 }
 0xfc5   :  { %4262 = vpow2.f32 %v3947_v3  ;;  %v3948_v19 = vmul.f32 -1.442695, %v3599_v54  ;;  %v3949_v27 = vmul.f32 -1.442695, %v3670_v22 }
 0xfc6   :  { %v3976_v50 = vpop.f32.mrf.mxu0 }
 0xfc7   :  { %4264 = vpow2.f32 %v3948_v19 }
 0xfc8   :  { %4266 = vtanh.f32 %v3668_v25 }
 0xfc9   :  { %4268 = vpow2.f32 %v3949_v27 }
 0xfd2   :  { %v4263_v4 = vpop.eup %4262 }
 0xfd3   :  { %v3675_v10 = vadd.f32 1.0, %v4263_v4 }
 0xfd4   :  { %v4265_v35 = vpop.eup %4264 }
 0xfd5   :  { %4270 = vrcp.f32 %v3675_v10  ;;  %v3681_v36 = vadd.f32 1.0, %v4265_v35  ;;  %v4267_v37 = vpop.eup %4266 }
 0xfd6   :  { %v4269_v38 = vpop.eup %4268 }
 0xfd7   :  { %4272 = vrcp.f32 %v3681_v36  ;;  %v3688_v12 = vadd.f32 1.0, %v4269_v38 }
 0xfd9   :  { %4274 = vrcp.f32 %v3688_v12 }
 0xfe2   :  { %v4271_v39 = vpop.eup %4270 }
 0xfe3   :  { %v3693_v2 = vmul.f32 %v4271_v39, %v4267_v37 }
 0xfe4   :  { %v4273_v28 = vpop.eup %4272 }
 0xfe5   :  { %v3692_v51 = vmul.f32 %v4273_v28, %v6586_v0 }
 0xfe6   :  { %v4275_v23 = vpop.eup %4274 }
 0xfe7   :  { %v3694_v52 = vadd.f32 %v3693_v2, %v3692_v51 }
 0xfe9   :  { %4276 = vtanh.f32 %v3694_v52 }
 0xff6   :  { %v4277_v31 = vpop.eup %4276 }
 0xff7   :  { %v3696_v46 = vmul.f32 %v4277_v31, %v4275_v23 }
 0xff9   :  { %4010 = vmatmul.mubr.f32.vlgmr.msra.gmra.mxu1 %v3696_v46 }
0x10b9   :  { %v3862_v7 = vpop.f32.mrf.mxu1 }
0x10ba   :  { %v3863_v48 = vadd.f32 %v3862_v7, %v3792_v11 }
0x10bb   :  { %v4011_v43 = vpop.f32.mrf.mxu1 }
0x10bc   :  { %v3873_v56 = vadd.f32 %v3952_v17, %v3863_v48 }
0x10be   :  { %3874 = vst [vmem:[%s6638_s11] sm:$0xff] %v3873_v56 }
0x10bf   :  { %3879 = vsyncpa [#allocation7], 1 }
0x10c0   :  { %3880 = vsyncpa [#allocation9], 1 }
0x10c1   :  { %3881 = vsyncpa [#allocation12], 1 }

</bundles_post_ra>
